<compile_context>
chip_gen: v6e
topology: v6e:2x2x1
jax: 0.10.0
libtpu: 0.0.40
codegen_flags: <defaults>
</compile_context>

<pallas_src>
import functools

import jax
import jax.numpy as jnp
from jax.experimental import pallas as pl
from jax.experimental.pallas import tpu as pltpu


# ----------------------------------------------------------------------------
# Single fused kernel, per batch element:
#   x_t   = sa * x0 + ss * eps                     (fp32 VPU FMA)
#   h     = relu(conv3x3(x_t, w1) + (b1 + temb))   (im2col matmul, bf16 MXU)
#   pred  = conv3x3(h, w2) + b2                    (im2col matmul, bf16 MXU)
#   sse_b = sum((pred - eps)^2)                    (fused MSE partial)
# ----------------------------------------------------------------------------
def _diffusion_fused_kernel(
    sa_ref, ss_ref,            # (B,) f32 in SMEM: per-batch noising scalars
    img_ref, eps_ref,          # (1, H, W, cin) f32 in VMEM
    w1_ref, a1_ref,            # (9*cin, cmid) bf16 ; (1, 1, cmid) f32 = b1 + temb
    w2_ref, b2_ref,            # (9*cmid, cout) bf16 ; (1, cout) f32
    sse_ref,                   # (1, 1, 1) f32 out: per-batch sum of squared error
    xpad_ref, hpad_ref,        # VMEM scratch: zero-padded activations
    *, H, W, cin, cmid, cout,
):
    b = pl.program_id(0)
    sa = sa_ref[b]
    ss = ss_ref[b]

    eps = eps_ref[0]                                      # (H, W, cin) fp32
    x_t = sa * img_ref[0] + ss * eps                      # noising FMA (fp32)

    # ---- layer 1: 3x3 "same" conv as ONE im2col matmul ----------------------
    xpad_ref[...] = jnp.zeros_like(xpad_ref)              # zero borders in-kernel
    xpad_ref[1:H + 1, 1:W + 1, :] = x_t                   # interior (no wrapper pad)
    patch1 = jnp.concatenate(
        [xpad_ref[dy:dy + H, dx:dx + W, :].reshape(H * W, cin)
         for dy in range(3) for dx in range(3)],
        axis=-1)                                          # (H*W, 9*cin)
    h = jnp.dot(patch1.astype(jnp.bfloat16), w1_ref[...],
                preferred_element_type=jnp.float32)       # fp32 accumulation
    h = jnp.maximum(h + a1_ref[0], 0.0)                   # folded bias+temb, ReLU (fp32)

    # ---- layer 2 -------------------------------------------------------------
    hpad_ref[...] = jnp.zeros_like(hpad_ref)
    hpad_ref[1:H + 1, 1:W + 1, :] = h.reshape(H, W, cmid)
    patch2 = jnp.concatenate(
        [hpad_ref[dy:dy + H, dx:dx + W, :].reshape(H * W, cmid)
         for dy in range(3) for dx in range(3)],
        axis=-1)                                          # (H*W, 9*cmid)
    pred = jnp.dot(patch2.astype(jnp.bfloat16), w2_ref[...],
                   preferred_element_type=jnp.float32) + b2_ref[...]

    # ---- fused MSE partial (no HBM writeback of predicted_eps) --------------
    d = pred - eps.reshape(H * W, cin)
    sse_ref[...] = jnp.sum(d * d).reshape(1, 1, 1)


def diffusion_loss(images_nhwc, eps_nhwc, sa, ss, w1, a1, w2, b2):
    """Fused noising + eps-prediction + MSE. Returns the scalar mean loss."""
    B, H, W, cin = images_nhwc.shape
    cmid = w1.shape[-1]
    cout = w2.shape[-1]

    w1f = w1.reshape(9 * cin, cmid).astype(jnp.bfloat16)      # im2col weights, bf16
    w2f = w2.reshape(9 * cmid, cout).astype(jnp.bfloat16)
    a1r = a1.reshape(B, 1, cmid).astype(jnp.float32)          # per-batch b1 + temb
    b2r = b2.reshape(1, cout).astype(jnp.float32)

    kern = functools.partial(_diffusion_fused_kernel,
                             H=H, W=W, cin=cin, cmid=cmid, cout=cout)
    sse = pl.pallas_call(
        kern,
        out_shape=jax.ShapeDtypeStruct((B, 1, 1), jnp.float32),
        grid=(B,),
        in_specs=[
            pl.BlockSpec(memory_space=pltpu.MemorySpace.SMEM),        # sa (B,)
            pl.BlockSpec(memory_space=pltpu.MemorySpace.SMEM),        # ss (B,)
            pl.BlockSpec((1, H, W, cin), lambda b: (b, 0, 0, 0)),     # images (NHWC)
            pl.BlockSpec((1, H, W, cin), lambda b: (b, 0, 0, 0)),     # eps (NHWC)
            pl.BlockSpec((9 * cin, cmid), lambda b: (0, 0)),          # w1 im2col
            pl.BlockSpec((1, 1, cmid), lambda b: (b, 0, 0)),          # b1 + temb
            pl.BlockSpec((9 * cmid, cout), lambda b: (0, 0)),         # w2 im2col
            pl.BlockSpec((1, cout), lambda b: (0, 0)),                # b2
        ],
        out_specs=pl.BlockSpec((1, 1, 1), lambda b: (b, 0, 0)),
        scratch_shapes=[
            pltpu.VMEM((H + 2, W + 2, cin), jnp.float32),   # padded x_t
            pltpu.VMEM((H + 2, W + 2, cmid), jnp.float32),  # padded h
        ],
        compiler_params=pltpu.CompilerParams(
            dimension_semantics=("parallel",)),   # v7x: batch split across 2 TCs
    )(sa.astype(jnp.float32), ss.astype(jnp.float32),
      images_nhwc.astype(jnp.float32), eps_nhwc.astype(jnp.float32),
      w1f, a1r, w2f, b2r)

    n = B * H * W * cin
    return jnp.sum(sse) / jnp.float32(n)


# ----------------------------------------------------------------------------
# Minimal time-conditioned Unet stand-in (parameters only; compute is fused).
# TODO(synk): original `Unet(3)` architecture is not provided in Diffusion.py;
#             using a minimal 2-layer time-conditioned conv net with the same
#             I/O contract (x: (B,3,H,W), t_normal: (B,1) -> eps_hat: (B,3,H,W)).
# ----------------------------------------------------------------------------
class MiniUnetParams:
    def __init__(self, key, cin=3, cmid=16):
        k1, k2, k3 = jax.random.split(key, 3)
        self.cin, self.cmid = cin, cmid
        self.w1 = 0.1 * jax.random.normal(k1, (3, 3, cin, cmid), jnp.float32)
        self.b1 = jnp.zeros((cmid,), jnp.float32)
        self.wt = 0.1 * jax.random.normal(k2, (1, cmid), jnp.float32)
        self.bt = jnp.zeros((cmid,), jnp.float32)
        self.w2 = 0.1 * jax.random.normal(k3, (3, 3, cmid, cin), jnp.float32)
        self.b2 = jnp.zeros((cin,), jnp.float32)


# ----------------------------------------------------------------------------
# Diffusion module (training forward pass -> scalar MSE loss).
# ----------------------------------------------------------------------------
class Diffusion:
    def __init__(self, key):
        self.T = 70
        self.beta_1 = 0.05
        self.beta_T = 0.1
        t_s = jnp.arange(1, self.T + 1, dtype=jnp.float32)
        self.beta_t = (self.beta_T - self.beta_1) / (self.T - 1) * (t_s - 1) + self.beta_1
        self.sqrt_beta_t = jnp.sqrt(self.beta_t)
        self.alpha_t = 1.0 - self.beta_t
        self.alpha_t_bar = jnp.cumprod(self.alpha_t)
        self.sqrt_alpha_t_bar = jnp.sqrt(self.alpha_t_bar)
        self.sqrt_one_minus_alpha_t_bar = jnp.sqrt(1.0 - self.alpha_t_bar)
        self.c1 = 1.0 / jnp.sqrt(self.alpha_t)
        self.c2 = (1.0 - self.alpha_t) / self.sqrt_one_minus_alpha_t_bar
        self.unet = MiniUnetParams(key)

    def forward(self, images_nchw, key):
        B, C, H, W = images_nchw.shape
        kt, ke = jax.random.split(key)
        t = jax.random.randint(kt, (B, 1), 1, self.T + 1)      # torch.randint(1, T+1)
        t_normal = (t - 1).astype(jnp.float32) / (self.T - 1)

        # Layout glue: kernel runs NHWC (lane-dense channels); eps is sampled
        # directly in NHWC (iid normal). At production sizes keep data NHWC
        # end-to-end instead of transposing here.
        images = jnp.transpose(images_nchw, (0, 2, 3, 1)).astype(jnp.float32)
        eps = jax.random.normal(ke, (B, H, W, C), jnp.float32)

        idx = (t - 1).reshape(B)
        sa = self.sqrt_alpha_t_bar[idx]                        # sqrt(alpha_bar[t-1])
        ss = self.sqrt_one_minus_alpha_t_bar[idx]              # sqrt(1 - alpha_bar)

        u = self.unet
        temb = t_normal @ u.wt + u.bt                          # (B, cmid) tiny glue
        a1 = temb + u.b1                                       # fold conv1 bias in

        return diffusion_loss(images, eps, sa, ss, u.w1, a1, u.w2, u.b2)


if __name__ == "__main__":
    key = jax.random.PRNGKey(0)
    k_params, k_img, k_fwd = jax.random.split(key, 3)

    B, C, H, W = 2, 3, 16, 16
    images = jax.random.uniform(k_img, (B, C, H, W), jnp.float32)   # NCHW like PyTorch

    model = Diffusion(k_params)
    loss = model.forward(images, k_fwd)
    loss = jax.block_until_ready(loss)
    assert loss.shape == () and jnp.isfinite(loss)
    print("KERNEL_OK")
</pallas_src>

<mosaic_0001>
module attributes {stable_mosaic.version = 11 : i64} {
  func.func @_diffusion_fused_kernel(%arg0: i32, %arg1: memref<2xf32, #tpu.memory_space<smem>>, %arg2: memref<2xf32, #tpu.memory_space<smem>>, %arg3: memref<1x16x16x3xf32, #tpu.memory_space<vmem>>, %arg4: memref<1x16x16x3xf32, #tpu.memory_space<vmem>>, %arg5: memref<27x16xbf16, #tpu.memory_space<vmem>>, %arg6: memref<1x1x16xf32, #tpu.memory_space<vmem>>, %arg7: memref<144x3xbf16, #tpu.memory_space<vmem>>, %arg8: memref<1x3xf32, #tpu.memory_space<vmem>>, %arg9: memref<1x1x1xf32, #tpu.memory_space<vmem>>, %arg10: memref<18x18x3xf32, #tpu.memory_space<vmem>>, %arg11: memref<18x18x16xf32, #tpu.memory_space<vmem>>) attributes {dimension_semantics = [#tpu.dimension_semantics<parallel>], iteration_bounds = array<i64: 2>, scalar_prefetch = 0 : i64, scratch_operands = 2 : i64, tpu.core_type = #tpu.core_type<tc>, window_params = [{transform_indices = @transform_0, window_bounds = array<i64: 2>}, {transform_indices = @transform_1, window_bounds = array<i64: 2>}, {transform_indices = @transform_2, window_bounds = array<i64: 1, 16, 16, 3>}, {transform_indices = @transform_3, window_bounds = array<i64: 1, 16, 16, 3>}, {pipeline_mode = #tpu.pipeline_mode<synchronous>, transform_indices = @transform_4, window_bounds = array<i64: 27, 16>}, {transform_indices = @transform_5, window_bounds = array<i64: 1, 1, 16>}, {pipeline_mode = #tpu.pipeline_mode<synchronous>, transform_indices = @transform_6, window_bounds = array<i64: 144, 3>}, {pipeline_mode = #tpu.pipeline_mode<synchronous>, transform_indices = @transform_7, window_bounds = array<i64: 1, 3>}, {transform_indices = @transform_8, window_bounds = array<i64: 1, 1, 1>}]} {
    %0 = arith.index_cast %arg0 : i32 to index
    %1 = memref.load %arg1[%0] : memref<2xf32, #tpu.memory_space<smem>>
    %2 = arith.index_cast %arg0 : i32 to index
    %3 = memref.load %arg2[%2] : memref<2xf32, #tpu.memory_space<smem>>
    %c0 = arith.constant 0 : index
    %c0_0 = arith.constant 0 : index
    %c0_1 = arith.constant 0 : index
    %c0_2 = arith.constant 0 : index
    %4 = vector.load %arg4[%c0, %c0_0, %c0_1, %c0_2] : memref<1x16x16x3xf32, #tpu.memory_space<vmem>>, vector<1x16x16x3xf32>
    %5 = vector.shape_cast %4 : vector<1x16x16x3xf32> to vector<16x16x3xf32>
    %c0_3 = arith.constant 0 : index
    %c0_4 = arith.constant 0 : index
    %c0_5 = arith.constant 0 : index
    %c0_6 = arith.constant 0 : index
    %6 = vector.load %arg3[%c0_3, %c0_4, %c0_5, %c0_6] : memref<1x16x16x3xf32, #tpu.memory_space<vmem>>, vector<1x16x16x3xf32>
    %7 = vector.shape_cast %6 : vector<1x16x16x3xf32> to vector<16x16x3xf32>
    %8 = vector.broadcast %1 : f32 to vector<16x16x3xf32>
    %9 = arith.mulf %8, %7 : vector<16x16x3xf32>
    %10 = vector.broadcast %3 : f32 to vector<16x16x3xf32>
    %11 = arith.mulf %10, %5 : vector<16x16x3xf32>
    %12 = arith.addf %9, %11 : vector<16x16x3xf32>
    %cst = arith.constant 0.000000e+00 : f32
    %13 = vector.broadcast %cst : f32 to vector<18x18x3xf32>
    %c0_7 = arith.constant 0 : index
    %c0_8 = arith.constant 0 : index
    %c0_9 = arith.constant 0 : index
    %14 = vector.load %arg10[%c0_7, %c0_8, %c0_9] : memref<18x18x3xf32, #tpu.memory_space<vmem>>, vector<18x18x3xf32>
    tpu.vector_store %arg10[%c0_7, %c0_8, %c0_9], %13 {strides = array<i32>} : memref<18x18x3xf32, #tpu.memory_space<vmem>>, vector<18x18x3xf32>,
    %c1 = arith.constant 1 : index
    %c1_10 = arith.constant 1 : index
    %c0_11 = arith.constant 0 : index
    %15 = vector.load %arg10[%c1, %c1_10, %c0_11] : memref<18x18x3xf32, #tpu.memory_space<vmem>>, vector<16x16x3xf32>
    tpu.vector_store %arg10[%c1, %c1_10, %c0_11], %12 {strides = array<i32>} : memref<18x18x3xf32, #tpu.memory_space<vmem>>, vector<16x16x3xf32>,
    %c0_12 = arith.constant 0 : index
    %c0_13 = arith.constant 0 : index
    %c0_14 = arith.constant 0 : index
    %16 = vector.load %arg10[%c0_12, %c0_13, %c0_14] : memref<18x18x3xf32, #tpu.memory_space<vmem>>, vector<16x16x3xf32>
    %17 = vector.shape_cast %16 : vector<16x16x3xf32> to vector<256x3xf32>
    %c0_15 = arith.constant 0 : index
    %c1_16 = arith.constant 1 : index
    %c0_17 = arith.constant 0 : index
    %18 = vector.load %arg10[%c0_15, %c1_16, %c0_17] : memref<18x18x3xf32, #tpu.memory_space<vmem>>, vector<16x16x3xf32>
    %19 = vector.shape_cast %18 : vector<16x16x3xf32> to vector<256x3xf32>
    %c0_18 = arith.constant 0 : index
    %c2 = arith.constant 2 : index
    %c0_19 = arith.constant 0 : index
    %20 = vector.load %arg10[%c0_18, %c2, %c0_19] : memref<18x18x3xf32, #tpu.memory_space<vmem>>, vector<16x16x3xf32>
    %21 = vector.shape_cast %20 : vector<16x16x3xf32> to vector<256x3xf32>
    %c1_20 = arith.constant 1 : index
    %c0_21 = arith.constant 0 : index
    %c0_22 = arith.constant 0 : index
    %22 = vector.load %arg10[%c1_20, %c0_21, %c0_22] : memref<18x18x3xf32, #tpu.memory_space<vmem>>, vector<16x16x3xf32>
    %23 = vector.shape_cast %22 : vector<16x16x3xf32> to vector<256x3xf32>
    %c1_23 = arith.constant 1 : index
    %c1_24 = arith.constant 1 : index
    %c0_25 = arith.constant 0 : index
    %24 = vector.load %arg10[%c1_23, %c1_24, %c0_25] : memref<18x18x3xf32, #tpu.memory_space<vmem>>, vector<16x16x3xf32>
    %25 = vector.shape_cast %24 : vector<16x16x3xf32> to vector<256x3xf32>
    %c1_26 = arith.constant 1 : index
    %c2_27 = arith.constant 2 : index
    %c0_28 = arith.constant 0 : index
    %26 = vector.load %arg10[%c1_26, %c2_27, %c0_28] : memref<18x18x3xf32, #tpu.memory_space<vmem>>, vector<16x16x3xf32>
    %27 = vector.shape_cast %26 : vector<16x16x3xf32> to vector<256x3xf32>
    %c2_29 = arith.constant 2 : index
    %c0_30 = arith.constant 0 : index
    %c0_31 = arith.constant 0 : index
    %28 = vector.load %arg10[%c2_29, %c0_30, %c0_31] : memref<18x18x3xf32, #tpu.memory_space<vmem>>, vector<16x16x3xf32>
    %29 = vector.shape_cast %28 : vector<16x16x3xf32> to vector<256x3xf32>
    %c2_32 = arith.constant 2 : index
    %c1_33 = arith.constant 1 : index
    %c0_34 = arith.constant 0 : index
    %30 = vector.load %arg10[%c2_32, %c1_33, %c0_34] : memref<18x18x3xf32, #tpu.memory_space<vmem>>, vector<16x16x3xf32>
    %31 = vector.shape_cast %30 : vector<16x16x3xf32> to vector<256x3xf32>
    %c2_35 = arith.constant 2 : index
    %c2_36 = arith.constant 2 : index
    %c0_37 = arith.constant 0 : index
    %32 = vector.load %arg10[%c2_35, %c2_36, %c0_37] : memref<18x18x3xf32, #tpu.memory_space<vmem>>, vector<16x16x3xf32>
    %33 = vector.shape_cast %32 : vector<16x16x3xf32> to vector<256x3xf32>
    %34 = tpu.concatenate %17, %19, %21, %23, %25, %27, %29, %31, %33 in 1 : vector<256x3xf32>, vector<256x3xf32>, vector<256x3xf32>, vector<256x3xf32>, vector<256x3xf32>, vector<256x3xf32>, vector<256x3xf32>, vector<256x3xf32>, vector<256x3xf32> -> vector<256x27xf32>
    %35 = arith.truncf %34 : vector<256x27xf32> to vector<256x27xbf16>
    %c0_38 = arith.constant 0 : index
    %c0_39 = arith.constant 0 : index
    %36 = vector.load %arg5[%c0_38, %c0_39] : memref<27x16xbf16, #tpu.memory_space<vmem>>, vector<27x16xbf16>
    %cst_40 = arith.constant dense<0.000000e+00> : vector<256x16xf32>
    %37 = tpu.matmul %35, %36, %cst_40 {dimension_numbers = #tpu.dot_dimension_numbers<[1], [0], [0], [1], [0, 0, 1, 1], [], []>} : vector<256x27xbf16>, vector<27x16xbf16>, vector<256x16xf32> -> vector<256x16xf32>
    %c0_41 = arith.constant 0 : index
    %c0_42 = arith.constant 0 : index
    %c0_43 = arith.constant 0 : index
    %38 = vector.load %arg6[%c0_41, %c0_42, %c0_43] : memref<1x1x16xf32, #tpu.memory_space<vmem>>, vector<1x1x16xf32>
    %39 = vector.shape_cast %38 : vector<1x1x16xf32> to vector<1x16xf32>
    %40 = vector.broadcast %39 : vector<1x16xf32> to vector<256x16xf32>
    %41 = arith.addf %37, %40 : vector<256x16xf32>
    %cst_44 = arith.constant 0.000000e+00 : f32
    %42 = vector.broadcast %cst_44 : f32 to vector<256x16xf32>
    %43 = arith.maximumf %41, %42 : vector<256x16xf32>
    %cst_45 = arith.constant 0.000000e+00 : f32
    %44 = vector.broadcast %cst_45 : f32 to vector<18x18x16xf32>
    %c0_46 = arith.constant 0 : index
    %c0_47 = arith.constant 0 : index
    %c0_48 = arith.constant 0 : index
    %45 = vector.load %arg11[%c0_46, %c0_47, %c0_48] : memref<18x18x16xf32, #tpu.memory_space<vmem>>, vector<18x18x16xf32>
    tpu.vector_store %arg11[%c0_46, %c0_47, %c0_48], %44 {strides = array<i32>} : memref<18x18x16xf32, #tpu.memory_space<vmem>>, vector<18x18x16xf32>,
    %46 = vector.shape_cast %43 : vector<256x16xf32> to vector<16x16x16xf32>
    %c1_49 = arith.constant 1 : index
    %c1_50 = arith.constant 1 : index
    %c0_51 = arith.constant 0 : index
    %47 = vector.load %arg11[%c1_49, %c1_50, %c0_51] : memref<18x18x16xf32, #tpu.memory_space<vmem>>, vector<16x16x16xf32>
    tpu.vector_store %arg11[%c1_49, %c1_50, %c0_51], %46 {strides = array<i32>} : memref<18x18x16xf32, #tpu.memory_space<vmem>>, vector<16x16x16xf32>,
    %c0_52 = arith.constant 0 : index
    %c0_53 = arith.constant 0 : index
    %c0_54 = arith.constant 0 : index
    %48 = vector.load %arg11[%c0_52, %c0_53, %c0_54] : memref<18x18x16xf32, #tpu.memory_space<vmem>>, vector<16x16x16xf32>
    %49 = vector.shape_cast %48 : vector<16x16x16xf32> to vector<256x16xf32>
    %c0_55 = arith.constant 0 : index
    %c1_56 = arith.constant 1 : index
    %c0_57 = arith.constant 0 : index
    %50 = vector.load %arg11[%c0_55, %c1_56, %c0_57] : memref<18x18x16xf32, #tpu.memory_space<vmem>>, vector<16x16x16xf32>
    %51 = vector.shape_cast %50 : vector<16x16x16xf32> to vector<256x16xf32>
    %c0_58 = arith.constant 0 : index
    %c2_59 = arith.constant 2 : index
    %c0_60 = arith.constant 0 : index
    %52 = vector.load %arg11[%c0_58, %c2_59, %c0_60] : memref<18x18x16xf32, #tpu.memory_space<vmem>>, vector<16x16x16xf32>
    %53 = vector.shape_cast %52 : vector<16x16x16xf32> to vector<256x16xf32>
    %c1_61 = arith.constant 1 : index
    %c0_62 = arith.constant 0 : index
    %c0_63 = arith.constant 0 : index
    %54 = vector.load %arg11[%c1_61, %c0_62, %c0_63] : memref<18x18x16xf32, #tpu.memory_space<vmem>>, vector<16x16x16xf32>
    %55 = vector.shape_cast %54 : vector<16x16x16xf32> to vector<256x16xf32>
    %c1_64 = arith.constant 1 : index
    %c1_65 = arith.constant 1 : index
    %c0_66 = arith.constant 0 : index
    %56 = vector.load %arg11[%c1_64, %c1_65, %c0_66] : memref<18x18x16xf32, #tpu.memory_space<vmem>>, vector<16x16x16xf32>
    %57 = vector.shape_cast %56 : vector<16x16x16xf32> to vector<256x16xf32>
    %c1_67 = arith.constant 1 : index
    %c2_68 = arith.constant 2 : index
    %c0_69 = arith.constant 0 : index
    %58 = vector.load %arg11[%c1_67, %c2_68, %c0_69] : memref<18x18x16xf32, #tpu.memory_space<vmem>>, vector<16x16x16xf32>
    %59 = vector.shape_cast %58 : vector<16x16x16xf32> to vector<256x16xf32>
    %c2_70 = arith.constant 2 : index
    %c0_71 = arith.constant 0 : index
    %c0_72 = arith.constant 0 : index
    %60 = vector.load %arg11[%c2_70, %c0_71, %c0_72] : memref<18x18x16xf32, #tpu.memory_space<vmem>>, vector<16x16x16xf32>
    %61 = vector.shape_cast %60 : vector<16x16x16xf32> to vector<256x16xf32>
    %c2_73 = arith.constant 2 : index
    %c1_74 = arith.constant 1 : index
    %c0_75 = arith.constant 0 : index
    %62 = vector.load %arg11[%c2_73, %c1_74, %c0_75] : memref<18x18x16xf32, #tpu.memory_space<vmem>>, vector<16x16x16xf32>
    %63 = vector.shape_cast %62 : vector<16x16x16xf32> to vector<256x16xf32>
    %c2_76 = arith.constant 2 : index
    %c2_77 = arith.constant 2 : index
    %c0_78 = arith.constant 0 : index
    %64 = vector.load %arg11[%c2_76, %c2_77, %c0_78] : memref<18x18x16xf32, #tpu.memory_space<vmem>>, vector<16x16x16xf32>
    %65 = vector.shape_cast %64 : vector<16x16x16xf32> to vector<256x16xf32>
    %66 = tpu.concatenate %49, %51, %53, %55, %57, %59, %61, %63, %65 in 1 : vector<256x16xf32>, vector<256x16xf32>, vector<256x16xf32>, vector<256x16xf32>, vector<256x16xf32>, vector<256x16xf32>, vector<256x16xf32>, vector<256x16xf32>, vector<256x16xf32> -> vector<256x144xf32>
    %67 = arith.truncf %66 : vector<256x144xf32> to vector<256x144xbf16>
    %c0_79 = arith.constant 0 : index
    %c0_80 = arith.constant 0 : index
    %68 = vector.load %arg7[%c0_79, %c0_80] : memref<144x3xbf16, #tpu.memory_space<vmem>>, vector<144x3xbf16>
    %cst_81 = arith.constant dense<0.000000e+00> : vector<256x3xf32>
    %69 = tpu.matmul %67, %68, %cst_81 {dimension_numbers = #tpu.dot_dimension_numbers<[1], [0], [0], [1], [0, 0, 1, 1], [], []>} : vector<256x144xbf16>, vector<144x3xbf16>, vector<256x3xf32> -> vector<256x3xf32>
    %c0_82 = arith.constant 0 : index
    %c0_83 = arith.constant 0 : index
    %70 = vector.load %arg8[%c0_82, %c0_83] : memref<1x3xf32, #tpu.memory_space<vmem>>, vector<1x3xf32>
    %71 = vector.broadcast %70 : vector<1x3xf32> to vector<256x3xf32>
    %72 = arith.addf %69, %71 : vector<256x3xf32>
    %73 = vector.shape_cast %5 : vector<16x16x3xf32> to vector<256x3xf32>
    %74 = arith.subf %72, %73 : vector<256x3xf32>
    %75 = arith.mulf %74, %74 : vector<256x3xf32>
    %76 = vector.shape_cast %75 : vector<256x3xf32> to vector<1x256x3xf32>
    %cst_84 = arith.constant dense<0.000000e+00> : vector<1xf32>
    %77 = vector.multi_reduction <add>, %76, %cst_84 [1, 2] : vector<1x256x3xf32> to vector<1xf32>
    %78 = vector.shape_cast %77 : vector<1xf32> to vector<1x1x1xf32>
    %79 = vector.extract %78[0, 0, 0] : f32 from vector<1x1x1xf32>
    %80 = vector.broadcast %79 : f32 to vector<1x1x1xf32>
    %c0_85 = arith.constant 0 : index
    %c0_86 = arith.constant 0 : index
    %c0_87 = arith.constant 0 : index
    %81 = vector.load %arg9[%c0_85, %c0_86, %c0_87] : memref<1x1x1xf32, #tpu.memory_space<vmem>>, vector<1x1x1xf32>
    tpu.vector_store %arg9[%c0_85, %c0_86, %c0_87], %80 {strides = array<i32>} : memref<1x1x1xf32, #tpu.memory_space<vmem>>, vector<1x1x1xf32>,
    return
  }
  func.func @transform_0(%arg0: i32) -> i32 {
    %c0_i32 = arith.constant 0 : i32
    %c0_i32_0 = arith.constant 0 : i32
    return %c0_i32 : i32
  }
  func.func @transform_1(%arg0: i32) -> i32 {
    %c0_i32 = arith.constant 0 : i32
    %c0_i32_0 = arith.constant 0 : i32
    return %c0_i32 : i32
  }
  func.func @transform_2(%arg0: i32) -> (i32, i32, i32, i32) {
    %c0_i32 = arith.constant 0 : i32
    %c0_i32_0 = arith.constant 0 : i32
    %c0_i32_1 = arith.constant 0 : i32
    %c0_i32_2 = arith.constant 0 : i32
    return %arg0, %c0_i32, %c0_i32_0, %c0_i32_1 : i32, i32, i32, i32
  }
  func.func @transform_3(%arg0: i32) -> (i32, i32, i32, i32) {
    %c0_i32 = arith.constant 0 : i32
    %c0_i32_0 = arith.constant 0 : i32
    %c0_i32_1 = arith.constant 0 : i32
    %c0_i32_2 = arith.constant 0 : i32
    return %arg0, %c0_i32, %c0_i32_0, %c0_i32_1 : i32, i32, i32, i32
  }
  func.func @transform_4(%arg0: i32) -> (i32, i32) {
    %c0_i32 = arith.constant 0 : i32
    %c0_i32_0 = arith.constant 0 : i32
    %c0_i32_1 = arith.constant 0 : i32
    return %c0_i32, %c0_i32_0 : i32, i32
  }
  func.func @transform_5(%arg0: i32) -> (i32, i32, i32) {
    %c0_i32 = arith.constant 0 : i32
    %c0_i32_0 = arith.constant 0 : i32
    %c0_i32_1 = arith.constant 0 : i32
    return %arg0, %c0_i32, %c0_i32_0 : i32, i32, i32
  }
  func.func @transform_6(%arg0: i32) -> (i32, i32) {
    %c0_i32 = arith.constant 0 : i32
    %c0_i32_0 = arith.constant 0 : i32
    %c0_i32_1 = arith.constant 0 : i32
    return %c0_i32, %c0_i32_0 : i32, i32
  }
  func.func @transform_7(%arg0: i32) -> (i32, i32) {
    %c0_i32 = arith.constant 0 : i32
    %c0_i32_0 = arith.constant 0 : i32
    %c0_i32_1 = arith.constant 0 : i32
    return %c0_i32, %c0_i32_0 : i32, i32
  }
  func.func @transform_8(%arg0: i32) -> (i32, i32, i32) {
    %c0_i32 = arith.constant 0 : i32
    %c0_i32_0 = arith.constant 0 : i32
    %c0_i32_1 = arith.constant 0 : i32
    return %arg0, %c0_i32, %c0_i32_0 : i32, i32, i32
  }
}

</mosaic_0001>

<bundles_post_ra>
// kernel: tpu_custom_call.1
= control target key start
LH: loop header
LB: loop body
LE: loop exit
PB: predicated region body
PF: predicated region fallthrough
CT: control target
= control target key end

     0   :  { %13 = vsyncpa [#allocation5], 0  ;;  %s8430_s0 = inlined_call_operand.vmem [shape: f32[2], index: 0, kind: input, shape index: {}]   ;;  %s8431_s1 = inlined_call_operand.vmem [shape: f32[2], index: 1, kind: input, shape index: {}]   ;;  %s8432_s2 = inlined_call_operand.vmem [shape: f32[2,16,16,3], index: 2, kind: input, shape index: {}]   ;;  %s8433_s3 = inlined_call_operand.vmem [shape: f32[2,16,16,3], index: 3, kind: input, shape index: {}]   ;;  %s8434_s4 = inlined_call_operand.vmem [shape: bf16[27,16], index: 4, kind: input, shape index: {}]   ;;  %s8435_s5 = inlined_call_operand.vmem [shape: f32[2,1,16], index: 5, kind: input, shape index: {}]   ;;  %s8436_s6 = inlined_call_operand.vmem [shape: bf16[144,3], index: 6, kind: input, shape index: {}]   ;;  %s8437_s7 = inlined_call_operand.vmem [shape: f32[1,3], index: 7, kind: input, shape index: {}]   ;;  %s8438_s8 = inlined_call_operand.vmem [shape: f32[2,1,1], index: 8, kind: output, shape index: {}]  }
   0x1   :  { %14 = vsyncpa [#allocation7], 0  ;;  %s6078_s27 = smov 0  }
   0x2 LB: > { %s6084_s28 = sadd.s32 4294967295, %s6011_s27   ;;  %p4535_p0 = scmp.ge.s32.totalorder %s6011_s27, 1  ;;  %s6011_s27 = sphi %s6078_s27, %s20_s27  }
   0x3   : > { %p234_p1 = scmp.lt.s32.totalorder %s6011_s27, 3  ;;  %s247_s9 = sshll.u32 %s8430_s0, 4  ;;  %s248_s9 = int_to_ptr.vmem [resolvable:$true] %s247_s9 }
   0x4   : > { %p8439_p3 = scmp.eq.s32.totalorder %s6084_s28, 0  ;;  %s258_s13 = sshll.u32 %s8431_s1, 4  ;;  %s259_s13 = int_to_ptr.vmem [resolvable:$true] %s258_s13 }
   0x5   : > { %p6091_p2 = pnand %p4535_p0, %p234_p1  ;;  %s5967_s15 = scalar_lea.vmem %s248_s9, 16 }
   0x6   : > { %p5968_p6 = scmp.ne.s32.totalorder %s248_s9, %s5967_s15  ;;  %p5975_p10 = scmp.lt.s32.totalorder %s248_s9, %s248_s9 }
   0x7   : > { %s8463_s10 = scalar_select %p6091_p2, 1, 0 }
   0x8   : > { %p4677_p4 = pneg %p6091_p2  ;;  %p5976_p11 = scmp.lt.s32.totalorder %s5967_s15, %s5967_s15 }
   0xa   : > { %p6103_p5 = pnand %p8439_p3, %p4677_p4  ;;  %p5977_p12 = por %p5976_p11, %p5975_p10 }
   0xc   : > { %p5969_p7 = pneg %p6103_p5 }
   0xe   : > { %p5970_p8 = pnand %p5969_p7, %p5968_p6 }
  0x10   : > { %p5971_p9 = pneg %p5970_p8 }
  0x12   : > { %p5978_p13 = pnand %p5977_p12, %p5971_p9 }
  0x14   : > { %5981 = shalt.err (!%p5978_p13)
}
  0x15   : > { %s6013_s16 = smov [#allocation4]   ;;  %s5982_s17 = scalar_lea.vmem %s259_s13, 16 }
  0x16   : > { %4680 = dma.vmem_to_smem (!%p6103_p5), %s248_s9, 16, %s6013_s16, [#allocation5]  }
  0x17   : > { %p5983_p0 = scmp.ne.s32.totalorder %s259_s13, %s5982_s17  ;;  %p5990_p3 = scmp.lt.s32.totalorder %s259_s13, %s259_s13 }
  0x18   : > { %p5991_p2 = scmp.lt.s32.totalorder %s5982_s17, %s5982_s17 }
  0x19   : > { %p5985_p1 = pnand %p5983_p0, %p5969_p7 }
  0x1a   : > { %p5992_p6 = por %p5991_p2, %p5990_p3 }
  0x1b   : > { %p5986_p4 = pneg %p5985_p1 }
  0x1d   : > { %p5993_p8 = pnand %p5992_p6, %p5986_p4 }
  0x1f   : > { %5996 = shalt.err (!%p5993_p8)
}
  0x20   : > { %s6014_s18 = smov [#allocation6]   ;;  %p8465_p9 = scmp.ne.s32.totalorder %s8463_s10, 0 }
  0x21   : > { %4683 = dma.vmem_to_smem (!%p6103_p5), %s259_s13, 16, %s6014_s18, [#allocation7]  }
  0x22   : > { %302 = sbr.rel (%p8465_p9) target bundleno = 1317 (0x525), region = 52 }
  0x27   : > { %p8466_p10 = scmp.eq.s32.totalorder %s6084_s28, 0 }
  0x29   : > { %6002 = dma.done.wait (%p8466_p10), [#allocation5], 16   ;;  %p8467_p11 = pmov %p8466_p10 }
  0x2a   : > { %p8468_p7 = pmov %p8466_p10 }
  0x2b   : > { %6004 = vsyncadd (%p8467_p11), [#allocation5], 4294967280 }
  0x2c   : > { %6006 = dma.done.wait (%p8468_p7), [#allocation7], 16   ;;  %p8469_p2 = pmov %p8468_p7 }
  0x2e   : > { %6008 = vsyncadd (%p8469_p2), [#allocation7], 4294967280 }
  0x2f   : > { %312 = sfence }
  0x30   : > { %vm528_vm0 = vcmask 23552   ;;  %vm531_vm1 = vcmask 17408   ;;  %p347_p3 = scmp.lt.s32.totalorder %s6084_s28, 1  ;;  %v8441_v0 = vmov 0.0   ;;  %s364_s19 = sld [smem:[#allocation4 + %s6084_s28]]  ;;  %vm2280_vm2 = vcmask 1044480  }
  0x31   : > { %529 = vst.msk [vmem:[#allocation2] sm:$0xff] %vm528_vm0, %v8441_v0  ;;  %530 = vst.msk [vmem:[#allocation2 + $0x8] sm:$0xff] %vm528_vm0, %v8441_v0  ;;  %s365_s21 = sld [smem:[#allocation6 + %s6084_s28]]  ;;  %s6017_s9 = smov 6   ;;  %vm2281_vm3 = vcmask 1045504   ;;  %vm1962_vm4 = vcmask 48128  }
  0x32   : > { %532 = vst.msk [vmem:[#allocation2 + $0x10] sm:$0x3] %vm531_vm1, %v8441_v0  ;;  %535 = vst.msk [vmem:[#allocation2 + $0x28] sm:$0x3] %vm531_vm1, %v8441_v0  ;;  %s6236_s20 = scalar_select %p347_p3, %s6084_s28, 1  ;;  %vm1995_vm5 = vcmask 72704  }
  0x33   : > { %533 = vst.msk [vmem:[#allocation2 + $0x18] sm:$0xff] %vm528_vm0, %v8441_v0  ;;  %534 = vst.msk [vmem:[#allocation2 + $0x20] sm:$0xff] %vm528_vm0, %v8441_v0  ;;  %s6016_s28 = smov 3   ;;  %s6018_s10 = smov 9   ;;  %vm2028_vm6 = vcmask 97280   ;;  %vm2061_vm7 = vcmask 121856  }
  0x34   : > { %536 = vst.msk [vmem:[#allocation2 + $0x30] sm:$0xff] %vm528_vm0, %v8441_v0  ;;  %537 = vst.msk [vmem:[#allocation2 + $0x38] sm:$0xff] %vm528_vm0, %v8441_v0  ;;  %s4593_s22 = sshll.u32 %s6236_s20, 8  ;;  %s6019_s11 = smov 12   ;;  %vm2094_vm8 = vcmask 146432   ;;  %vm2127_vm9 = vcmask 171008  }
  0x35   : > { %538 = vst.msk [vmem:[#allocation2 + $0x40] sm:$0x3] %vm531_vm1, %v8441_v0  ;;  %541 = vst.msk [vmem:[#allocation2 + $0x58] sm:$0x3] %vm531_vm1, %v8441_v0  ;;  %s6243_s25 = scalar_lea.vmem %s8432_s2, %s4593_s22  ;;  %s6248_s30 = scalar_lea.vmem %s8433_s3, %s4593_s22  ;;  %vm2160_vm10 = vcmask 195584   ;;  %vm2231_vm11 = vcmask 220160  }
  0x36   : > { %539 = vst.msk [vmem:[#allocation2 + $0x48] sm:$0xff] %vm528_vm0, %v8441_v0  ;;  %540 = vst.msk [vmem:[#allocation2 + $0x50] sm:$0xff] %vm528_vm0, %v8441_v0  ;;  %v368_v1 = vld [vmem:[%s6248_s30 + $0x10] sm:$0xff]  ;;  %v369_v2 = vld [vmem:[%s6248_s30 + $0x18] sm:$0xff]  ;;  %v6254_v5 = vstv %s364_s19  ;;  %s6021_s14 = smov 15   ;;  %s6022_s17 = smov 18  }
  0x37   : > { %542 = vst.msk [vmem:[#allocation2 + $0x60] sm:$0xff] %vm528_vm0, %v8441_v0  ;;  %543 = vst.msk [vmem:[#allocation2 + $0x68] sm:$0xff] %vm528_vm0, %v8441_v0  ;;  %v400_v3 = vld [vmem:[%s6243_s25 + $0x10] sm:$0xff]  ;;  %v401_v4 = vld [vmem:[%s6243_s25 + $0x18] sm:$0xff]  ;;  %v6261_v14 = vstv %s365_s21  ;;  %s6023_s18 = smov 21   ;;  %s6024_s19 = smov 24  }
  0x38   : > { %544 = vst.msk [vmem:[#allocation2 + $0x70] sm:$0x3] %vm531_vm1, %v8441_v0  ;;  %547 = vst.msk [vmem:[#allocation2 + $0x88] sm:$0x3] %vm531_vm1, %v8441_v0  ;;  %v366_v6 = vld [vmem:[%s6248_s30] sm:$0xff]  ;;  %v367_v7 = vld [vmem:[%s6248_s30 + $0x8] sm:$0xff]  ;;  %v433_v10 = vmul.f32 %v6254_v5, %v400_v3  ;;  %v434_v11 = vmul.f32 %v6254_v5, %v401_v4  ;;  %v466_v19 = vmul.f32 %v6261_v14, %v368_v1 }
  0x39   : > { %545 = vst.msk [vmem:[#allocation2 + $0x78] sm:$0xff] %vm528_vm0, %v8441_v0  ;;  %546 = vst.msk [vmem:[#allocation2 + $0x80] sm:$0xff] %vm528_vm0, %v8441_v0  ;;  %v649_v8 = vld [vmem:[#allocation2 + $0x1] sm:$0xff]  ;;  %v650_v9 = vld [vmem:[#allocation2 + $0x9] sm:$0xff]  ;;  %v467_v20 = vmul.f32 %v6261_v14, %v369_v2  ;;  %v464_v22 = vmul.f32 %v6261_v14, %v366_v6  ;;  %v465_v26 = vmul.f32 %v6261_v14, %v367_v7  ;;  %vm2480_vm12 = vcmask 130048   ;;  %s6025_s21 = smov 16  }
  0x3a   : > { %548 = vst.msk [vmem:[#allocation2 + $0x90] sm:$0xff] %vm528_vm0, %v8441_v0  ;;  %549 = vst.msk [vmem:[#allocation2 + $0x98] sm:$0xff] %vm528_vm0, %v8441_v0  ;;  %v398_v12 = vld [vmem:[%s6243_s25] sm:$0xff]  ;;  %v4716_v13 = vpack.i.bf16 %v650_v9, %v649_v8  ;;  %v399_v15 = vld [vmem:[%s6243_s25 + $0x8] sm:$0xff]  ;;  %v498_v33 = vadd.f32 %v466_v19, %v433_v10  ;;  %vm2483_vm13 = vcmask 123904   ;;  %s6026_s22 = smov 32  }
  0x3b   : > { %550 = vst.msk [vmem:[#allocation2 + $0xa0] sm:$0x3] %vm531_vm1, %v8441_v0  ;;  %553 = vst.msk [vmem:[#allocation2 + $0xb8] sm:$0x3] %vm531_vm1, %v8441_v0  ;;  %v431_v16 = vmul.f32 %v6254_v5, %v398_v12  ;;  %v370_v17 = vld [vmem:[%s6248_s30 + $0x20] sm:$0xff]  ;;  %v371_v18 = vld [vmem:[%s6248_s30 + $0x28] sm:$0xff]  ;;  %v432_v21 = vmul.f32 %v6254_v5, %v399_v15  ;;  %v499_v34 = vadd.f32 %v467_v20, %v434_v11 }
  0x3c   : > { %551 = vst.msk [vmem:[#allocation2 + $0xa8] sm:$0xff] %vm528_vm0, %v8441_v0  ;;  %552 = vst.msk [vmem:[#allocation2 + $0xb0] sm:$0xff] %vm528_vm0, %v8441_v0  ;;  %v402_v23 = vld [vmem:[%s6243_s25 + $0x20] sm:$0xff]  ;;  %v403_v24 = vld [vmem:[%s6243_s25 + $0x28] sm:$0xff]  ;;  %4717 = vrot.lane.b32.xlu0 %v4716_v13, %s6016_s28  ;;  %v468_v29 = vmul.f32 %v6261_v14, %v370_v17  ;;  %v469_v36 = vmul.f32 %v6261_v14, %v371_v18  ;;  %s6029_s13 = smov 112   ;;  %s6030_s16 = smov 48  }
  0x3d   : > { %554 = vst.msk [vmem:[#allocation2 + $0xc0] sm:$0xff] %vm528_vm0, %v8441_v0  ;;  %555 = vst.msk [vmem:[#allocation2 + $0xc8] sm:$0xff] %vm528_vm0, %v8441_v0  ;;  %v372_v25 = vld [vmem:[%s6248_s30 + $0x30] sm:$0xff]  ;;  %v435_v27 = vmul.f32 %v6254_v5, %v402_v23  ;;  %v436_v28 = vmul.f32 %v6254_v5, %v403_v24  ;;  %v373_v30 = vld [vmem:[%s6248_s30 + $0x38] sm:$0xff]  ;;  %v496_v35 = vadd.f32 %v464_v22, %v431_v16  ;;  %vm3786_vm14 = vcmask 261120  }
  0x3e   : > { %556 = vst.msk [vmem:[#allocation2 + $0xd0] sm:$0x3] %vm531_vm1, %v8441_v0  ;;  %559 = vst.msk [vmem:[#allocation2 + $0xe8] sm:$0x3] %vm531_vm1, %v8441_v0  ;;  %v404_v31 = vld [vmem:[%s6243_s25 + $0x30] sm:$0xff]  ;;  %v405_v32 = vld [vmem:[%s6243_s25 + $0x38] sm:$0xff]  ;;  %v497_v40 = vadd.f32 %v465_v26, %v432_v21  ;;  %v470_v48 = vmul.f32 %v6261_v14, %v372_v25  ;;  %v471_v49 = vmul.f32 %v6261_v14, %v373_v30 }
  0x3f   : > { %557 = vst.msk [vmem:[#allocation2 + $0xd8] sm:$0xff] %vm528_vm0, %v8441_v0  ;;  %558 = vst.msk [vmem:[#allocation2 + $0xe0] sm:$0xff] %vm528_vm0, %v8441_v0  ;;  %v374_v37 = vld [vmem:[%s6248_s30 + $0x40] sm:$0xff]  ;;  %v375_v38 = vld [vmem:[%s6248_s30 + $0x48] sm:$0xff]  ;;  %v500_v41 = vadd.f32 %v468_v29, %v435_v27  ;;  %v437_v42 = vmul.f32 %v6254_v5, %v404_v31  ;;  %v438_v43 = vmul.f32 %v6254_v5, %v405_v32  ;;  %vm3819_vm15 = vcmask 392192  }
  0x40   : > { %560 = vst.msk [vmem:[#allocation2 + $0xf0] sm:$0xff] %vm528_vm0, %v8441_v0  ;;  %561 = vst.msk [vmem:[#allocation2 + $0xf8] sm:$0xff] %vm528_vm0, %v8441_v0  ;;  %v406_v39 = vld [vmem:[%s6243_s25 + $0x40] sm:$0xff]  ;;  %v407_v44 = vld [vmem:[%s6243_s25 + $0x48] sm:$0xff]  ;;  %v501_v47 = vadd.f32 %v469_v36, %v436_v28  ;;  %v472_v55 = vmul.f32 %v6261_v14, %v374_v37  ;;  %v473_v56 = vmul.f32 %v6261_v14, %v375_v38 }
  0x41   : > { %562 = vst.msk [vmem:[#allocation2 + $0x100] sm:$0x3] %vm531_vm1, %v8441_v0  ;;  %565 = vst.msk [vmem:[#allocation2 + $0x118] sm:$0x3] %vm531_vm1, %v8441_v0  ;;  %v376_v45 = vld [vmem:[%s6248_s30 + $0x50] sm:$0xff]  ;;  %v377_v46 = vld [vmem:[%s6248_s30 + $0x58] sm:$0xff]  ;;  %v439_v50 = vmul.f32 %v6254_v5, %v406_v39  ;;  %v440_v54 = vmul.f32 %v6254_v5, %v407_v44  ;;  %v502_v61 = vadd.f32 %v470_v48, %v437_v42 }
  0x42   : > { %563 = vst.msk [vmem:[#allocation2 + $0x108] sm:$0xff] %vm528_vm0, %v8441_v0  ;;  %564 = vst.msk [vmem:[#allocation2 + $0x110] sm:$0xff] %vm528_vm0, %v8441_v0  ;;  %v408_v51 = vld [vmem:[%s6243_s25 + $0x50] sm:$0xff]  ;;  %v409_v52 = vld [vmem:[%s6243_s25 + $0x58] sm:$0xff]  ;;  %v503_v62 = vadd.f32 %v471_v49, %v438_v43  ;;  %v474_v1 = vmul.f32 %v6261_v14, %v376_v45  ;;  %v475_v8 = vmul.f32 %v6261_v14, %v377_v46 }
  0x43   : > { %566 = vst.msk [vmem:[#allocation2 + $0x120] sm:$0xff] %vm528_vm0, %v8441_v0  ;;  %567 = vst.msk [vmem:[#allocation2 + $0x128] sm:$0xff] %vm528_vm0, %v8441_v0  ;;  %v378_v53 = vld [vmem:[%s6248_s30 + $0x60] sm:$0xff]  ;;  %v441_v57 = vmul.f32 %v6254_v5, %v408_v51  ;;  %v379_v58 = vld [vmem:[%s6248_s30 + $0x68] sm:$0xff]  ;;  %v442_v63 = vmul.f32 %v6254_v5, %v409_v52  ;;  %v504_v6 = vadd.f32 %v472_v55, %v439_v50 }
  0x44   : > { %568 = vst.msk [vmem:[#allocation2 + $0x130] sm:$0x3] %vm531_vm1, %v8441_v0  ;;  %571 = vst.msk [vmem:[#allocation2 + $0x148] sm:$0x3] %vm531_vm1, %v8441_v0  ;;  %v410_v59 = vld [vmem:[%s6243_s25 + $0x60] sm:$0xff]  ;;  %v411_v60 = vld [vmem:[%s6243_s25 + $0x68] sm:$0xff]  ;;  %v505_v7 = vadd.f32 %v473_v56, %v440_v54  ;;  %v476_v16 = vmul.f32 %v6261_v14, %v378_v53  ;;  %v477_v17 = vmul.f32 %v6261_v14, %v379_v58 }
  0x45   : > { %569 = vst.msk [vmem:[#allocation2 + $0x138] sm:$0xff] %vm528_vm0, %v8441_v0  ;;  %570 = vst.msk [vmem:[#allocation2 + $0x140] sm:$0xff] %vm528_vm0, %v8441_v0  ;;  %v380_v2 = vld [vmem:[%s6248_s30 + $0x70] sm:$0xff]  ;;  %v381_v3 = vld [vmem:[%s6248_s30 + $0x78] sm:$0xff]  ;;  %v443_v9 = vmul.f32 %v6254_v5, %v410_v59  ;;  %v506_v13 = vadd.f32 %v474_v1, %v441_v57  ;;  %v444_v15 = vmul.f32 %v6254_v5, %v411_v60 }
  0x46   : > { %572 = vst.msk [vmem:[#allocation2 + $0x150] sm:$0xff] %vm528_vm0, %v8441_v0  ;;  %573 = vst.msk [vmem:[#allocation2 + $0x158] sm:$0xff] %vm528_vm0, %v8441_v0  ;;  %v412_v4 = vld [vmem:[%s6243_s25 + $0x70] sm:$0xff]  ;;  %v413_v10 = vld [vmem:[%s6243_s25 + $0x78] sm:$0xff]  ;;  %v507_v21 = vadd.f32 %v475_v8, %v442_v63  ;;  %v478_v24 = vmul.f32 %v6261_v14, %v380_v2  ;;  %v479_v30 = vmul.f32 %v6261_v14, %v381_v3 }
  0x47   : > { %574 = vst.msk [vmem:[#allocation2 + $0x160] sm:$0x3] %vm531_vm1, %v8441_v0  ;;  %577 = vst.msk [vmem:[#allocation2 + $0x178] sm:$0x3] %vm531_vm1, %v8441_v0  ;;  %v382_v11 = vld [vmem:[%s6248_s30 + $0x80] sm:$0xff]  ;;  %v383_v12 = vld [vmem:[%s6248_s30 + $0x88] sm:$0xff]  ;;  %v445_v22 = vmul.f32 %v6254_v5, %v412_v4  ;;  %v446_v23 = vmul.f32 %v6254_v5, %v413_v10  ;;  %v508_v28 = vadd.f32 %v476_v16, %v443_v9 }
  0x48   : > { %575 = vst.msk [vmem:[#allocation2 + $0x168] sm:$0xff] %vm528_vm0, %v8441_v0  ;;  %576 = vst.msk [vmem:[#allocation2 + $0x170] sm:$0xff] %vm528_vm0, %v8441_v0  ;;  %v414_v18 = vld [vmem:[%s6243_s25 + $0x80] sm:$0xff]  ;;  %v415_v19 = vld [vmem:[%s6243_s25 + $0x88] sm:$0xff]  ;;  %v509_v29 = vadd.f32 %v477_v17, %v444_v15 }
  0x49   : > { %578 = vst.msk [vmem:[#allocation2 + $0x180] sm:$0xff] %vm528_vm0, %v8441_v0  ;;  %579 = vst.msk [vmem:[#allocation2 + $0x188] sm:$0xff] %vm528_vm0, %v8441_v0  ;;  %v384_v20 = vld [vmem:[%s6248_s30 + $0x90] sm:$0xff]  ;;  %v385_v25 = vld [vmem:[%s6248_s30 + $0x98] sm:$0xff]  ;;  %v447_v31 = vmul.f32 %v6254_v5, %v414_v18  ;;  %v510_v38 = vadd.f32 %v478_v24, %v445_v22  ;;  %v448_v39 = vmul.f32 %v6254_v5, %v415_v19 }
  0x4a   : > { %580 = vst.msk [vmem:[#allocation2 + $0x190] sm:$0x3] %vm531_vm1, %v8441_v0  ;;  %583 = vst.msk [vmem:[#allocation2 + $0x1a8] sm:$0x3] %vm531_vm1, %v8441_v0  ;;  %v416_v26 = vld [vmem:[%s6243_s25 + $0x90] sm:$0xff]  ;;  %v417_v27 = vld [vmem:[%s6243_s25 + $0x98] sm:$0xff]  ;;  %v511_v45 = vadd.f32 %v479_v30, %v446_v23  ;;  %v482_v53 = vmul.f32 %v6261_v14, %v384_v20  ;;  %v483_v57 = vmul.f32 %v6261_v14, %v385_v25 }
  0x4b   : > { %581 = vst.msk [vmem:[#allocation2 + $0x198] sm:$0xff] %vm528_vm0, %v8441_v0  ;;  %582 = vst.msk [vmem:[#allocation2 + $0x1a0] sm:$0xff] %vm528_vm0, %v8441_v0  ;;  %v386_v32 = vld [vmem:[%s6248_s30 + $0xa0] sm:$0xff]  ;;  %v449_v46 = vmul.f32 %v6254_v5, %v416_v26  ;;  %v419_v48 = vld [vmem:[%s6243_s25 + $0xa8] sm:$0xff]  ;;  %vm3852_vm1 = vcmask 523264  }
  0x4c   : > { %587 = vst.msk [vmem:[#allocation2 + $0x31] sm:$0xff] %vm528_vm0, %v498_v33  ;;  %588 = vst.msk [vmem:[#allocation2 + $0x39] sm:$0xff] %vm528_vm0, %v499_v34  ;;  %v387_v33 = vld [vmem:[%s6248_s30 + $0xa8] sm:$0xff]  ;;  %v418_v34 = vld [vmem:[%s6243_s25 + $0xa0] sm:$0xff]  ;;  %v452_v59 = vmul.f32 %v6254_v5, %v419_v48  ;;  %v484_v3 = vmul.f32 %v6261_v14, %v386_v32 }
  0x4d   : > { %585 = vst.msk [vmem:[#allocation2 + $0x19] sm:$0xff] %vm528_vm0, %v496_v35  ;;  %586 = vst.msk [vmem:[#allocation2 + $0x21] sm:$0xff] %vm528_vm0, %v497_v40  ;;  %v480_v40 = vmul.f32 %v6261_v14, %v382_v11  ;;  %v388_v54 = vld [vmem:[%s6248_s30 + $0xb0] sm:$0xff]  ;;  %v389_v55 = vld [vmem:[%s6248_s30 + $0xb8] sm:$0xff]  ;;  %v451_v58 = vmul.f32 %v6254_v5, %v418_v34  ;;  %v514_v2 = vadd.f32 %v482_v53, %v449_v46 }
  0x4e   : > { %589 = vst.msk [vmem:[#allocation2 + $0x49] sm:$0xff] %vm528_vm0, %v500_v41  ;;  %590 = vst.msk [vmem:[#allocation2 + $0x51] sm:$0xff] %vm528_vm0, %v501_v47  ;;  %v481_v41 = vmul.f32 %v6261_v14, %v383_v12  ;;  %v450_v47 = vmul.f32 %v6254_v5, %v417_v27  ;;  %v420_v60 = vld [vmem:[%s6243_s25 + $0xb0] sm:$0xff]  ;;  %v485_v4 = vmul.f32 %v6261_v14, %v387_v33  ;;  %v422_v15 = vld [vmem:[%s6243_s25 + $0xc0] sm:$0xff] }
  0x4f   : > { %591 = vst.msk [vmem:[#allocation2 + $0x61] sm:$0xff] %vm528_vm0, %v502_v61  ;;  %592 = vst.msk [vmem:[#allocation2 + $0x69] sm:$0xff] %vm528_vm0, %v503_v62  ;;  %v512_v51 = vadd.f32 %v480_v40, %v447_v31  ;;  %v421_v61 = vld [vmem:[%s6243_s25 + $0xb8] sm:$0xff]  ;;  %v390_v62 = vld [vmem:[%s6248_s30 + $0xc0] sm:$0xff]  ;;  %v516_v18 = vadd.f32 %v484_v3, %v451_v58  ;;  %v487_v20 = vmul.f32 %v6261_v14, %v389_v55 }
  0x50   : > { %593 = vst.msk [vmem:[#allocation2 + $0x79] sm:$0xff] %vm528_vm0, %v504_v6  ;;  %594 = vst.msk [vmem:[#allocation2 + $0x81] sm:$0xff] %vm528_vm0, %v505_v7  ;;  %v513_v52 = vadd.f32 %v481_v41, %v448_v39  ;;  %v453_v6 = vmul.f32 %v6254_v5, %v420_v60  ;;  %v391_v7 = vld [vmem:[%s6248_s30 + $0xc8] sm:$0xff]  ;;  %v515_v11 = vadd.f32 %v483_v57, %v450_v47  ;;  %v392_v22 = vld [vmem:[%s6248_s30 + $0xd0] sm:$0xff] }
  0x51   : > { %595 = vst.msk [vmem:[#allocation2 + $0x91] sm:$0xff] %vm528_vm0, %v506_v13  ;;  %596 = vst.msk [vmem:[#allocation2 + $0x99] sm:$0xff] %vm528_vm0, %v507_v21  ;;  %v454_v12 = vmul.f32 %v6254_v5, %v421_v61  ;;  %v486_v13 = vmul.f32 %v6261_v14, %v388_v54  ;;  %v517_v19 = vadd.f32 %v485_v4, %v452_v59  ;;  %v423_v21 = vld [vmem:[%s6243_s25 + $0xc8] sm:$0xff]  ;;  %v394_v41 = vld [vmem:[%s6248_s30 + $0xe0] sm:$0xff] }
  0x52   : > { %597 = vst.msk [vmem:[#allocation2 + $0xa9] sm:$0xff] %vm528_vm0, %v508_v28  ;;  %598 = vst.msk [vmem:[#allocation2 + $0xb1] sm:$0xff] %vm528_vm0, %v509_v29  ;;  %v455_v25 = vmul.f32 %v6254_v5, %v422_v15  ;;  %v456_v26 = vmul.f32 %v6254_v5, %v423_v21  ;;  %v488_v27 = vmul.f32 %v6261_v14, %v390_v62  ;;  %v393_v28 = vld [vmem:[%s6248_s30 + $0xd8] sm:$0xff]  ;;  %v424_v29 = vld [vmem:[%s6243_s25 + $0xd0] sm:$0xff] }
  0x53   : > { %v653_v35 = vld [vmem:[#allocation2 + $0x31] sm:$0xff]  ;;  %v654_v36 = vld [vmem:[#allocation2 + $0x39] sm:$0xff]  ;;  %599 = vst.msk [vmem:[#allocation2 + $0xc1] sm:$0xff] %vm528_vm0, %v510_v38  ;;  %600 = vst.msk [vmem:[#allocation2 + $0xc9] sm:$0xff] %vm528_vm0, %v511_v45  ;;  %v518_v24 = vadd.f32 %v486_v13, %v453_v6  ;;  %v519_v33 = vadd.f32 %v487_v20, %v454_v12  ;;  %v489_v34 = vmul.f32 %v6261_v14, %v391_v7 }
  0x54   : > { %v651_v37 = vld [vmem:[#allocation2 + $0x19] sm:$0xff]  ;;  %v6346_v42 = vpack.i.bf16 %v654_v36, %v653_v35  ;;  %v652_v43 = vld [vmem:[#allocation2 + $0x21] sm:$0xff]  ;;  %601 = vst.msk [vmem:[#allocation2 + $0xd9] sm:$0xff] %vm528_vm0, %v512_v51  ;;  %602 = vst.msk [vmem:[#allocation2 + $0xe1] sm:$0xff] %vm528_vm0, %v513_v52  ;;  %v457_v36 = vmul.f32 %v6254_v5, %v424_v29  ;;  %v520_v38 = vadd.f32 %v488_v27, %v455_v25 }
  0x55   : > { %v655_v44 = vld [vmem:[#allocation2 + $0x49] sm:$0xff]  ;;  %v6353_v49 = vpack.i.bf16 %v652_v43, %v651_v37  ;;  %v656_v50 = vld [vmem:[#allocation2 + $0x51] sm:$0xff]  ;;  %603 = vst.msk [vmem:[#allocation2 + $0xf1] sm:$0xff] %vm528_vm0, %v514_v2  ;;  %604 = vst.msk [vmem:[#allocation2 + $0xf9] sm:$0xff] %vm528_vm0, %v515_v11  ;;  %v490_v40 = vmul.f32 %v6261_v14, %v392_v22  ;;  %v521_v45 = vadd.f32 %v489_v34, %v456_v26 }
  0x56   : > { %4727 = vrot.lane.b32.xlu1 %v6346_v42, %s6016_s28  ;;  %v6361_v56 = vpack.i.bf16 %v656_v50, %v655_v44  ;;  %v657_v63 = vld [vmem:[#allocation2 + $0x61] sm:$0xff]  ;;  %v658_v1 = vld [vmem:[#allocation2 + $0x69] sm:$0xff]  ;;  %605 = vst.msk [vmem:[#allocation2 + $0x109] sm:$0xff] %vm528_vm0, %v516_v18  ;;  %606 = vst.msk [vmem:[#allocation2 + $0x111] sm:$0xff] %vm528_vm0, %v517_v19  ;;  %v491_v46 = vmul.f32 %v6261_v14, %v393_v28  ;;  %v492_v50 = vmul.f32 %v6261_v14, %v394_v41 }
  0x57   : > { %4722 = vrot.lane.b32.xlu0 %v6353_v49, %s6016_s28  ;;  %v6378_v8 = vpack.i.bf16 %v658_v1, %v657_v63  ;;  %v659_v9 = vld [vmem:[#allocation2 + $0x79] sm:$0xff]  ;;  %v660_v10 = vld [vmem:[#allocation2 + $0x81] sm:$0xff]  ;;  %607 = vst.msk [vmem:[#allocation2 + $0x121] sm:$0xff] %vm528_vm0, %v518_v24  ;;  %608 = vst.msk [vmem:[#allocation2 + $0x129] sm:$0xff] %vm528_vm0, %v519_v33  ;;  %v522_v53 = vadd.f32 %v490_v40, %v457_v36 }
  0x58   : > { %v6383_v16 = vpack.i.bf16 %v660_v10, %v659_v9  ;;  %v661_v17 = vld [vmem:[#allocation2 + $0x91] sm:$0xff]  ;;  %v662_v23 = vld [vmem:[#allocation2 + $0x99] sm:$0xff]  ;;  %v395_v43 = vld [vmem:[%s6248_s30 + $0xe8] sm:$0xff]  ;;  %609 = vst.msk [vmem:[#allocation2 + $0x139] sm:$0xff] %vm528_vm0, %v520_v38 }
  0x59   : > { %v6399_v30 = vpack.i.bf16 %v662_v23, %v661_v17  ;;  %v663_v31 = vld [vmem:[#allocation2 + $0xa9] sm:$0xff]  ;;  %v664_v32 = vld [vmem:[#allocation2 + $0xb1] sm:$0xff]  ;;  %v426_v47 = vld [vmem:[%s6243_s25 + $0xe0] sm:$0xff]  ;;  %v493_v51 = vmul.f32 %v6261_v14, %v395_v43  ;;  %610 = vst.msk [vmem:[#allocation2 + $0x141] sm:$0xff] %vm528_vm0, %v521_v45 }
  0x5a   : > { %4732 = vrot.lane.b32.xlu1 %v6361_v56, %s6016_s28  ;;  %v425_v35 = vld [vmem:[%s6243_s25 + $0xd8] sm:$0xff]  ;;  %v665_v37 = vld [vmem:[#allocation2 + $0xc1] sm:$0xff]  ;;  %v666_v44 = vld [vmem:[#allocation2 + $0xc9] sm:$0xff]  ;;  %v4751_v52 = vpack.i.bf16 %v664_v32, %v663_v31  ;;  %v459_v54 = vmul.f32 %v6254_v5, %v426_v47  ;;  %611 = vst.msk [vmem:[#allocation2 + $0x151] sm:$0xff] %vm528_vm0, %v522_v53 }
  0x5b   : > { %4737 = vrot.lane.b32.xlu0 %v6378_v8, %s6016_s28  ;;  %v458_v39 = vmul.f32 %v6254_v5, %v425_v35  ;;  %v427_v48 = vld [vmem:[%s6243_s25 + $0xe8] sm:$0xff]  ;;  %v4756_v57 = vpack.i.bf16 %v666_v44, %v665_v37  ;;  %v667_v58 = vld [vmem:[#allocation2 + $0xd9] sm:$0xff]  ;;  %v396_v43 = vld [vmem:[%s6248_s30 + $0xf0] sm:$0xff] }
  0x5c   : > { %v460_v55 = vmul.f32 %v6254_v5, %v427_v48  ;;  %v668_v59 = vld [vmem:[#allocation2 + $0xe1] sm:$0xff]  ;;  %v669_v61 = vld [vmem:[#allocation2 + $0xf1] sm:$0xff]  ;;  %v524_v62 = vadd.f32 %v492_v50, %v459_v54  ;;  %v670_v1 = vld [vmem:[#allocation2 + $0xf9] sm:$0xff]  ;;  %v494_v48 = vmul.f32 %v6261_v14, %v396_v43 }
  0x5d   : > { %v523_v60 = vadd.f32 %v491_v46, %v458_v39  ;;  %v4761_v2 = vpack.i.bf16 %v668_v59, %v667_v58  ;;  %v4766_v3 = vpack.i.bf16 %v670_v1, %v669_v61  ;;  %v671_v4 = vld [vmem:[#allocation2 + $0x109] sm:$0xff]  ;;  %v672_v6 = vld [vmem:[#allocation2 + $0x111] sm:$0xff]  ;;  %v683_v26 = vld [vmem:[#allocation2 + $0x1a] sm:$0xff] }
  0x5e   : > { %4742 = vrot.lane.b32.xlu1 %v6383_v16, %s6016_s28  ;;  %v525_v63 = vadd.f32 %v493_v51, %v460_v55  ;;  %613 = vst.msk [vmem:[#allocation2 + $0x169] sm:$0xff] %vm528_vm0, %v524_v62  ;;  %v673_v7 = vld [vmem:[#allocation2 + $0x121] sm:$0xff]  ;;  %v674_v9 = vld [vmem:[#allocation2 + $0x129] sm:$0xff]  ;;  %v4771_v10 = vpack.i.bf16 %v672_v6, %v671_v4  ;;  %v685_v28 = vld [vmem:[#allocation2 + $0x32] sm:$0xff] }
  0x5f   : > { %4747 = vrot.lane.b32.xlu0 %v6399_v30, %s6016_s28  ;;  %612 = vst.msk [vmem:[#allocation2 + $0x159] sm:$0xff] %vm528_vm0, %v523_v60  ;;  %v4776_v11 = vpack.i.bf16 %v674_v9, %v673_v7  ;;  %v675_v12 = vld [vmem:[#allocation2 + $0x139] sm:$0xff]  ;;  %v681_v22 = vld [vmem:[#allocation2 + $0x2] sm:$0xff]  ;;  %v682_v23 = vld [vmem:[#allocation2 + $0xa] sm:$0xff] }
  0x60   : > { %614 = vst.msk [vmem:[#allocation2 + $0x171] sm:$0xff] %vm528_vm0, %v525_v63  ;;  %v676_v13 = vld [vmem:[#allocation2 + $0x141] sm:$0xff]  ;;  %v4796_v25 = vpack.i.bf16 %v682_v23, %v681_v22  ;;  %v687_v33 = vld [vmem:[#allocation2 + $0x4a] sm:$0xff]  ;;  %v688_v34 = vld [vmem:[#allocation2 + $0x52] sm:$0xff] }
  0x61   : > { %v677_v15 = vld [vmem:[#allocation2 + $0x151] sm:$0xff]  ;;  %v4781_v18 = vpack.i.bf16 %v676_v13, %v675_v12  ;;  %v684_v27 = vld [vmem:[#allocation2 + $0x22] sm:$0xff]  ;;  %v686_v29 = vld [vmem:[#allocation2 + $0x3a] sm:$0xff]  ;;  %v6445_v37 = vpack.i.bf16 %v688_v34, %v687_v33 }
  0x62   : > { %4752 = vrot.lane.b32.xlu1 %v4751_v52, %s6016_s28  ;;  %v6438_v31 = vpack.i.bf16 %v684_v27, %v683_v26  ;;  %v6441_v32 = vpack.i.bf16 %v686_v29, %v685_v28  ;;  %v689_v35 = vld [vmem:[#allocation2 + $0x62] sm:$0xff]  ;;  %v690_v36 = vld [vmem:[#allocation2 + $0x6a] sm:$0xff]  ;;  %v691_v38 = vld [vmem:[#allocation2 + $0x7a] sm:$0xff] }
  0x63   : > { %4757 = vrot.lane.b32.xlu0 %v4756_v57, %s6016_s28  ;;  %v692_v39 = vld [vmem:[#allocation2 + $0x82] sm:$0xff]  ;;  %v6449_v40 = vpack.i.bf16 %v690_v36, %v689_v35  ;;  %v693_v41 = vld [vmem:[#allocation2 + $0x92] sm:$0xff]  ;;  %v694_v45 = vld [vmem:[#allocation2 + $0x9a] sm:$0xff] }
  0x64   : > { %v397_v44 = vld [vmem:[%s6248_s30 + $0xf8] sm:$0xff]  ;;  %v428_v46 = vld [vmem:[%s6243_s25 + $0xf0] sm:$0xff]  ;;  %v6461_v53 = vpack.i.bf16 %v692_v39, %v691_v38  ;;  %v6465_v55 = vpack.i.bf16 %v694_v45, %v693_v41  ;;  %v697_v60 = vld [vmem:[#allocation2 + $0xc2] sm:$0xff] }
  0x65   : > { %v679_v20 = vld [vmem:[#allocation2 + $0x169] sm:$0xff]  ;;  %v429_v47 = vld [vmem:[%s6243_s25 + $0xf8] sm:$0xff]  ;;  %v495_v50 = vmul.f32 %v6261_v14, %v397_v44  ;;  %v461_v51 = vmul.f32 %v6254_v5, %v428_v46  ;;  %v719_v36 = vld [vmem:[#allocation2 + $0x60] sm:$0xff]  ;;  %s359_s25 = scalar_lea.vmem %s8435_s5, %s6236_s20 }
  0x66   : > { %4762 = vrot.lane.b32.xlu1 %v4761_v2, %s6016_s28  ;;  %v678_v17 = vld [vmem:[#allocation2 + $0x159] sm:$0xff]  ;;  %v462_v52 = vmul.f32 %v6254_v5, %v429_v47  ;;  %v695_v54 = vld [vmem:[#allocation2 + $0xaa] sm:$0xff]  ;;  %v700_v63 = vld [vmem:[#allocation2 + $0xe2] sm:$0xff] }
  0x67   : > { %4767 = vrot.lane.b32.xlu0 %v4766_v3, %s6016_s28  ;;  %v4786_v19 = vpack.i.bf16 %v678_v17, %v677_v15  ;;  %v680_v21 = vld [vmem:[#allocation2 + $0x171] sm:$0xff]  ;;  %v526_v58 = vadd.f32 %v494_v48, %v461_v51  ;;  %v699_v61 = vld [vmem:[#allocation2 + $0xda] sm:$0xff]  ;;  %v705_v9 = vld [vmem:[#allocation2 + $0x122] sm:$0xff] }
  0x68   : > { %v4791_v24 = vpack.i.bf16 %v680_v21, %v679_v20  ;;  %v696_v57 = vld [vmem:[#allocation2 + $0xb2] sm:$0xff]  ;;  %v527_v59 = vadd.f32 %v495_v50, %v462_v52  ;;  %v698_v14 = vld [vmem:[#allocation2 + $0xca] sm:$0xff]  ;;  %v702_v2 = vld [vmem:[#allocation2 + $0xfa] sm:$0xff]  ;;  %v6479_v3 = vpack.i.bf16 %v700_v63, %v699_v61 }
  0x69   : > { %615 = vst.msk [vmem:[#allocation2 + $0x181] sm:$0xff] %vm528_vm0, %v526_v58  ;;  %v6471_v5 = vpack.i.bf16 %v696_v57, %v695_v54  ;;  %v6475_v62 = vpack.i.bf16 %v698_v14, %v697_v60  ;;  %v701_v1 = vld [vmem:[#allocation2 + $0xf2] sm:$0xff]  ;;  %v703_v6 = vld [vmem:[#allocation2 + $0x10a] sm:$0xff]  ;;  %v707_v13 = vld [vmem:[#allocation2 + $0x13a] sm:$0xff] }
  0x6a   : > { %4772 = vrot.lane.b32.xlu1 %v4771_v10, %s6016_s28  ;;  %616 = vst.msk [vmem:[#allocation2 + $0x189] sm:$0xff] %vm528_vm0, %v527_v59  ;;  %v6483_v4 = vpack.i.bf16 %v702_v2, %v701_v1  ;;  %v704_v7 = vld [vmem:[#allocation2 + $0x112] sm:$0xff]  ;;  %v706_v10 = vld [vmem:[#allocation2 + $0x12a] sm:$0xff]  ;;  %v708_v15 = vld [vmem:[#allocation2 + $0x142] sm:$0xff] }
  0x6b   : > { %4777 = vrot.lane.b32.xlu0 %v4776_v11, %s6016_s28  ;;  %v4851_v11 = vpack.i.bf16 %v704_v7, %v703_v6  ;;  %v4856_v12 = vpack.i.bf16 %v706_v10, %v705_v9  ;;  %v709_v17 = vld [vmem:[#allocation2 + $0x152] sm:$0xff]  ;;  %v711_v21 = vld [vmem:[#allocation2 + $0x16a] sm:$0xff]  ;;  %v722_v41 = vld [vmem:[#allocation2 + $0x80] sm:$0xff] }
  0x6c   : > { %v712_v22 = vld [vmem:[#allocation2 + $0x172] sm:$0xff]  ;;  %v6503_v29 = vld [vmem:[#allocation2 + $0x48] sm:$0xff]  ;;  %v6533_v52 = vld [vmem:[#allocation2 + $0xc0] sm:$0xff] }
  0x6d   : > { %v6491_v23 = vld [vmem:[#allocation2 + $0x18] sm:$0xff]  ;;  %v6499_v27 = vld [vmem:[#allocation2 + $0x30] sm:$0xff]  ;;  %8473 = vst [vmem:[#allocation13_spill] sm:$0xff] %v6503_v29  ;;  %v720_v38 = vld [vmem:[#allocation2 + $0x68] sm:$0xff] }
  0x6e   : > { %4782 = vrot.lane.b32.xlu1 %v4781_v18, %s6016_s28  ;;  %v710_v18 = vld [vmem:[#allocation2 + $0x15a] sm:$0xff]  ;;  %8471 = vst [vmem:[#allocation11_spill] sm:$0xff] %v6499_v27  ;;  %v6505_v33 = vld [vmem:[#allocation2 + $0x50] sm:$0xff]  ;;  %v6519_v43 = vpack.i.bf16 %v720_v38, %v719_v36  ;;  %v725_v47 = vld [vmem:[#allocation2 + $0xa8] sm:$0xff]  ;;  %v6020_v38 = vmov 65535  }
  0x6f   : > { %4787 = vrot.lane.b32.xlu0 %v4786_v19, %s6016_s28  ;;  %v4861_v19 = vpack.i.bf16 %v708_v15, %v707_v13  ;;  %v4866_v20 = vpack.i.bf16 %v710_v18, %v709_v17  ;;  %v6501_v28 = vld [vmem:[#allocation2 + $0x38] sm:$0xff]  ;;  %8474 = vst [vmem:[#allocation14_spill] sm:$0xff] %v6505_v33  ;;  %v6515_v35 = vpack.i.bf16 %v6505_v33, %v6503_v29  ;;  %v723_v45 = vld [vmem:[#allocation2 + $0x90] sm:$0xff]  ;;  %v6535_v54 = vld [vmem:[#allocation2 + $0xc8] sm:$0xff] }
  0x70   : > { %8472 = vst [vmem:[#allocation12_spill] sm:$0xff] %v6501_v28  ;;  %v6510_v34 = vpack.i.bf16 %v6501_v28, %v6499_v27  ;;  %v721_v39 = vld [vmem:[#allocation2 + $0x78] sm:$0xff]  ;;  %v726_v48 = vld [vmem:[#allocation2 + $0xb0] sm:$0xff]  ;;  %v6539_v58 = vld [vmem:[#allocation2 + $0xe0] sm:$0xff]  ;;  %v6545_v59 = vpack.i.bf16 %v6535_v54, %v6533_v52 }
  0x71   : > { %v6523_v44 = vpack.i.bf16 %v722_v41, %v721_v39  ;;  %v724_v46 = vld [vmem:[#allocation2 + $0x98] sm:$0xff]  ;;  %v6531_v51 = vpack.i.bf16 %v726_v48, %v725_v47  ;;  %v6553_v14 = vld [vmem:[#allocation2 + $0xf0] sm:$0xff]  ;;  %v6557_v63 = vld [vmem:[#allocation2 + $0x108] sm:$0xff]  ;;  %v2282_v39 = vsel %vm2280_vm2, 4294967295, %v6020_v38  ;;  %vm3885_vm2 = vcmask 654336  }
  0x72   : > { %4792 = vrot.lane.b32.xlu1 %v4791_v24, %s6016_s28  ;;  %v6493_v24 = vld [vmem:[#allocation2 + $0x20] sm:$0xff]  ;;  %v6527_v50 = vpack.i.bf16 %v724_v46, %v723_v45  ;;  %v6537_v57 = vld [vmem:[#allocation2 + $0xd8] sm:$0xff]  ;;  %v6559_v1 = vld [vmem:[#allocation2 + $0x110] sm:$0xff]  ;;  %v2283_v41 = vsel %vm2281_vm3, %v2282_v39, 0  ;;  %vm3918_vm3 = vcmask 785408  }
  0x73   : > { %4797 = vrot.lane.b32.xlu0 %v4796_v25, %s6017_s9  ;;  %8470 = vst [vmem:[#allocation10_spill] sm:$0xff] %v6493_v24  ;;  %v4871_v25 = vpack.i.bf16 %v712_v22, %v711_v21  ;;  %v4876_v26 = vpack.i.bf16 %v6493_v24, %v6491_v23  ;;  %v6551_v60 = vpack.i.bf16 %v6539_v58, %v6537_v57  ;;  %v6555_v61 = vld [vmem:[#allocation2 + $0xf8] sm:$0xff]  ;;  %v6573_v7 = vld [vmem:[#allocation2 + $0x120] sm:$0xff]  ;;  %v6575_v9 = vld [vmem:[#allocation2 + $0x128] sm:$0xff] }
  0x74   : > { %v6565_v2 = vpack.i.bf16 %v6555_v61, %v6553_v14  ;;  %v6571_v6 = vpack.i.bf16 %v6559_v1, %v6557_v63  ;;  %v6577_v10 = vld [vmem:[#allocation2 + $0x138] sm:$0xff]  ;;  %v6591_v15 = vld [vmem:[#allocation2 + $0x150] sm:$0xff]  ;;  %v6595_v18 = vld [vmem:[#allocation2 + $0x168] sm:$0xff] }
  0x75   : > { %v6593_v17 = vld [vmem:[#allocation2 + $0x158] sm:$0xff]  ;;  %v743_v22 = vld [vmem:[#allocation2 + $0x180] sm:$0xff]  ;;  %v5916_v36 = vld [vmem:[%s8434_s4 + $0x8] sm:$0x3f]  }
  0x76   : > { %4802 = vrot.lane.b32.xlu1 %v6438_v31, %s6017_s9  ;;  %v2285_v45 = vand.u32 %v5916_v36, %v2283_v41  ;;  %v760_v39 = vld [vmem:[#allocation2 + $0xc9] sm:$0xff]  ;;  %v764_v0 = vld [vmem:[#allocation2 + $0xf9] sm:$0xff] }
  0x77   : > { %4807 = vrot.lane.b32.xlu0 %v6441_v32, %s6017_s9  ;;  %v6767_v29 = vld [vmem:[#allocation2 + $0x138] sm:$0xff] }
  0x78   : > { %4613 = vmatprep.subr.bf16.mxu0 %v2285_v45  ;;  %v864_v27 = vld [vmem:[#allocation2 + $0x139] sm:$0xff] }
  0x79   : > { %4614 = vmatpush3.bf16.msra.mxu0 %v2285_v45 }
  0x7a   : > { %4812 = vrot.lane.b32.xlu1 %v6445_v37, %s6017_s9 }
  0x7b   : > { %4817 = vrot.lane.b32.xlu0 %v6449_v40, %s6017_s9 }
  0x7e   : > { %4822 = vrot.lane.b32.xlu1 %v6461_v53, %s6017_s9 }
  0x7f   : > { %4827 = vrot.lane.b32.xlu0 %v6465_v55, %s6017_s9 }
  0x82   : > { %4832 = vrot.lane.b32.xlu1 %v6471_v5, %s6017_s9 }
  0x83   : > { %4837 = vrot.lane.b32.xlu0 %v6475_v62, %s6017_s9 }
  0x86   : > { %4842 = vrot.lane.b32.xlu1 %v6479_v3, %s6017_s9 }
  0x87   : > { %4847 = vrot.lane.b32.xlu0 %v6483_v4, %s6017_s9 }
  0x8a   : > { %4852 = vrot.lane.b32.xlu1 %v4851_v11, %s6017_s9  ;;  %v6579_v11 = vld [vmem:[#allocation2 + $0x140] sm:$0xff] }
  0x8b   : > { %4857 = vrot.lane.b32.xlu0 %v4856_v12, %s6017_s9  ;;  %v6585_v12 = vpack.i.bf16 %v6575_v9, %v6573_v7  ;;  %v4936_v13 = vpack.i.bf16 %v6579_v11, %v6577_v10 }
  0x8e   : > { %4862 = vrot.lane.b32.xlu1 %v4861_v19, %s6017_s9  ;;  %v6597_v19 = vld [vmem:[#allocation2 + $0x170] sm:$0xff] }
  0x8f   : > { %4867 = vrot.lane.b32.xlu0 %v4866_v20, %s6017_s9  ;;  %v4941_v20 = vpack.i.bf16 %v6593_v17, %v6591_v15  ;;  %v4946_v21 = vpack.i.bf16 %v6597_v19, %v6595_v18 }
  0x92   : > { %4872 = vrot.lane.b32.xlu1 %v4871_v25, %s6017_s9  ;;  %v744_v25 = vld [vmem:[#allocation2 + $0x188] sm:$0xff] }
  0x93   : > { %4877 = vrot.lane.b32.xlu0 %v4876_v26, %s6018_s10  ;;  %v4951_v26 = vpack.i.bf16 %v744_v25, %v743_v22  ;;  %v852_v22 = vld [vmem:[#allocation2 + $0xa9] sm:$0xff]  ;;  %v853_v25 = vld [vmem:[#allocation2 + $0xb1] sm:$0xff] }
  0x96   : > { %4882 = vrot.lane.b32.xlu1 %v6510_v34, %s6018_s10 }
  0x97   : > { %4887 = vrot.lane.b32.xlu0 %v6515_v35, %s6018_s10 }
  0x9a   : > { %4892 = vrot.lane.b32.xlu1 %v6519_v43, %s6018_s10 }
  0x9b   : > { %4897 = vrot.lane.b32.xlu0 %v6523_v44, %s6018_s10 }
  0x9e   : > { %4902 = vrot.lane.b32.xlu1 %v6527_v50, %s6018_s10 }
  0x9f   : > { %4907 = vrot.lane.b32.xlu0 %v6531_v51, %s6018_s10 }
  0xa2   : > { %4912 = vrot.lane.b32.xlu1 %v6545_v59, %s6018_s10 }
  0xa3   : > { %4917 = vrot.lane.b32.xlu0 %v6551_v60, %s6018_s10 }
  0xa6   : > { %4922 = vrot.lane.b32.xlu1 %v6565_v2, %s6018_s10 }
  0xa7   : > { %4927 = vrot.lane.b32.xlu0 %v6571_v6, %s6018_s10 }
  0xaa   : > { %4932 = vrot.lane.b32.xlu1 %v6585_v12, %s6018_s10 }
  0xab   : > { %4937 = vrot.lane.b32.xlu0 %v4936_v13, %s6018_s10  ;;  %v850_v13 = vld [vmem:[#allocation2 + $0x91] sm:$0xff] }
  0xae   : > { %4942 = vrot.lane.b32.xlu1 %v4941_v20, %s6018_s10  ;;  %v851_v20 = vld [vmem:[#allocation2 + $0x99] sm:$0xff] }
  0xaf   : > { %4947 = vrot.lane.b32.xlu0 %v4946_v21, %s6018_s10 }
  0xb2   : > { %4952 = vrot.lane.b32.xlu1 %v4951_v26, %s6018_s10  ;;  %s6028_s10 = smov 96  }
  0xb3   : > { %4957 = vrot.lane.b32.xlu0 %v6353_v49, %s6019_s11  ;;  %v5917_v49 = vld [vmem:[%s8434_s4] sm:$0xff]  }
  0xb4   : > { %4615 = vmatprep.subr.bf16.mxu0 %v5917_v49 }
  0xb5   : > { %4616 = vmatpush3.bf16.msra.mxu0 %v5917_v49 }
  0xb6   : > { %4962 = vrot.lane.b32.xlu1 %v6346_v42, %s6019_s11 }
  0xb7   : > { %4967 = vrot.lane.b32.xlu0 %v6438_v31, %s6021_s14  ;;  %v6633_v31 = vpop.permute.xlu0 %4717 }
  0xba   : > { %4972 = vrot.lane.b32.xlu1 %v6441_v32, %s6021_s14 }
  0xbb   : > { %4977 = vrot.lane.b32.xlu0 %v6510_v34, %s6022_s17 }
  0xbe   : > { %4982 = vrot.lane.b32.xlu1 %v6515_v35, %s6022_s17 }
  0xbf   : > { %4987 = vrot.lane.b32.xlu0 %v6346_v42, %s6023_s18 }
  0xc2   : > { %4992 = vrot.lane.b32.xlu1 %v6361_v56, %s6023_s18 }
  0xc3   : > { %4997 = vrot.lane.b32.xlu0 %v6441_v32, %s6024_s19 }
  0xc6   : > { %5002 = vrot.lane.b32.xlu1 %v6445_v37, %s6024_s19 }
  0xc7   : > { %5007 = vrot.lane.b32.xlu0 %v6361_v56, %s6019_s11 }
  0xc8   : > { %v6639_v34 = vpop.permute.xlu1 %4727 }
  0xc9   : > { %8475 = vst [vmem:[#allocation15_spill] sm:$0xff] %v6639_v34  ;;  %v6641_v35 = vpop.permute.xlu0 %4722 }
  0xca   : > { %5012 = vrot.lane.b32.xlu1 %v6378_v8, %s6019_s11 }
  0xcb   : > { %5017 = vrot.lane.b32.xlu0 %v6445_v37, %s6021_s14 }
  0xcc   : > { %v6647_v42 = vpop.permute.xlu1 %4732 }
  0xcd   : > { %8476 = vst [vmem:[#allocation16_spill] sm:$0xff] %v6647_v42  ;;  %v6649_v32 = vpop.permute.xlu0 %4737 }
  0xce   : > { %8477 = vst [vmem:[#allocation17_spill] sm:$0xff] %v6649_v32  ;;  %5022 = vrot.lane.b32.xlu1 %v6449_v40, %s6021_s14  ;;  %v799_v32 = vld [vmem:[#allocation2 + $0x122] sm:$0xff] }
  0xcf   : > { %5027 = vrot.lane.b32.xlu0 %v6519_v43, %s6022_s17 }
  0xd0   : > { %v6655_v56 = vpop.permute.xlu1 %4742 }
  0xd1   : > { %8478 = vst [vmem:[#allocation18_spill] sm:$0xff] %v6655_v56  ;;  %v6657_v46 = vpop.permute.xlu0 %4747  ;;  %v768_v56 = vld [vmem:[#allocation2 + $0x129] sm:$0xff] }
  0xd2   : > { %8479 = vst [vmem:[#allocation19_spill] sm:$0xff] %v6657_v46  ;;  %5032 = vrot.lane.b32.xlu1 %v6523_v44, %s6022_s17 }
  0xd3   : > { %5037 = vrot.lane.b32.xlu0 %v6378_v8, %s6023_s18 }
  0xd4   : > { %v6663_v37 = vpop.permute.xlu1 %4752 }
  0xd5   : > { %8480 = vst [vmem:[#allocation20_spill] sm:$0xff] %v6663_v37  ;;  %v6665_v47 = vpop.permute.xlu0 %4757  ;;  %v861_v37 = vld [vmem:[#allocation2 + $0x111] sm:$0xff] }
  0xd6   : > { %5042 = vrot.lane.b32.xlu1 %v6383_v16, %s6023_s18 }
  0xd7   : > { %5047 = vrot.lane.b32.xlu0 %v6449_v40, %s6024_s19 }
  0xd8   : > { %v6671_v43 = vpop.permute.xlu1 %4762 }
  0xd9   : > { %v6673_v48 = vpop.permute.xlu0 %4767 }
  0xda   : > { %5052 = vrot.lane.b32.xlu1 %v6461_v53, %s6024_s19 }
  0xdb   : > { %5057 = vrot.lane.b32.xlu0 %v6383_v16, %s6019_s11  ;;  %v5086_v16 = vpack.i.bf16 %v851_v20, %v850_v13 }
  0xdc   : > { %v6679_v8 = vpop.permute.xlu1 %4772 }
  0xdd   : > { %v6681_v44 = vpop.permute.xlu0 %4777 }
  0xde   : > { %5062 = vrot.lane.b32.xlu1 %v6399_v30, %s6019_s11 }
  0xdf   : > { %5067 = vrot.lane.b32.xlu0 %v6461_v53, %s6021_s14  ;;  %v5091_v53 = vpack.i.bf16 %v853_v25, %v852_v22  ;;  %v857_v22 = vld [vmem:[#allocation2 + $0xe1] sm:$0xff] }
  0xe0   : > { %v6687_v40 = vpop.permute.xlu1 %4782 }
  0xe1   : > { %v6689_v21 = vpop.permute.xlu0 %4787 }
  0xe2   : > { %5072 = vrot.lane.b32.xlu1 %v6465_v55, %s6021_s14 }
  0xe3   : > { %5077 = vrot.lane.b32.xlu0 %v6527_v50, %s6022_s17  ;;  %v759_v50 = vld [vmem:[#allocation2 + $0xc1] sm:$0xff] }
  0xe4   : > { %v6695_v26 = vpop.permute.xlu1 %4792 }
  0xe5   : > { %v6697_v30 = vpop.permute.xlu0 %4797 }
  0xe6   : > { %5082 = vrot.lane.b32.xlu1 %v6531_v51, %s6022_s17  ;;  %v5111_v51 = vpack.i.bf16 %v760_v39, %v759_v50 }
  0xe7   : > { %5087 = vrot.lane.b32.xlu0 %v5086_v16, %s6023_s18  ;;  %v856_v16 = vld [vmem:[#allocation2 + $0xd9] sm:$0xff] }
  0xe8   : > { %v6702_v36 = vpop.permute.xlu1 %4802 }
  0xe9   : > { %v6704_v38 = vpop.permute.xlu0 %4807 }
  0xea   : > { %8481 = vst [vmem:[#allocation21_spill] sm:$0xff] %v6704_v38  ;;  %5092 = vrot.lane.b32.xlu1 %v5091_v53, %s6023_s18  ;;  %v4760_v38 = vunpack.i.h.bf16 %v6665_v47 }
  0xeb   : > { %5097 = vrot.lane.b32.xlu0 %v6465_v55, %s6024_s19 }
  0xec   : > { %v6709_v41 = vpop.permute.xlu1 %4812 }
  0xed   : > { %8482 = vst [vmem:[#allocation22_spill] sm:$0xff] %v6709_v41  ;;  %v6711_v45 = vpop.permute.xlu0 %4817  ;;  %v865_v41 = vld [vmem:[#allocation2 + $0x141] sm:$0xff] }
  0xee   : > { %8483 = vst [vmem:[#allocation23_spill] sm:$0xff] %v6711_v45  ;;  %5102 = vrot.lane.b32.xlu1 %v6471_v5, %s6024_s19  ;;  %v891_v45 = vld [vmem:[#allocation2 + $0xfa] sm:$0xff] }
  0xef   : > { %5107 = vrot.lane.b32.xlu0 %v5091_v53, %s6019_s11 }
  0xf0   : > { %v6716_v49 = vpop.permute.xlu1 %4822 }
  0xf1   : > { %8484 = vst [vmem:[#allocation24_spill] sm:$0xff] %v6716_v49  ;;  %v6718_v13 = vpop.permute.xlu0 %4827  ;;  %v890_v49 = vld [vmem:[#allocation2 + $0xf2] sm:$0xff] }
  0xf2   : > { %8485 = vst [vmem:[#allocation25_spill] sm:$0xff] %v6718_v13  ;;  %5112 = vrot.lane.b32.xlu1 %v5111_v51, %s6019_s11  ;;  %v5196_v34 = vpack.i.bf16 %v891_v45, %v890_v49  ;;  %v6792_v49 = vpack.i.bf16 %v865_v41, %v864_v27  ;;  %v4784_v27 = vunpack.i.l.bf16 %v6687_v40 }
  0xf3   : > { %5117 = vrot.lane.b32.xlu0 %v6471_v5, %s6021_s14  ;;  %v5141_v5 = vpack.i.bf16 %v857_v22, %v856_v16  ;;  %v860_v22 = vld [vmem:[#allocation2 + $0x109] sm:$0xff] }
  0xf4   : > { %v6723_v55 = vpop.permute.xlu1 %4832  ;;  %v5191_v28 = vpack.i.bf16 %v861_v37, %v860_v22 }
  0xf5   : > { %8486 = vst [vmem:[#allocation26_spill] sm:$0xff] %v6723_v55  ;;  %v6725_v20 = vpop.permute.xlu0 %4837 }
  0xf6   : > { %5122 = vrot.lane.b32.xlu1 %v6475_v62, %s6021_s14 }
  0xf7   : > { %5127 = vrot.lane.b32.xlu0 %v6545_v59, %s6022_s17  ;;  %v763_v59 = vld [vmem:[#allocation2 + $0xf1] sm:$0xff] }
  0xf8   : > { %v6731_v25 = vpop.permute.xlu1 %4842 }
  0xf9   : > { %v6733_v53 = vpop.permute.xlu0 %4847 }
  0xfa   : > { %5132 = vrot.lane.b32.xlu1 %v6551_v60, %s6022_s17  ;;  %v5161_v60 = vpack.i.bf16 %v764_v0, %v763_v59  ;;  %v892_v0 = vld [vmem:[#allocation2 + $0x10a] sm:$0xff]  ;;  %v767_v59 = vld [vmem:[#allocation2 + $0x121] sm:$0xff] }
  0xfb   : > { %5137 = vrot.lane.b32.xlu0 %v5111_v51, %s6023_s18  ;;  %v6783_v37 = vpack.i.bf16 %v768_v56, %v767_v59  ;;  %v4780_v56 = vunpack.i.h.bf16 %v6681_v44  ;;  %v4790_v59 = vunpack.i.h.bf16 %v6689_v21 }
  0xfc   : > { %v6738_v50 = vpop.permute.xlu1 %4852 }
  0xfd   : > { %v6740_v39 = vpop.permute.xlu0 %4857 }
  0xfe   : > { %5142 = vrot.lane.b32.xlu1 %v5141_v5, %s6023_s18 }
  0xff   : > { %5147 = vrot.lane.b32.xlu0 %v6475_v62, %s6024_s19 }
 0x100   : > { %v6745_v55 = vpop.permute.xlu1 %4862 }
 0x101   : > { %v6747_v13 = vpop.permute.xlu0 %4867 }
 0x102   : > { %5152 = vrot.lane.b32.xlu1 %v6479_v3, %s6024_s19 }
 0x103   : > { %5157 = vrot.lane.b32.xlu0 %v5141_v5, %s6019_s11  ;;  %v893_v5 = vld [vmem:[#allocation2 + $0x112] sm:$0xff] }
 0x104   : > { %v6752_v51 = vpop.permute.xlu1 %4872  ;;  %v6777_v24 = vpack.i.bf16 %v893_v5, %v892_v0  ;;  %v4785_v5 = vunpack.i.h.bf16 %v6687_v40  ;;  %v4840_v40 = vunpack.i.h.bf16 %v6725_v20 }
 0x105   : > { %v6754_v16 = vpop.permute.xlu0 %4877 }
 0x106   : > { %5162 = vrot.lane.b32.xlu1 %v5161_v60, %s6019_s11 }
 0x107   : > { %5167 = vrot.lane.b32.xlu0 %v6479_v3, %s6021_s14  ;;  %v800_v3 = vld [vmem:[#allocation2 + $0x12a] sm:$0xff] }
 0x108   : > { %v6759_v62 = vpop.permute.xlu1 %4882  ;;  %v6785_v22 = vpack.i.bf16 %v800_v3, %v799_v32  ;;  %v4779_v32 = vunpack.i.l.bf16 %v6681_v44  ;;  %v4789_v3 = vunpack.i.l.bf16 %v6689_v21  ;;  %v1955_v21 = vsel %vm528_vm0, %v6575_v9, %v4780_v56 }
 0x109   : > { %8487 = vst [vmem:[#allocation27_spill] sm:$0xff] %v6759_v62  ;;  %v6761_v46 = vpop.permute.xlu0 %4887  ;;  %v4764_v62 = vunpack.i.l.bf16 %v6671_v43 }
 0x10a   : > { %8488 = vst [vmem:[#allocation28_spill] sm:$0xff] %v6761_v46  ;;  %5172 = vrot.lane.b32.xlu1 %v6483_v4, %s6021_s14  ;;  %v6771_v46 = vld [vmem:[#allocation2 + $0x140] sm:$0xff]  ;;  %v4759_v4 = vunpack.i.l.bf16 %v6665_v47  ;;  %v4769_v47 = vunpack.i.l.bf16 %v6673_v48 }
 0x10b   : > { %5177 = vrot.lane.b32.xlu0 %v6565_v2, %s6022_s17  ;;  %v4765_v2 = vunpack.i.h.bf16 %v6671_v43  ;;  %v5231_v45 = vpack.i.bf16 %v6771_v46, %v6767_v29  ;;  %v4775_v43 = vunpack.i.h.bf16 %v6679_v8  ;;  %v1948_v44 = vsel %vm528_vm0, %v6537_v57, %v4764_v62 }
 0x10c   : > { %v6769_v33 = vpop.permute.xlu1 %4892 }
 0x10d   : > { %8489 = vst [vmem:[#allocation29_spill] sm:$0xff] %v6769_v33  ;;  %v6775_v42 = vpop.permute.xlu0 %4897  ;;  %v4770_v33 = vunpack.i.h.bf16 %v6673_v48  ;;  %v1947_v48 = vsel %vm528_vm0, %v6535_v54, %v4760_v38  ;;  %v1950_v54 = vsel %vm528_vm0, %v6553_v14, %v4769_v47  ;;  %v4839_v38 = vunpack.i.l.bf16 %v6725_v20 }
 0x10e   : > { %5182 = vrot.lane.b32.xlu1 %v6571_v6, %s6022_s17  ;;  %v4774_v6 = vunpack.i.l.bf16 %v6679_v8  ;;  %v1949_v8 = vsel %vm528_vm0, %v6539_v58, %v4765_v2  ;;  %v1953_v57 = vsel %vm528_vm0, %v6559_v1, %v4775_v43  ;;  %v1957_v14 = vsel %vm528_vm0, %v6579_v11, %v4785_v5 }
 0x10f   : > { %5187 = vrot.lane.b32.xlu0 %v5161_v60, %s6023_s18  ;;  %v1946_v60 = vsel %vm528_vm0, %v6533_v52, %v4759_v4  ;;  %v1951_v52 = vsel %vm528_vm0, %v6555_v61, %v4770_v33  ;;  %v1954_v33 = vsel %vm528_vm0, %v6573_v7, %v4779_v32  ;;  %v4845_v20 = vunpack.i.h.bf16 %v6731_v25 }
 0x110   : > { %v6798_v0 = vpop.permute.xlu1 %4902  ;;  %v1952_v58 = vsel %vm528_vm0, %v6557_v63, %v4774_v6  ;;  %v4844_v1 = vunpack.i.l.bf16 %v6731_v25  ;;  %v6840_v63 = vsel %vm528_vm0, %v6593_v17, %v4790_v59  ;;  %v6844_v7 = vsel %vm528_vm0, %v6591_v15, %v4789_v3 }
 0x111   : > { %v6806_v41 = vpop.permute.xlu0 %4907  ;;  %v1980_v11 = vsel %vm1962_vm4, %v1947_v48, %v4840_v40  ;;  %v4850_v25 = vunpack.i.h.bf16 %v6733_v53  ;;  %v4849_v2 = vunpack.i.l.bf16 %v6733_v53  ;;  %v4855_v17 = vunpack.i.h.bf16 %v6738_v50 }
 0x112   : > { %5192 = vrot.lane.b32.xlu1 %v5191_v28, %s6023_s18  ;;  %v4854_v15 = vunpack.i.l.bf16 %v6738_v50  ;;  %v1982_v56 = vsel %vm1962_vm4, %v1949_v8, %v4845_v20  ;;  %v1981_v32 = vsel %vm1962_vm4, %v1948_v44, %v4844_v1  ;;  %v4859_v5 = vunpack.i.l.bf16 %v6740_v39 }
 0x113   : > { %5197 = vrot.lane.b32.xlu0 %v5196_v34, %s6024_s19  ;;  %v1956_v34 = vsel %vm528_vm0, %v6577_v10, %v4784_v27  ;;  %v1979_v10 = vsel %vm1962_vm4, %v1946_v60, %v4839_v38  ;;  %v1983_v59 = vsel %vm1962_vm4, %v1950_v54, %v4849_v2  ;;  %v1984_v3 = vsel %vm1962_vm4, %v1951_v52, %v4850_v25 }
 0x114   : > { %v6830_v61 = vpop.permute.xlu1 %4912  ;;  %v1985_v40 = vsel %vm1962_vm4, %v1952_v58, %v4854_v15  ;;  %v4865_v20 = vunpack.i.h.bf16 %v6745_v55  ;;  %v4864_v1 = vunpack.i.l.bf16 %v6745_v55  ;;  %v4869_v25 = vunpack.i.l.bf16 %v6747_v13 }
 0x115   : > { %v4918_v62 = vpop.permute.xlu0 %4917 }
 0x116   : > { %v4920_v9 = vunpack.i.h.bf16 %v4918_v62  ;;  %v4919_v4 = vunpack.i.l.bf16 %v4918_v62  ;;  %5202 = vrot.lane.b32.xlu1 %v6777_v24, %s6024_s19 }
 0x117   : > { %5207 = vrot.lane.b32.xlu0 %v5191_v28, %s6019_s11  ;;  %v4860_v28 = vunpack.i.h.bf16 %v6740_v39  ;;  %v1986_v39 = vsel %vm1962_vm4, %v1953_v57, %v4855_v17 }
 0x118   : > { %v6856_v47 = vsel %vm1995_vm5, %v1979_v10, %v4919_v4  ;;  %v6859_v43 = vsel %vm1995_vm5, %v1980_v11, %v4920_v9  ;;  %v4923_v6 = vpop.permute.xlu1 %4922  ;;  %v4870_v11 = vunpack.i.h.bf16 %v6747_v13 }
 0x119   : > { %v4925_v48 = vunpack.i.h.bf16 %v4923_v6  ;;  %v4924_v60 = vunpack.i.l.bf16 %v4923_v6  ;;  %v4928_v53 = vpop.permute.xlu0 %4927  ;;  %v1988_v57 = vsel %vm1962_vm4, %v1955_v21, %v4860_v28  ;;  %v4795_v21 = vunpack.i.h.bf16 %v6695_v26 }
 0x11a   : > { %v4930_v27 = vunpack.i.h.bf16 %v4928_v53  ;;  %v4929_v50 = vunpack.i.l.bf16 %v4928_v53  ;;  %5212 = vrot.lane.b32.xlu1 %v6783_v37, %s6019_s11  ;;  %v1990_v6 = vsel %vm1962_vm4, %v1957_v14, %v4865_v20  ;;  %v4874_v53 = vunpack.i.l.bf16 %v6752_v51  ;;  %v771_v20 = vld [vmem:[#allocation2 + $0x151] sm:$0xff] }
 0x11b   : > { %v6870_v8 = vsel %vm1995_vm5, %v1981_v32, %v4924_v60  ;;  %v6873_v44 = vsel %vm1995_vm5, %v1982_v56, %v4925_v48  ;;  %5217 = vrot.lane.b32.xlu0 %v6777_v24, %s6021_s14  ;;  %v1987_v24 = vsel %vm1962_vm4, %v1954_v33, %v4859_v5  ;;  %v4794_v33 = vunpack.i.l.bf16 %v6695_v26 }
 0x11c   : > { %v6880_v38 = vsel %vm1995_vm5, %v1983_v59, %v4929_v50  ;;  %v6883_v54 = vsel %vm1995_vm5, %v1984_v3, %v4930_v27  ;;  %v4933_v52 = vpop.permute.xlu1 %4932  ;;  %v1989_v56 = vsel %vm1962_vm4, %v1956_v34, %v4864_v1  ;;  %v1991_v5 = vsel %vm1962_vm4, %v6844_v7, %v4869_v25  ;;  %v897_v50 = vld [vmem:[#allocation2 + $0x142] sm:$0xff]  ;;  %v772_v1 = vld [vmem:[#allocation2 + $0x159] sm:$0xff] }
 0x11d   : > { %v4935_v62 = vunpack.i.h.bf16 %v4933_v52  ;;  %v4934_v9 = vunpack.i.l.bf16 %v4933_v52  ;;  %v4938_v4 = vpop.permute.xlu0 %4937  ;;  %v1992_v14 = vsel %vm1962_vm4, %v6840_v63, %v4870_v11  ;;  %v1961_v63 = vsel %vm528_vm0, %v6597_v19, %v4795_v21 }
 0x11e   : > { %v4940_v10 = vunpack.i.h.bf16 %v4938_v4  ;;  %v4939_v58 = vunpack.i.l.bf16 %v4938_v4  ;;  %5222 = vrot.lane.b32.xlu1 %v6785_v22, %s6021_s14  ;;  %v1960_v7 = vsel %vm528_vm0, %v6595_v18, %v4794_v33  ;;  %v6953_v4 = vld [vmem:[#allocation2 + $0x150] sm:$0xff]  ;;  %v4719_v11 = vunpack.i.l.bf16 %v6633_v31 }
 0x11f   : > { %v6894_v2 = vsel %vm1995_vm5, %v1985_v40, %v4934_v9  ;;  %v6897_v55 = vsel %vm1995_vm5, %v1986_v39, %v4935_v62  ;;  %5227 = vrot.lane.b32.xlu0 %v6585_v12, %s6022_s17  ;;  %v4875_v12 = vunpack.i.h.bf16 %v6752_v51  ;;  %v896_v51 = vld [vmem:[#allocation2 + $0x13a] sm:$0xff]  ;;  %v1993_v40 = vsel %vm1962_vm4, %v1960_v7, %v4874_v53  ;;  %v803_v62 = vld [vmem:[#allocation2 + $0x152] sm:$0xff] }
 0x120   : > { %v6904_v17 = vsel %vm1995_vm5, %v1987_v24, %v4939_v58  ;;  %v6907_v15 = vsel %vm1995_vm5, %v1988_v57, %v4940_v10  ;;  %v4943_v13 = vpop.permute.xlu1 %4942  ;;  %v5251_v52 = vpack.i.bf16 %v897_v50, %v896_v51  ;;  %v804_v9 = vld [vmem:[#allocation2 + $0x15a] sm:$0xff]  ;;  %v6959_v10 = vld [vmem:[#allocation2 + $0x168] sm:$0xff]  ;;  %v4720_v58 = vunpack.i.h.bf16 %v6633_v31  ;;  %v6964_v33 = vld [vmem:[#allocation2 + $0x170] sm:$0xff] }
 0x121   : > { %v4945_v32 = vunpack.i.h.bf16 %v4943_v13  ;;  %v4944_v48 = vunpack.i.l.bf16 %v4943_v13  ;;  %v4948_v60 = vpop.permute.xlu0 %4947  ;;  %v6955_v24 = vld [vmem:[#allocation2 + $0x158] sm:$0xff]  ;;  %v4724_v25 = vunpack.i.l.bf16 %v6641_v35  ;;  %v4799_v53 = vunpack.i.l.bf16 %v6697_v30 }
 0x122   : > { %v4950_v28 = vunpack.i.h.bf16 %v4948_v60  ;;  %v4949_v26 = vunpack.i.l.bf16 %v4948_v60  ;;  %5232 = vrot.lane.b32.xlu1 %v5231_v45, %s6022_s17  ;;  %v869_v13 = vld [vmem:[#allocation2 + $0x171] sm:$0xff]  ;;  %v5276_v31 = vpack.i.bf16 %v6955_v24, %v6953_v4  ;;  %v4725_v60 = vunpack.i.h.bf16 %v6641_v35 }
 0x123   : > { %v6922_v34 = vsel %vm1995_vm5, %v1989_v56, %v4944_v48  ;;  %v6925_v27 = vsel %vm1995_vm5, %v1990_v6, %v4945_v32  ;;  %5237 = vrot.lane.b32.xlu0 %v6783_v37, %s6023_s18  ;;  %v1994_v37 = vsel %vm1962_vm4, %v1961_v63, %v4875_v12  ;;  %v618_v6 = vld [vmem:[#allocation2 + $0x8] sm:$0xff]  ;;  %v617_v56 = vld [vmem:[#allocation2] sm:$0xff]  ;;  %v6967_v32 = vpack.i.bf16 %v772_v1, %v771_v20 }
 0x124   : > { %v6930_v29 = vsel %vm1995_vm5, %v1991_v5, %v4949_v26  ;;  %v6933_v46 = vsel %vm1995_vm5, %v1992_v14, %v4950_v28  ;;  %v4953_v45 = vpop.permute.xlu1 %4952  ;;  %v6969_v48 = vpack.i.bf16 %v804_v9, %v803_v62  ;;  %v4800_v12 = vunpack.i.h.bf16 %v6697_v30  ;;  %v8490_v63 = vld [vmem:[#allocation27_spill] sm:$0xff] }
 0x125   : > { %v4955_v59 = vunpack.i.h.bf16 %v4953_v45  ;;  %v4954_v3 = vunpack.i.l.bf16 %v4953_v45  ;;  %v6939_v39 = vpop.permute.xlu0 %4957  ;;  %v4804_v28 = vunpack.i.l.bf16 %v6702_v36  ;;  %v4805_v26 = vunpack.i.h.bf16 %v6702_v36 }
 0x126   : > { %5242 = vrot.lane.b32.xlu1 %v6792_v49, %s6023_s18  ;;  %v4879_v5 = vunpack.i.l.bf16 %v6754_v16  ;;  %v5281_v51 = vpack.i.bf16 %v6964_v33, %v6959_v10  ;;  %v1931_v50 = vsel %vm528_vm0, %v618_v6, %v4720_v58  ;;  %v1930_v30 = vsel %vm528_vm0, %v617_v56, %v4719_v11 }
 0x127   : > { %v6946_v19 = vsel %vm1995_vm5, %v1993_v40, %v4954_v3  ;;  %v6949_v18 = vsel %vm1995_vm5, %v1994_v37, %v4955_v59  ;;  %5247 = vrot.lane.b32.xlu0 %v6785_v22, %s6024_s19  ;;  %v868_v22 = vld [vmem:[#allocation2 + $0x169] sm:$0xff]  ;;  %v1932_v45 = vsel %vm528_vm0, %v6491_v23, %v4724_v25  ;;  %v4885_v7 = vunpack.i.h.bf16 %v8490_v63  ;;  %v8491_v40 = vld [vmem:[#allocation10_spill] sm:$0xff] }
 0x128   : > { %v6957_v57 = vpop.permute.xlu1 %4962  ;;  %v6985_v35 = vpack.i.bf16 %v869_v13, %v868_v22  ;;  %v4884_v59 = vunpack.i.l.bf16 %v8490_v63  ;;  %v4960_v3 = vunpack.i.h.bf16 %v6939_v39  ;;  %v4959_v37 = vunpack.i.l.bf16 %v6939_v39 }
 0x129   : > { %v4968_v21 = vpop.permute.xlu0 %4967  ;;  %v1933_v20 = vsel %vm528_vm0, %v8491_v40, %v4725_v60  ;;  %v1964_v23 = vsel %vm1962_vm4, %v1931_v50, %v4800_v12  ;;  %v1965_v1 = vsel %vm1962_vm4, %v1932_v45, %v4804_v28  ;;  %v4964_v58 = vunpack.i.l.bf16 %v6957_v57 }
 0x12a   : > { %5252 = vrot.lane.b32.xlu1 %v5251_v52, %s6024_s19  ;;  %v1966_v62 = vsel %vm1962_vm4, %v1933_v20, %v4805_v26  ;;  %v4970_v4 = vunpack.i.h.bf16 %v4968_v21  ;;  %v4969_v39 = vunpack.i.l.bf16 %v4968_v21  ;;  %v1998_v22 = vsel %vm1995_vm5, %v1965_v1, %v4884_v59  ;;  %v900_v20 = vld [vmem:[#allocation2 + $0x16a] sm:$0xff] }
 0x12b   : > { %5257 = vrot.lane.b32.xlu0 %v6792_v49, %s6019_s11  ;;  %v4880_v49 = vunpack.i.h.bf16 %v6754_v16  ;;  %v1963_v16 = vsel %vm1962_vm4, %v1930_v30, %v4799_v53  ;;  %v1999_v13 = vsel %vm1995_vm5, %v1966_v62, %v4885_v7  ;;  %v4965_v21 = vunpack.i.h.bf16 %v6957_v57 }
 0x12c   : > { %v6981_v14 = vpop.permute.xlu1 %4972  ;;  %v1996_v9 = vsel %vm1995_vm5, %v1963_v16, %v4879_v5  ;;  %v2031_v30 = vsel %vm2028_vm6, %v1998_v22, %v4964_v58  ;;  %v776_v22 = vld [vmem:[#allocation2 + $0x189] sm:$0xff] }
 0x12d   : > { %v4978_v36 = vpop.permute.xlu0 %4977  ;;  %v1997_v10 = vsel %vm1995_vm5, %v1964_v23, %v4880_v49  ;;  %v4974_v56 = vunpack.i.l.bf16 %v6981_v14  ;;  %v4975_v26 = vunpack.i.h.bf16 %v6981_v14  ;;  %v901_v23 = vld [vmem:[#allocation2 + $0x172] sm:$0xff] }
 0x12e   : > { %5262 = vrot.lane.b32.xlu1 %v6967_v32, %s6019_s11  ;;  %v4980_v11 = vunpack.i.h.bf16 %v4978_v36  ;;  %v4979_v25 = vunpack.i.l.bf16 %v4978_v36  ;;  %v2030_v6 = vsel %vm2028_vm6, %v1997_v10, %v4960_v3  ;;  %v2032_v3 = vsel %vm2028_vm6, %v1999_v13, %v4965_v21  ;;  %v807_v13 = vld [vmem:[#allocation2 + $0x182] sm:$0xff]  ;;  %v808_v21 = vld [vmem:[#allocation2 + $0x18a] sm:$0xff] }
 0x12f   : > { %5267 = vrot.lane.b32.xlu0 %v5251_v52, %s6021_s14  ;;  %v2029_v52 = vsel %vm2028_vm6, %v1996_v9, %v4959_v37  ;;  %v2063_v28 = vsel %vm2061_vm7, %v2030_v6, %v4970_v4  ;;  %v2064_v14 = vsel %vm2061_vm7, %v2031_v30, %v4974_v56  ;;  %v2065_v16 = vsel %vm2061_vm7, %v2032_v3, %v4975_v26  ;;  %v838_v56 = vld [vmem:[#allocation2 + $0x180] sm:$0xff]  ;;  %v8494_v3 = vld [vmem:[#allocation21_spill] sm:$0xff] }
 0x130   : > { %v4983_v24 = vpop.permute.xlu1 %4982  ;;  %v2062_v53 = vsel %vm2061_vm7, %v2029_v52, %v4969_v39  ;;  %v2096_v36 = vsel %vm2094_vm8, %v2063_v28, %v4980_v11 }
 0x131   : > { %v4988_v33 = vpop.permute.xlu0 %4987  ;;  %v4984_v5 = vunpack.i.l.bf16 %v4983_v24  ;;  %v4985_v45 = vunpack.i.h.bf16 %v4983_v24  ;;  %v2095_v57 = vsel %vm2094_vm8, %v2062_v53, %v4979_v25  ;;  %v5301_v25 = vpack.i.bf16 %v901_v23, %v900_v20  ;;  %v8496_v23 = vld [vmem:[#allocation11_spill] sm:$0xff] }
 0x132   : > { %5272 = vrot.lane.b32.xlu1 %v6969_v48, %s6021_s14  ;;  %v4990_v60 = vunpack.i.h.bf16 %v4988_v33  ;;  %v4989_v12 = vunpack.i.l.bf16 %v4988_v33  ;;  %v775_v33 = vld [vmem:[#allocation2 + $0x181] sm:$0xff] }
 0x133   : > { %5277 = vrot.lane.b32.xlu0 %v5276_v31, %s6022_s17  ;;  %v2097_v1 = vsel %vm2094_vm8, %v2064_v14, %v4984_v5  ;;  %v2098_v4 = vsel %vm2094_vm8, %v2065_v16, %v4985_v45  ;;  %v4810_v14 = vunpack.i.h.bf16 %v8494_v3 }
 0x134   : > { %v4993_v50 = vpop.permute.xlu1 %4992  ;;  %v2128_v37 = vsel %vm2127_vm9, %v2095_v57, %v4989_v12  ;;  %v2129_v40 = vsel %vm2127_vm9, %v2096_v36, %v4990_v60  ;;  %v839_v60 = vld [vmem:[#allocation2 + $0x188] sm:$0xff]  ;;  %v7053_v57 = vld [vmem:[#allocation2 + $0x1a0] sm:$0xff]  ;;  %v7059_v36 = vpack.i.bf16 %v808_v21, %v807_v13 }
 0x135   : > { %v4998_v49 = vpop.permute.xlu0 %4997  ;;  %v4995_v63 = vunpack.i.h.bf16 %v4993_v50  ;;  %v4994_v7 = vunpack.i.l.bf16 %v4993_v50  ;;  %v8492_v12 = vld [vmem:[#allocation15_spill] sm:$0xff]  ;;  %v8493_v50 = vld [vmem:[#allocation16_spill] sm:$0xff] }
 0x136   : > { %v5000_v59 = vunpack.i.h.bf16 %v4998_v49  ;;  %v4999_v31 = vunpack.i.l.bf16 %v4998_v49  ;;  %5282 = vrot.lane.b32.xlu1 %v5281_v51, %s6022_s17  ;;  %v4729_v53 = vunpack.i.l.bf16 %v8492_v12  ;;  %v4730_v5 = vunpack.i.h.bf16 %v8492_v12  ;;  %v7051_v49 = vld [vmem:[#allocation2 + $0x198] sm:$0xff] }
 0x137   : > { %5287 = vrot.lane.b32.xlu0 %v6967_v32, %s6023_s18  ;;  %v2130_v58 = vsel %vm2127_vm9, %v2097_v1, %v4994_v7  ;;  %v2131_v11 = vsel %vm2127_vm9, %v2098_v4, %v4995_v63  ;;  %v4735_v30 = vunpack.i.h.bf16 %v8493_v50  ;;  %v5326_v63 = vpack.i.bf16 %v839_v60, %v838_v56  ;;  %v7061_v7 = vld [vmem:[#allocation2 + $0x199] sm:$0xff] }
 0x138   : > { %v5003_v62 = vpop.permute.xlu1 %5002  ;;  %v2161_v51 = vsel %vm2160_vm10, %v2128_v37, %v4999_v31  ;;  %v2162_v9 = vsel %vm2160_vm10, %v2129_v40, %v5000_v59  ;;  %v7063_v59 = vld [vmem:[#allocation2 + $0x1a1] sm:$0xff]  ;;  %v4734_v31 = vunpack.i.l.bf16 %v8493_v50  ;;  %v4809_v37 = vunpack.i.l.bf16 %v8494_v3  ;;  %v8501_v56 = vld [vmem:[#allocation13_spill] sm:$0xff] }
 0x139   : > { %v5005_v39 = vunpack.i.h.bf16 %v5003_v62  ;;  %v5004_v24 = vunpack.i.l.bf16 %v5003_v62  ;;  %v7035_v32 = vpop.permute.xlu0 %5007  ;;  %v2193_v10 = vpack.c.bf16 %v2162_v9, %v2161_v51  ;;  %v8495_v40 = vld [vmem:[#allocation22_spill] sm:$0xff]  ;;  %v1934_v16 = vsel %vm528_vm0, %v8496_v23, %v4729_v53  ;;  %v8497_v62 = vld [vmem:[#allocation28_spill] sm:$0xff] }
 0x13a   : > { %5292 = vrot.lane.b32.xlu1 %v6985_v35, %s6023_s18  ;;  %v4815_v20 = vunpack.i.h.bf16 %v8495_v40  ;;  %v4814_v1 = vunpack.i.l.bf16 %v8495_v40  ;;  %v4889_v51 = vunpack.i.l.bf16 %v8497_v62  ;;  %v5331_v4 = vpack.i.bf16 %v7053_v57, %v7051_v49 }
 0x13b   : > { %v2163_v52 = vsel %vm2160_vm10, %v2130_v58, %v5004_v24  ;;  %v2164_v6 = vsel %vm2160_vm10, %v2131_v11, %v5005_v39  ;;  %5297 = vrot.lane.b32.xlu0 %v6969_v48, %s6024_s19  ;;  %4617 = vmatprep.mubr.msk.bf16.mxu0 %vm2231_vm11, %v2193_v10  ;;  %v7057_v48 = vpack.i.bf16 %v776_v22, %v775_v33  ;;  %v8498_v39 = vld [vmem:[#allocation12_spill] sm:$0xff]  ;;  %v8499_v10 = vld [vmem:[#allocation14_spill] sm:$0xff]  ;;  %v4890_v11 = vunpack.i.h.bf16 %v8497_v62  ;;  %v8500_v22 = vld [vmem:[#allocation29_spill] sm:$0xff] }
 0x13c   : > { %v7047_v28 = vpop.permute.xlu1 %5012  ;;  %v2194_v26 = vpack.c.bf16 %v2164_v6, %v2163_v52  ;;  %v1935_v24 = vsel %vm528_vm0, %v8498_v39, %v4730_v5  ;;  %v1937_v58 = vsel %vm528_vm0, %v8499_v10, %v4735_v30  ;;  %v5341_v33 = vpack.i.bf16 %v7063_v59, %v7061_v7 }
 0x13d   : > { %v5018_v45 = vpop.permute.xlu0 %5017  ;;  %v4895_v13 = vunpack.i.h.bf16 %v8500_v22  ;;  %v4894_v52 = vunpack.i.l.bf16 %v8500_v22  ;;  %v5010_v6 = vunpack.i.h.bf16 %v7035_v32  ;;  %v5009_v21 = vunpack.i.l.bf16 %v7035_v32 }
 0x13e   : > { %5302 = vrot.lane.b32.xlu1 %v5301_v25, %s6024_s19  ;;  %4618 = vmatmul.mubr.msk.bf16.vlgmr.msra.gmra.mxu0 %vm2231_vm11, %v2194_v26  ;;  %v1936_v60 = vsel %vm528_vm0, %v8501_v56, %v4734_v31  ;;  %v1968_v12 = vsel %vm1962_vm4, %v1935_v24, %v4810_v14  ;;  %v1967_v53 = vsel %vm1962_vm4, %v1934_v16, %v4809_v37  ;;  %v5020_v30 = vunpack.i.h.bf16 %v5018_v45 }
 0x13f   : > { %5307 = vrot.lane.b32.xlu0 %v6985_v35, %s6019_s11  ;;  %v1970_v26 = vsel %vm1962_vm4, %v1937_v58, %v4815_v20  ;;  %v1969_v5 = vsel %vm1962_vm4, %v1936_v60, %v4814_v1  ;;  %v2000_v50 = vsel %vm1995_vm5, %v1967_v53, %v4889_v51  ;;  %v5019_v32 = vunpack.i.l.bf16 %v5018_v45  ;;  %v904_v53 = vld [vmem:[#allocation2 + $0x19a] sm:$0xff] }
 0x140   : > { %v5023_v9 = vpop.permute.xlu1 %5022  ;;  %v2001_v57 = vsel %vm1995_vm5, %v1968_v12, %v4890_v11  ;;  %v5014_v3 = vunpack.i.l.bf16 %v7047_v28  ;;  %v2002_v37 = vsel %vm1995_vm5, %v1969_v5, %v4894_v52  ;;  %v2003_v20 = vsel %vm1995_vm5, %v1970_v26, %v4895_v13  ;;  %v905_v26 = vld [vmem:[#allocation2 + $0x1a2] sm:$0xff] }
 0x141   : > { %v5028_v35 = vpop.permute.xlu0 %5027  ;;  %v2034_v23 = vsel %vm2028_vm6, %v2001_v57, %v5010_v6  ;;  %v5015_v45 = vunpack.i.h.bf16 %v7047_v28  ;;  %v5024_v16 = vunpack.i.l.bf16 %v5023_v9  ;;  %v5025_v24 = vunpack.i.h.bf16 %v5023_v9 }
 0x142   : > { %5312 = vrot.lane.b32.xlu1 %v7057_v48, %s6019_s11  ;;  %v5030_v31 = vunpack.i.h.bf16 %v5028_v35  ;;  %v5029_v40 = vunpack.i.l.bf16 %v5028_v35  ;;  %v2067_v39 = vsel %vm2061_vm7, %v2034_v23, %v5020_v30  ;;  %v2035_v11 = vsel %vm2028_vm6, %v2002_v37, %v5014_v3 }
 0x143   : > { %5317 = vrot.lane.b32.xlu0 %v5301_v25, %s6021_s14  ;;  %v2033_v25 = vsel %vm2028_vm6, %v2000_v50, %v5009_v21  ;;  %v2068_v9 = vsel %vm2061_vm7, %v2035_v11, %v5024_v16  ;;  %v5351_v37 = vpack.i.bf16 %v905_v26, %v904_v53  ;;  %v8502_v16 = vld [vmem:[#allocation17_spill] sm:$0xff] }
 0x144   : > { %v5033_v49 = vpop.permute.xlu1 %5032  ;;  %v2066_v51 = vsel %vm2061_vm7, %v2033_v25, %v5019_v32  ;;  %v2100_v22 = vsel %vm2094_vm8, %v2067_v39, %v5030_v31  ;;  %v8504_v39 = vld [vmem:[#allocation23_spill] sm:$0xff] }
 0x145   : > { %v5038_v14 = vpop.permute.xlu0 %5037  ;;  %v5034_v10 = vunpack.i.l.bf16 %v5033_v49  ;;  %v2099_v35 = vsel %vm2094_vm8, %v2066_v51, %v5029_v40  ;;  %v5035_v13 = vunpack.i.h.bf16 %v5033_v49  ;;  %v8503_v51 = vld [vmem:[#allocation18_spill] sm:$0xff] }
 0x146   : > { %5322 = vrot.lane.b32.xlu1 %v7059_v36, %s6021_s14  ;;  %v5040_v1 = vunpack.i.h.bf16 %v5038_v14  ;;  %v5039_v62 = vunpack.i.l.bf16 %v5038_v14  ;;  %v4745_v7 = vunpack.i.h.bf16 %v8503_v51 }
 0x147   : > { %5327 = vrot.lane.b32.xlu0 %v5326_v63, %s6022_s17  ;;  %v2036_v63 = vsel %vm2028_vm6, %v2003_v20, %v5015_v45  ;;  %v2101_v50 = vsel %vm2094_vm8, %v2068_v9, %v5034_v10  ;;  %v8505_v10 = vld [vmem:[#allocation24_spill] sm:$0xff] }
 0x148   : > { %v5043_v58 = vpop.permute.xlu1 %5042  ;;  %v2132_v60 = vsel %vm2127_vm9, %v2099_v35, %v5039_v62  ;;  %v2133_v12 = vsel %vm2127_vm9, %v2100_v22, %v5040_v1  ;;  %v2069_v5 = vsel %vm2061_vm7, %v2036_v63, %v5025_v24  ;;  %v4740_v1 = vunpack.i.h.bf16 %v8502_v16 }
 0x149   : > { %v5048_v28 = vpop.permute.xlu0 %5047  ;;  %v5045_v52 = vunpack.i.h.bf16 %v5043_v58  ;;  %v5044_v6 = vunpack.i.l.bf16 %v5043_v58  ;;  %v2102_v49 = vsel %vm2094_vm8, %v2069_v5, %v5035_v13  ;;  %v4739_v62 = vunpack.i.l.bf16 %v8502_v16  ;;  %v5927_v13 = vld [vmem:[#allocation2 + $0x68] sm:$0xff]  ;;  %v5930_v5 = vld [vmem:[#allocation2 + $0x78] sm:$0xff] }
 0x14a   : > { %v5050_v21 = vunpack.i.h.bf16 %v5048_v28  ;;  %v5049_v56 = vunpack.i.l.bf16 %v5048_v28  ;;  %5332 = vrot.lane.b32.xlu1 %v5331_v4, %s6022_s17  ;;  %v4819_v24 = vunpack.i.l.bf16 %v8504_v39  ;;  %v4825_v58 = vunpack.i.h.bf16 %v8505_v10 }
 0x14b   : > { %5337 = vrot.lane.b32.xlu0 %v7057_v48, %s6023_s18  ;;  %v2134_v14 = vsel %vm2127_vm9, %v2101_v50, %v5044_v6  ;;  %v2135_v48 = vsel %vm2127_vm9, %v2102_v49, %v5045_v52  ;;  %v4824_v11 = vunpack.i.l.bf16 %v8505_v10  ;;  %v4899_v35 = vunpack.i.l.bf16 %v6775_v42  ;;  %v5928_v52 = vld [vmem:[#allocation2 + $0x60] sm:$0xff] }
 0x14c   : > { %v2165_v30 = vsel %vm2160_vm10, %v2132_v60, %v5049_v56  ;;  %v2166_v4 = vsel %vm2160_vm10, %v2133_v12, %v5050_v21  ;;  %v5053_v32 = vpop.permute.xlu1 %5052  ;;  %v1939_v28 = vsel %vm528_vm0, %v5927_v13, %v4740_v1  ;;  %v1938_v6 = vsel %vm528_vm0, %v5928_v52, %v4739_v62  ;;  %v5929_v21 = vld [vmem:[#allocation2 + $0x80] sm:$0xff] }
 0x14d   : > { %v5055_v57 = vunpack.i.h.bf16 %v5053_v32  ;;  %v5054_v3 = vunpack.i.l.bf16 %v5053_v32  ;;  %v5058_v31 = vpop.permute.xlu0 %5057  ;;  %v2195_v40 = vpack.c.bf16 %v2166_v4, %v2165_v30  ;;  %v1941_v56 = vsel %vm528_vm0, %v5929_v21, %v4745_v7 }
 0x14e   : > { %5342 = vrot.lane.b32.xlu1 %v5341_v33, %s6023_s18  ;;  %v4744_v33 = vunpack.i.l.bf16 %v8503_v51  ;;  %v4900_v63 = vunpack.i.h.bf16 %v6775_v42  ;;  %v4905_v60 = vunpack.i.h.bf16 %v6798_v0  ;;  %v4904_v12 = vunpack.i.l.bf16 %v6798_v0 }
 0x14f   : > { %v2167_v20 = vsel %vm2160_vm10, %v2134_v14, %v5054_v3  ;;  %v2168_v25 = vsel %vm2160_vm10, %v2135_v48, %v5055_v57  ;;  %5347 = vrot.lane.b32.xlu0 %v7059_v36, %s6024_s19  ;;  %4621 = vmatprep.mubr.msk.bf16.mxu0 %vm2231_vm11, %v2195_v40  ;;  %v4820_v36 = vunpack.i.h.bf16 %v8504_v39  ;;  %v5060_v53 = vunpack.i.h.bf16 %v5058_v31 }
 0x150   : > { %v7136_v23 = vpop.permute.xlu1 %5062  ;;  %v2196_v45 = vpack.c.bf16 %v2168_v25, %v2167_v20  ;;  %v5059_v26 = vunpack.i.l.bf16 %v5058_v31  ;;  %v1940_v50 = vsel %vm528_vm0, %v5930_v5, %v4744_v33  ;;  %v1971_v30 = vsel %vm1962_vm4, %v1938_v6, %v4819_v24 }
 0x151   : > { %v5068_v59 = vpop.permute.xlu0 %5067  ;;  %v1972_v4 = vsel %vm1962_vm4, %v1939_v28, %v4820_v36  ;;  %v1974_v32 = vsel %vm1962_vm4, %v1941_v56, %v4825_v58  ;;  %v1973_v49 = vsel %vm1962_vm4, %v1940_v50, %v4824_v11  ;;  %v2004_v42 = vsel %vm1995_vm5, %v1971_v30, %v4899_v35 }
 0x152   : > { %5352 = vrot.lane.b32.xlu1 %v5351_v37, %s6024_s19  ;;  %4622 = vmatmul.mubr.msk.bf16.gmra.mxu0 %vm2231_vm11, %v2196_v45  ;;  %v5070_v57 = vunpack.i.h.bf16 %v5068_v59  ;;  %v5069_v3 = vunpack.i.l.bf16 %v5068_v59  ;;  %v2005_v0 = vsel %vm1995_vm5, %v1972_v4, %v4900_v63  ;;  %v5064_v31 = vunpack.i.l.bf16 %v7136_v23  ;;  %s6031_s19 = smov 64  }
 0x153   : > { %v2006_v20 = vsel %vm1995_vm5, %v1973_v49, %v4904_v12  ;;  %v2007_v25 = vsel %vm1995_vm5, %v1974_v32, %v4905_v60  ;;  %v2037_v45 = vsel %vm2028_vm6, %v2004_v42, %v5059_v26  ;;  %v2038_v16 = vsel %vm2028_vm6, %v2005_v0, %v5060_v53 }
 0x154   : > { %v5073_v22 = vpop.permute.xlu1 %5072  ;;  %v5065_v1 = vunpack.i.h.bf16 %v7136_v23  ;;  %v2070_v59 = vsel %vm2061_vm7, %v2037_v45, %v5069_v3  ;;  %v2071_v33 = vsel %vm2061_vm7, %v2038_v16, %v5070_v57  ;;  %v2039_v10 = vsel %vm2028_vm6, %v2006_v20, %v5064_v31  ;;  %v8506_v31 = vld [vmem:[#allocation19_spill] sm:$0xff]  ;;  %v8508_v16 = vld [vmem:[#allocation25_spill] sm:$0xff] }
 0x155   : > { %v5078_v9 = vpop.permute.xlu0 %5077  ;;  %v5074_v62 = vunpack.i.l.bf16 %v5073_v22  ;;  %v5075_v39 = vunpack.i.h.bf16 %v5073_v22 }
 0x156   : > { %v5080_v14 = vunpack.i.h.bf16 %v5078_v9  ;;  %v5079_v48 = vunpack.i.l.bf16 %v5078_v9  ;;  %v2040_v21 = vsel %vm2028_vm6, %v2007_v25, %v5065_v1  ;;  %v4830_v1 = vunpack.i.h.bf16 %v8508_v16 }
 0x157   : > { %v2072_v56 = vsel %vm2061_vm7, %v2039_v10, %v5074_v62  ;;  %v2073_v9 = vsel %vm2061_vm7, %v2040_v21, %v5075_v39  ;;  %v4829_v62 = vunpack.i.l.bf16 %v8508_v16  ;;  %v5932_v10 = vld [vmem:[#allocation2 + $0x90] sm:$0xff] }
 0x158   : > { %v5083_v40 = vpop.permute.xlu1 %5082  ;;  %v2103_v58 = vsel %vm2094_vm8, %v2070_v59, %v5079_v48  ;;  %v2104_v11 = vsel %vm2094_vm8, %v2071_v33, %v5080_v14  ;;  %v4750_v14 = vunpack.i.h.bf16 %v8506_v31  ;;  %v4749_v48 = vunpack.i.l.bf16 %v8506_v31 }
 0x159   : > { %v5088_v37 = vpop.permute.xlu0 %5087  ;;  %v5084_v36 = vunpack.i.l.bf16 %v5083_v40  ;;  %v5085_v35 = vunpack.i.h.bf16 %v5083_v40  ;;  %v4909_v33 = vunpack.i.l.bf16 %v6806_v41 }
 0x15a   : > { %v5090_v51 = vunpack.i.h.bf16 %v5088_v37  ;;  %v5089_v7 = vunpack.i.l.bf16 %v5088_v37  ;;  %v8507_v37 = vld [vmem:[#allocation20_spill] sm:$0xff] }
 0x15b   : > { %v2105_v60 = vsel %vm2094_vm8, %v2072_v56, %v5084_v36  ;;  %v2106_v5 = vsel %vm2094_vm8, %v2073_v9, %v5085_v35  ;;  %v4755_v20 = vunpack.i.h.bf16 %v8507_v37  ;;  %v4754_v45 = vunpack.i.l.bf16 %v8507_v37  ;;  %v5931_v36 = vld [vmem:[#allocation2 + $0x98] sm:$0xff]  ;;  %v5934_v56 = vld [vmem:[#allocation2 + $0xa8] sm:$0xff] }
 0x15c   : > { %v5093_v24 = vpop.permute.xlu1 %5092  ;;  %v2136_v22 = vsel %vm2127_vm9, %v2103_v58, %v5089_v7  ;;  %v2137_v63 = vsel %vm2127_vm9, %v2104_v11, %v5090_v51  ;;  %v8509_v51 = vld [vmem:[#allocation26_spill] sm:$0xff]  ;;  %v1942_v58 = vsel %vm528_vm0, %v5932_v10, %v4749_v48  ;;  %v5933_v11 = vld [vmem:[#allocation2 + $0xb0] sm:$0xff] }
 0x15d   : > { %v5098_v13 = vpop.permute.xlu0 %5097  ;;  %v5095_v28 = vunpack.i.h.bf16 %v5093_v24  ;;  %v5094_v23 = vunpack.i.l.bf16 %v5093_v24  ;;  %v4835_v7 = vunpack.i.h.bf16 %v8509_v51  ;;  %v4834_v59 = vunpack.i.l.bf16 %v8509_v51 }
 0x15e   : > { %v5100_v52 = vunpack.i.h.bf16 %v5098_v13  ;;  %v5099_v6 = vunpack.i.l.bf16 %v5098_v13  ;;  %v1943_v24 = vsel %vm528_vm0, %v5931_v36, %v4750_v14  ;;  %v1945_v35 = vsel %vm528_vm0, %v5933_v11, %v4755_v20 }
 0x15f   : > { %v2138_v49 = vsel %vm2127_vm9, %v2105_v60, %v5094_v23  ;;  %v2139_v42 = vsel %vm2127_vm9, %v2106_v5, %v5095_v28  ;;  %v4910_v13 = vunpack.i.h.bf16 %v6806_v41  ;;  %v4915_v23 = vunpack.i.h.bf16 %v6830_v61 }
 0x160   : > { %v2169_v12 = vsel %vm2160_vm10, %v2136_v22, %v5099_v6  ;;  %v2170_v53 = vsel %vm2160_vm10, %v2137_v63, %v5100_v52  ;;  %v5103_v26 = vpop.permute.xlu1 %5102  ;;  %v4914_v52 = vunpack.i.l.bf16 %v6830_v61  ;;  %v1944_v22 = vsel %vm528_vm0, %v5934_v56, %v4754_v45 }
 0x161   : > { %v5105_v50 = vunpack.i.h.bf16 %v5103_v26  ;;  %v5104_v30 = vunpack.i.l.bf16 %v5103_v26  ;;  %v5108_v4 = vpop.permute.xlu0 %5107  ;;  %v2197_v32 = vpack.c.bf16 %v2170_v53, %v2169_v12  ;;  %v1975_v63 = vsel %vm1962_vm4, %v1942_v58, %v4829_v62 }
 0x162   : > { %v5110_v6 = vunpack.i.h.bf16 %v5108_v4  ;;  %v5109_v21 = vunpack.i.l.bf16 %v5108_v4  ;;  %v1976_v9 = vsel %vm1962_vm4, %v1943_v24, %v4830_v1  ;;  %v1978_v60 = vsel %vm1962_vm4, %v1945_v35, %v4835_v7 }
 0x163   : > { %v2171_v57 = vsel %vm2160_vm10, %v2138_v49, %v5104_v30  ;;  %v2172_v3 = vsel %vm2160_vm10, %v2139_v42, %v5105_v50  ;;  %4625 = vmatprep.mubr.msk.bf16.mxu0 %vm2231_vm11, %v2197_v32  ;;  %v1977_v12 = vsel %vm1962_vm4, %v1944_v22, %v4834_v59  ;;  %v2008_v41 = vsel %vm1995_vm5, %v1975_v63, %v4909_v33 }
 0x164   : > { %v7187_v40 = vpop.permute.xlu1 %5112  ;;  %v2198_v0 = vpack.c.bf16 %v2172_v3, %v2171_v57  ;;  %v2009_v61 = vsel %vm1995_vm5, %v1976_v9, %v4910_v13  ;;  %v2010_v49 = vsel %vm1995_vm5, %v1977_v12, %v4914_v52  ;;  %v2011_v42 = vsel %vm1995_vm5, %v1978_v60, %v4915_v23 }
 0x165   : > { %v5118_v25 = vpop.permute.xlu0 %5117  ;;  %v5114_v50 = vunpack.i.l.bf16 %v7187_v40  ;;  %v2041_v57 = vsel %vm2028_vm6, %v2008_v41, %v5109_v21  ;;  %v2042_v3 = vsel %vm2028_vm6, %v2009_v61, %v5110_v6  ;;  %vm3951_vm4 = vcmask 916480  }
 0x166   : > { %4626 = vmatmul.mubr.msk.bf16.gmra.mxu0 %vm2231_vm11, %v2198_v0  ;;  %v5120_v53 = vunpack.i.h.bf16 %v5118_v25  ;;  %v5119_v26 = vunpack.i.l.bf16 %v5118_v25  ;;  %v5115_v0 = vunpack.i.h.bf16 %v7187_v40  ;;  %vm4441_vm5 = vcmask 0  }
 0x167   : > { %v2043_v1 = vsel %vm2028_vm6, %v2010_v49, %v5114_v50 }
 0x168   : > { %v5123_v39 = vpop.permute.xlu1 %5122  ;;  %v2074_v37 = vsel %vm2061_vm7, %v2041_v57, %v5119_v26  ;;  %v2075_v20 = vsel %vm2061_vm7, %v2042_v3, %v5120_v53  ;;  %v2044_v10 = vsel %vm2028_vm6, %v2011_v42, %v5115_v0  ;;  %v8510_v3 = vmov 0.0  }
 0x169   : > { %v5128_v28 = vpop.permute.xlu0 %5127  ;;  %v5124_v31 = vunpack.i.l.bf16 %v5123_v39  ;;  %v5125_v25 = vunpack.i.h.bf16 %v5123_v39  ;;  %2488 = vst.msk [vmem:[#allocation3 + $0x30] sm:$0xff] %vm2480_vm12, %v8510_v3  ;;  %2489 = vst.msk [vmem:[#allocation3 + $0x38] sm:$0xff] %vm2480_vm12, %v8510_v3 }
 0x16a   : > { %v5130_v30 = vunpack.i.h.bf16 %v5128_v28  ;;  %v5129_v4 = vunpack.i.l.bf16 %v5128_v28  ;;  %2481 = vst.msk [vmem:[#allocation3] sm:$0xff] %vm2480_vm12, %v8510_v3  ;;  %2482 = vst.msk [vmem:[#allocation3 + $0x8] sm:$0xff] %vm2480_vm12, %v8510_v3 }
 0x16b   : > { %v2076_v58 = vsel %vm2061_vm7, %v2043_v1, %v5124_v31  ;;  %v2077_v35 = vsel %vm2061_vm7, %v2044_v10, %v5125_v25  ;;  %2485 = vst.msk [vmem:[#allocation3 + $0x18] sm:$0xff] %vm2480_vm12, %v8510_v3  ;;  %2486 = vst.msk [vmem:[#allocation3 + $0x20] sm:$0xff] %vm2480_vm12, %v8510_v3 }
 0x16c   : > { %v5133_v5 = vpop.permute.xlu1 %5132  ;;  %v2107_v62 = vsel %vm2094_vm8, %v2074_v37, %v5129_v4  ;;  %v2108_v51 = vsel %vm2094_vm8, %v2075_v20, %v5130_v30  ;;  %2491 = vst.msk [vmem:[#allocation3 + $0x48] sm:$0xff] %vm2480_vm12, %v8510_v3  ;;  %2492 = vst.msk [vmem:[#allocation3 + $0x50] sm:$0xff] %vm2480_vm12, %v8510_v3 }
 0x16d   : > { %v5138_v32 = vpop.permute.xlu0 %5137  ;;  %v5134_v45 = vunpack.i.l.bf16 %v5133_v5  ;;  %v5135_v7 = vunpack.i.h.bf16 %v5133_v5  ;;  %2494 = vst.msk [vmem:[#allocation3 + $0x60] sm:$0xff] %vm2480_vm12, %v8510_v3  ;;  %2495 = vst.msk [vmem:[#allocation3 + $0x68] sm:$0xff] %vm2480_vm12, %v8510_v3 }
 0x16e   : > { %v5140_v14 = vunpack.i.h.bf16 %v5138_v32  ;;  %v5139_v48 = vunpack.i.l.bf16 %v5138_v32  ;;  %2497 = vst.msk [vmem:[#allocation3 + $0x78] sm:$0xff] %vm2480_vm12, %v8510_v3  ;;  %2498 = vst.msk [vmem:[#allocation3 + $0x80] sm:$0xff] %vm2480_vm12, %v8510_v3 }
 0x16f   : > { %v2109_v13 = vsel %vm2094_vm8, %v2076_v58, %v5134_v45  ;;  %v2110_v6 = vsel %vm2094_vm8, %v2077_v35, %v5135_v7  ;;  %2500 = vst.msk [vmem:[#allocation3 + $0x90] sm:$0xff] %vm2480_vm12, %v8510_v3  ;;  %2501 = vst.msk [vmem:[#allocation3 + $0x98] sm:$0xff] %vm2480_vm12, %v8510_v3 }
 0x170   : > { %v5143_v16 = vpop.permute.xlu1 %5142  ;;  %v2140_v39 = vsel %vm2127_vm9, %v2107_v62, %v5139_v48  ;;  %v2141_v11 = vsel %vm2127_vm9, %v2108_v51, %v5140_v14  ;;  %2503 = vst.msk [vmem:[#allocation3 + $0xa8] sm:$0xff] %vm2480_vm12, %v8510_v3  ;;  %2504 = vst.msk [vmem:[#allocation3 + $0xb0] sm:$0xff] %vm2480_vm12, %v8510_v3 }
 0x171   : > { %v5148_v59 = vpop.permute.xlu0 %5147  ;;  %v5145_v33 = vunpack.i.h.bf16 %v5143_v16  ;;  %v5144_v40 = vunpack.i.l.bf16 %v5143_v16  ;;  %2506 = vst.msk [vmem:[#allocation3 + $0xc0] sm:$0xff] %vm2480_vm12, %v8510_v3  ;;  %2507 = vst.msk [vmem:[#allocation3 + $0xc8] sm:$0xff] %vm2480_vm12, %v8510_v3 }
 0x172   : > { %v5150_v36 = vunpack.i.h.bf16 %v5148_v59  ;;  %v5149_v24 = vunpack.i.l.bf16 %v5148_v59  ;;  %2509 = vst.msk [vmem:[#allocation3 + $0xd8] sm:$0xff] %vm2480_vm12, %v8510_v3  ;;  %2510 = vst.msk [vmem:[#allocation3 + $0xe0] sm:$0xff] %vm2480_vm12, %v8510_v3 }
 0x173   : > { %v2142_v9 = vsel %vm2127_vm9, %v2109_v13, %v5144_v40  ;;  %v2143_v60 = vsel %vm2127_vm9, %v2110_v6, %v5145_v33  ;;  %2512 = vst.msk [vmem:[#allocation3 + $0xf0] sm:$0xff] %vm2480_vm12, %v8510_v3  ;;  %2513 = vst.msk [vmem:[#allocation3 + $0xf8] sm:$0xff] %vm2480_vm12, %v8510_v3 }
 0x174   : > { %v2173_v28 = vsel %vm2160_vm10, %v2140_v39, %v5149_v24  ;;  %v2174_v23 = vsel %vm2160_vm10, %v2141_v11, %v5150_v36  ;;  %v5153_v52 = vpop.permute.xlu1 %5152  ;;  %2515 = vst.msk [vmem:[#allocation3 + $0x108] sm:$0xff] %vm2480_vm12, %v8510_v3  ;;  %2516 = vst.msk [vmem:[#allocation3 + $0x110] sm:$0xff] %vm2480_vm12, %v8510_v3 }
 0x175   : > { %v5155_v21 = vunpack.i.h.bf16 %v5153_v52  ;;  %v5154_v56 = vunpack.i.l.bf16 %v5153_v52  ;;  %v7232_v22 = vpop.permute.xlu0 %5157  ;;  %v2199_v63 = vpack.c.bf16 %v2174_v23, %v2173_v28  ;;  %2518 = vst.msk [vmem:[#allocation3 + $0x120] sm:$0xff] %vm2480_vm12, %v8510_v3  ;;  %2519 = vst.msk [vmem:[#allocation3 + $0x128] sm:$0xff] %vm2480_vm12, %v8510_v3 }
 0x176   : > { %v5160_v30 = vunpack.i.h.bf16 %v7232_v22  ;;  %v5159_v4 = vunpack.i.l.bf16 %v7232_v22  ;;  %2521 = vst.msk [vmem:[#allocation3 + $0x138] sm:$0xff] %vm2480_vm12, %v8510_v3  ;;  %2522 = vst.msk [vmem:[#allocation3 + $0x140] sm:$0xff] %vm2480_vm12, %v8510_v3 }
 0x177   : > { %v2175_v12 = vsel %vm2160_vm10, %v2142_v9, %v5154_v56  ;;  %v2176_v41 = vsel %vm2160_vm10, %v2143_v60, %v5155_v21  ;;  %4629 = vmatprep.mubr.msk.bf16.mxu0 %vm2231_vm11, %v2199_v63  ;;  %2524 = vst.msk [vmem:[#allocation3 + $0x150] sm:$0xff] %vm2480_vm12, %v8510_v3  ;;  %2525 = vst.msk [vmem:[#allocation3 + $0x158] sm:$0xff] %vm2480_vm12, %v8510_v3 }
 0x178   : > { %v7239_v53 = vpop.permute.xlu1 %5162  ;;  %v2200_v26 = vpack.c.bf16 %v2176_v41, %v2175_v12  ;;  %2527 = vst.msk [vmem:[#allocation3 + $0x168] sm:$0xff] %vm2480_vm12, %v8510_v3  ;;  %2528 = vst.msk [vmem:[#allocation3 + $0x170] sm:$0xff] %vm2480_vm12, %v8510_v3  ;;  %v2045_v37 = vsel %vm2028_vm6, %v6856_v47, %v5159_v4  ;;  %v2046_v20 = vsel %vm2028_vm6, %v6859_v43, %v5160_v30 }
 0x179   : > { %v7241_v5 = vpop.permute.xlu0 %5167  ;;  %v5164_v32 = vunpack.i.l.bf16 %v7239_v53  ;;  %2530 = vst.msk [vmem:[#allocation3 + $0x180] sm:$0xff] %vm2480_vm12, %v8510_v3  ;;  %2531 = vst.msk [vmem:[#allocation3 + $0x188] sm:$0xff] %vm2480_vm12, %v8510_v3  ;;  %v5165_v0 = vunpack.i.h.bf16 %v7239_v53  ;;  %v2633_v53 = vld [vmem:[#allocation3 + $0x2] sm:$0xff] }
 0x17a   : > { %4630 = vmatmul.mubr.msk.bf16.gmra.mxu0 %vm2231_vm11, %v2200_v26  ;;  %v5170_v49 = vunpack.i.h.bf16 %v7241_v5  ;;  %v5169_v42 = vunpack.i.l.bf16 %v7241_v5  ;;  %2533 = vst.msk [vmem:[#allocation3 + $0x198] sm:$0xff] %vm2480_vm12, %v8510_v3  ;;  %2534 = vst.msk [vmem:[#allocation3 + $0x1a0] sm:$0xff] %vm2480_vm12, %v8510_v3 }
 0x17b   : > { %2490 = vst.msk [vmem:[#allocation3 + $0x40] sm:$0x3] %vm2483_vm13, %v8510_v3  ;;  %2484 = vst.msk [vmem:[#allocation3 + $0x10] sm:$0x3] %vm2483_vm13, %v8510_v3  ;;  %v2047_v62 = vsel %vm2028_vm6, %v6870_v8, %v5164_v32  ;;  %v2048_v59 = vsel %vm2028_vm6, %v6873_v44, %v5165_v0  ;;  %v2601_v44 = vld [vmem:[#allocation3 + $0x1] sm:$0xff] }
 0x17c   : > { %v7244_v61 = vpop.permute.xlu1 %5172  ;;  %2487 = vst.msk [vmem:[#allocation3 + $0x28] sm:$0x3] %vm2483_vm13, %v8510_v3  ;;  %2493 = vst.msk [vmem:[#allocation3 + $0x58] sm:$0x3] %vm2483_vm13, %v8510_v3  ;;  %v2078_v47 = vsel %vm2061_vm7, %v2045_v37, %v5169_v42  ;;  %v2079_v51 = vsel %vm2061_vm7, %v2046_v20, %v5170_v49 }
 0x17d   : > { %v7246_v50 = vpop.permute.xlu0 %5177  ;;  %2496 = vst.msk [vmem:[#allocation3 + $0x70] sm:$0x3] %vm2483_vm13, %v8510_v3  ;;  %2499 = vst.msk [vmem:[#allocation3 + $0x88] sm:$0x3] %vm2483_vm13, %v8510_v3  ;;  %v5175_v25 = vunpack.i.h.bf16 %v7244_v61  ;;  %v5174_v45 = vunpack.i.l.bf16 %v7244_v61 }
 0x17e   : > { %2502 = vst.msk [vmem:[#allocation3 + $0xa0] sm:$0x3] %vm2483_vm13, %v8510_v3  ;;  %2505 = vst.msk [vmem:[#allocation3 + $0xb8] sm:$0x3] %vm2483_vm13, %v8510_v3  ;;  %v5180_v31 = vunpack.i.h.bf16 %v7246_v50  ;;  %v5179_v14 = vunpack.i.l.bf16 %v7246_v50 }
 0x17f   : > { %2508 = vst.msk [vmem:[#allocation3 + $0xd0] sm:$0x3] %vm2483_vm13, %v8510_v3  ;;  %2511 = vst.msk [vmem:[#allocation3 + $0xe8] sm:$0x3] %vm2483_vm13, %v8510_v3  ;;  %v2080_v11 = vsel %vm2061_vm7, %v2047_v62, %v5174_v45  ;;  %v2081_v35 = vsel %vm2061_vm7, %v2048_v59, %v5175_v25 }
 0x180   : > { %v7253_v57 = vpop.permute.xlu1 %5182  ;;  %2514 = vst.msk [vmem:[#allocation3 + $0x100] sm:$0x3] %vm2483_vm13, %v8510_v3  ;;  %2517 = vst.msk [vmem:[#allocation3 + $0x118] sm:$0x3] %vm2483_vm13, %v8510_v3  ;;  %v2111_v33 = vsel %vm2094_vm8, %v2078_v47, %v5179_v14  ;;  %v2112_v40 = vsel %vm2094_vm8, %v2079_v51, %v5180_v31 }
 0x181   : > { %2520 = vst.msk [vmem:[#allocation3 + $0x130] sm:$0x3] %vm2483_vm13, %v8510_v3  ;;  %2523 = vst.msk [vmem:[#allocation3 + $0x148] sm:$0x3] %vm2483_vm13, %v8510_v3  ;;  %v5188_v48 = vpop.permute.xlu0 %5187  ;;  %v5184_v43 = vunpack.i.l.bf16 %v7253_v57  ;;  %v5185_v8 = vunpack.i.h.bf16 %v7253_v57 }
 0x182   : > { %2526 = vst.msk [vmem:[#allocation3 + $0x160] sm:$0x3] %vm2483_vm13, %v8510_v3  ;;  %2529 = vst.msk [vmem:[#allocation3 + $0x178] sm:$0x3] %vm2483_vm13, %v8510_v3  ;;  %v5190_v16 = vunpack.i.h.bf16 %v5188_v48  ;;  %v5189_v1 = vunpack.i.l.bf16 %v5188_v48  ;;  %v2602_v23 = vld [vmem:[#allocation3 + $0x9] sm:$0xff] }
 0x183   : > { %2532 = vst.msk [vmem:[#allocation3 + $0x190] sm:$0x3] %vm2483_vm13, %v8510_v3  ;;  %2535 = vst.msk [vmem:[#allocation3 + $0x1a8] sm:$0x3] %vm2483_vm13, %v8510_v3  ;;  %v2113_v52 = vsel %vm2094_vm8, %v2080_v11, %v5184_v43  ;;  %v5356_v22 = vpack.i.bf16 %v2602_v23, %v2601_v44  ;;  %v2114_v63 = vsel %vm2094_vm8, %v2081_v35, %v5185_v8  ;;  %v2634_v26 = vld [vmem:[#allocation3 + $0xa] sm:$0xff] }
 0x184   : > { %v5193_v7 = vpop.permute.xlu1 %5192  ;;  %v2144_v13 = vsel %vm2127_vm9, %v2111_v33, %v5189_v1  ;;  %v2145_v28 = vsel %vm2127_vm9, %v2112_v40, %v5190_v16  ;;  %v5361_v50 = vpack.i.bf16 %v2634_v26, %v2633_v53 }
 0x185   : > { %v5198_v36 = vpop.permute.xlu0 %5197  ;;  %v5195_v24 = vunpack.i.h.bf16 %v5193_v7  ;;  %v5194_v10 = vunpack.i.l.bf16 %v5193_v7  ;;  %5357 = vrot.lane.b32.xlu0 %v5356_v22, %s6025_s21 }
 0x186   : > { %v5200_v58 = vunpack.i.h.bf16 %v5198_v36  ;;  %v5199_v39 = vunpack.i.l.bf16 %v5198_v36 }
 0x187   : > { %v2146_v5 = vsel %vm2127_vm9, %v2113_v52, %v5194_v10  ;;  %v2147_v61 = vsel %vm2127_vm9, %v2114_v63, %v5195_v24 }
 0x188   : > { %v2177_v6 = vsel %vm2160_vm10, %v2144_v13, %v5199_v39  ;;  %v2178_v21 = vsel %vm2160_vm10, %v2145_v28, %v5200_v58  ;;  %v5203_v56 = vpop.permute.xlu1 %5202 }
 0x189   : > { %v5205_v9 = vunpack.i.h.bf16 %v5203_v56  ;;  %v5204_v60 = vunpack.i.l.bf16 %v5203_v56  ;;  %v5208_v12 = vpop.permute.xlu0 %5207  ;;  %v2201_v41 = vpack.c.bf16 %v2178_v21, %v2177_v6  ;;  %5362 = vrot.lane.b32.xlu0 %v5361_v50, %s6026_s22 }
 0x18a   : > { %v5210_v0 = vunpack.i.h.bf16 %v5208_v12  ;;  %v5209_v31 = vunpack.i.l.bf16 %v5208_v12 }
 0x18b   : > { %v2179_v30 = vsel %vm2160_vm10, %v2146_v5, %v5204_v60  ;;  %v2180_v4 = vsel %vm2160_vm10, %v2147_v61, %v5205_v9  ;;  %4633 = vmatprep.mubr.msk.bf16.mxu0 %vm2231_vm11, %v2201_v41 }
 0x18c   : > { %v5213_v32 = vpop.permute.xlu1 %5212  ;;  %v2202_v49 = vpack.c.bf16 %v2180_v4, %v2179_v30  ;;  %v2049_v1 = vsel %vm2028_vm6, %v6880_v38, %v5209_v31  ;;  %v2050_v62 = vsel %vm2028_vm6, %v6883_v54, %v5210_v0 }
 0x18d   : > { %v5218_v42 = vpop.permute.xlu0 %5217  ;;  %v5214_v20 = vunpack.i.l.bf16 %v5213_v32  ;;  %v5215_v47 = vunpack.i.h.bf16 %v5213_v32 }
 0x18e   : > { %4634 = vmatmul.mubr.msk.bf16.gmra.mxu0 %vm2231_vm11, %v2202_v49  ;;  %v5220_v14 = vunpack.i.h.bf16 %v5218_v42  ;;  %v5219_v48 = vunpack.i.l.bf16 %v5218_v42 }
 0x18f   : > { %v2051_v24 = vsel %vm2028_vm6, %v6894_v2, %v5214_v20  ;;  %v2052_v28 = vsel %vm2028_vm6, %v6897_v55, %v5215_v47 }
 0x190   : > { %v5223_v57 = vpop.permute.xlu1 %5222  ;;  %v2082_v59 = vsel %vm2061_vm7, %v2049_v1, %v5219_v48  ;;  %v2083_v33 = vsel %vm2061_vm7, %v2050_v62, %v5220_v14 }
 0x191   : > { %v5228_v3 = vpop.permute.xlu0 %5227  ;;  %v5224_v51 = vunpack.i.l.bf16 %v5223_v57  ;;  %v5225_v40 = vunpack.i.h.bf16 %v5223_v57 }
 0x192   : > { %v5230_v25 = vunpack.i.h.bf16 %v5228_v3  ;;  %v5229_v45 = vunpack.i.l.bf16 %v5228_v3 }
 0x193   : > { %v2084_v44 = vsel %vm2061_vm7, %v2051_v24, %v5224_v51  ;;  %v2085_v2 = vsel %vm2061_vm7, %v2052_v28, %v5225_v40 }
 0x194   : > { %v5233_v37 = vpop.permute.xlu1 %5232  ;;  %v2115_v10 = vsel %vm2094_vm8, %v2082_v59, %v5229_v45  ;;  %v2116_v38 = vsel %vm2094_vm8, %v2083_v33, %v5230_v25 }
 0x195   : > { %v5238_v16 = vpop.permute.xlu0 %5237  ;;  %v5234_v8 = vunpack.i.l.bf16 %v5233_v37  ;;  %v5235_v58 = vunpack.i.h.bf16 %v5233_v37 }
 0x196   : > { %v5240_v43 = vunpack.i.h.bf16 %v5238_v16  ;;  %v5239_v7 = vunpack.i.l.bf16 %v5238_v16 }
 0x197   : > { %v2117_v6 = vsel %vm2094_vm8, %v2084_v44, %v5234_v8  ;;  %v2118_v63 = vsel %vm2094_vm8, %v2085_v2, %v5235_v58 }
 0x198   : > { %v5243_v36 = vpop.permute.xlu1 %5242  ;;  %v2148_v23 = vsel %vm2127_vm9, %v2115_v10, %v5239_v7  ;;  %v2149_v52 = vsel %vm2127_vm9, %v2116_v38, %v5240_v43 }
 0x199   : > { %v5248_v54 = vpop.permute.xlu0 %5247  ;;  %v5245_v39 = vunpack.i.h.bf16 %v5243_v36  ;;  %v5244_v11 = vunpack.i.l.bf16 %v5243_v36 }
 0x19a   : > { %v5250_v35 = vunpack.i.h.bf16 %v5248_v54  ;;  %v5249_v13 = vunpack.i.l.bf16 %v5248_v54 }
 0x19b   : > { %v2150_v41 = vsel %vm2127_vm9, %v2117_v6, %v5244_v11  ;;  %v2151_v53 = vsel %vm2127_vm9, %v2118_v63, %v5245_v39 }
 0x19c   : > { %v2181_v21 = vsel %vm2160_vm10, %v2148_v23, %v5249_v13  ;;  %v2182_v56 = vsel %vm2160_vm10, %v2149_v52, %v5250_v35  ;;  %v5253_v22 = vpop.permute.xlu1 %5252 }
 0x19d   : > { %v5255_v9 = vunpack.i.h.bf16 %v5253_v22  ;;  %v5254_v60 = vunpack.i.l.bf16 %v5253_v22  ;;  %v5258_v55 = vpop.permute.xlu0 %5257  ;;  %v2203_v12 = vpack.c.bf16 %v2182_v56, %v2181_v21 }
 0x19e   : > { %v5260_v49 = vunpack.i.h.bf16 %v5258_v55  ;;  %v5259_v42 = vunpack.i.l.bf16 %v5258_v55 }
 0x19f   : > { %v2183_v26 = vsel %vm2160_vm10, %v2150_v41, %v5254_v60  ;;  %v2184_v5 = vsel %vm2160_vm10, %v2151_v53, %v5255_v9  ;;  %4637 = vmatprep.mubr.msk.bf16.mxu0 %vm2231_vm11, %v2203_v12 }
 0x1a0   : > { %v5263_v61 = vpop.permute.xlu1 %5262  ;;  %v2204_v50 = vpack.c.bf16 %v2184_v5, %v2183_v26  ;;  %v2053_v20 = vsel %vm2028_vm6, %v6904_v17, %v5259_v42  ;;  %v2054_v25 = vsel %vm2028_vm6, %v6907_v15, %v5260_v49 }
 0x1a1   : > { %v5268_v30 = vpop.permute.xlu0 %5267  ;;  %v5264_v31 = vunpack.i.l.bf16 %v5263_v61  ;;  %v5265_v45 = vunpack.i.h.bf16 %v5263_v61 }
 0x1a2   : > { %4638 = vmatmul.mubr.msk.bf16.gmra.mxu0 %vm2231_vm11, %v2204_v50  ;;  %v5270_v57 = vunpack.i.h.bf16 %v5268_v30  ;;  %v5269_v3 = vunpack.i.l.bf16 %v5268_v30 }
 0x1a3   : > { %v2055_v33 = vsel %vm2028_vm6, %v6922_v34, %v5264_v31  ;;  %v2056_v58 = vsel %vm2028_vm6, %v6925_v27, %v5265_v45 }
 0x1a4   : > { %v5273_v4 = vpop.permute.xlu1 %5272  ;;  %v2086_v47 = vsel %vm2061_vm7, %v2053_v20, %v5269_v3  ;;  %v2087_v51 = vsel %vm2061_vm7, %v2054_v25, %v5270_v57 }
 0x1a5   : > { %v5278_v32 = vpop.permute.xlu0 %5277  ;;  %v5274_v16 = vunpack.i.l.bf16 %v5273_v4  ;;  %v5275_v43 = vunpack.i.h.bf16 %v5273_v4 }
 0x1a6   : > { %v5280_v14 = vunpack.i.h.bf16 %v5278_v32  ;;  %v5279_v48 = vunpack.i.l.bf16 %v5278_v32 }
 0x1a7   : > { %v2088_v54 = vsel %vm2061_vm7, %v2055_v33, %v5274_v16  ;;  %v2089_v34 = vsel %vm2061_vm7, %v2056_v58, %v5275_v43 }
 0x1a8   : > { %v5283_v0 = vpop.permute.xlu1 %5282  ;;  %v2119_v40 = vsel %vm2094_vm8, %v2086_v47, %v5279_v48  ;;  %v2120_v17 = vsel %vm2094_vm8, %v2087_v51, %v5280_v14 }
 0x1a9   : > { %v5288_v37 = vpop.permute.xlu0 %5287  ;;  %v5284_v7 = vunpack.i.l.bf16 %v5283_v0  ;;  %v5285_v8 = vunpack.i.h.bf16 %v5283_v0 }
 0x1aa   : > { %v5290_v1 = vunpack.i.h.bf16 %v5288_v37  ;;  %v5289_v62 = vunpack.i.l.bf16 %v5288_v37 }
 0x1ab   : > { %v2121_v35 = vsel %vm2094_vm8, %v2088_v54, %v5284_v7  ;;  %v2122_v23 = vsel %vm2094_vm8, %v2089_v34, %v5285_v8 }
 0x1ac   : > { %v5293_v59 = vpop.permute.xlu1 %5292  ;;  %v2152_v39 = vsel %vm2127_vm9, %v2119_v40, %v5289_v62  ;;  %v2153_v11 = vsel %vm2127_vm9, %v2120_v17, %v5290_v1 }
 0x1ad   : > { %v5298_v15 = vpop.permute.xlu0 %5297  ;;  %v5295_v36 = vunpack.i.h.bf16 %v5293_v59  ;;  %v5294_v24 = vunpack.i.l.bf16 %v5293_v59 }
 0x1ae   : > { %v5300_v10 = vunpack.i.h.bf16 %v5298_v15  ;;  %v5299_v38 = vunpack.i.l.bf16 %v5298_v15 }
 0x1af   : > { %v2154_v21 = vsel %vm2127_vm9, %v2121_v35, %v5294_v24  ;;  %v2155_v56 = vsel %vm2127_vm9, %v2122_v23, %v5295_v36 }
 0x1b0   : > { %v2185_v13 = vsel %vm2160_vm10, %v2152_v39, %v5299_v38  ;;  %v2186_v28 = vsel %vm2160_vm10, %v2153_v11, %v5300_v10  ;;  %v5303_v44 = vpop.permute.xlu1 %5302 }
 0x1b1   : > { %v5305_v52 = vunpack.i.h.bf16 %v5303_v44  ;;  %v5304_v2 = vunpack.i.l.bf16 %v5303_v44  ;;  %v5308_v27 = vpop.permute.xlu0 %5307  ;;  %v2205_v6 = vpack.c.bf16 %v2186_v28, %v2185_v13  ;;  %v7490_v13 = vld [vmem:[%s359_s25] ss:$0 sm:$0xff]  ;;  %s6032_s25 = smov 80  }
 0x1b2   : > { %v5310_v53 = vunpack.i.h.bf16 %v5308_v27  ;;  %v5309_v26 = vunpack.i.l.bf16 %v5308_v27 }
 0x1b3   : > { %v2187_v22 = vsel %vm2160_vm10, %v2154_v21, %v5304_v2  ;;  %v2188_v63 = vsel %vm2160_vm10, %v2155_v56, %v5305_v52  ;;  %4641 = vmatprep.mubr.msk.bf16.mxu0 %vm2231_vm11, %v2205_v6 }
 0x1b4   : > { %v5313_v9 = vpop.permute.xlu1 %5312  ;;  %v2206_v60 = vpack.c.bf16 %v2188_v63, %v2187_v22  ;;  %v2057_v42 = vsel %vm2028_vm6, %v6930_v29, %v5309_v26  ;;  %v2058_v57 = vsel %vm2028_vm6, %v6933_v46, %v5310_v53 }
 0x1b5   : > { %v5318_v55 = vpop.permute.xlu0 %5317  ;;  %v5314_v30 = vunpack.i.l.bf16 %v5313_v9  ;;  %v5315_v3 = vunpack.i.h.bf16 %v5313_v9 }
 0x1b6   : > { %4642 = vmatmul.mubr.msk.bf16.gmra.mxu0 %vm2231_vm11, %v2206_v60  ;;  %v5320_v5 = vunpack.i.h.bf16 %v5318_v55  ;;  %v5319_v61 = vunpack.i.l.bf16 %v5318_v55  ;;  %v5918_v60 = vld [vmem:[%s8436_s6 + $0x38] sm:$0xff]   ;;  %v6027_v55 = vmov 0  }
 0x1b7   : > { %v2059_v16 = vsel %vm2028_vm6, %v6946_v19, %v5314_v30  ;;  %v2060_v59 = vsel %vm2028_vm6, %v6949_v18, %v5315_v3  ;;  %4143 = vmatprep.subr.bf16.mxu0 %v6027_v55  ;;  %4649 = vmatprep.subr.bf16.mxu1 %v6027_v55 }
 0x1b8   : > { %v5323_v12 = vpop.permute.xlu1 %5322  ;;  %v2090_v48 = vsel %vm2061_vm7, %v2057_v42, %v5319_v61  ;;  %v2091_v37 = vsel %vm2061_vm7, %v2058_v57, %v5320_v5  ;;  %4144 = vmatpush1.bf16.msra.mxu0 %v5918_v60  ;;  %4658 = vmatpush1.bf16.msra.mxu1 %v5918_v60  ;;  %v5920_v57 = vld [vmem:[%s8436_s6 + $0x28] sm:$0xff]  }
 0x1b9   : > { %v5328_v41 = vpop.permute.xlu0 %5327  ;;  %v5324_v0 = vunpack.i.l.bf16 %v5323_v12  ;;  %v5325_v20 = vunpack.i.h.bf16 %v5323_v12  ;;  %4145 = vmatprep.subr.bf16.mxu0 %v6027_v55  ;;  %4650 = vmatprep.subr.bf16.mxu1 %v6027_v55 }
 0x1ba   : > { %v5330_v4 = vunpack.i.h.bf16 %v5328_v41  ;;  %v5329_v32 = vunpack.i.l.bf16 %v5328_v41 }
 0x1bb   : > { %v2092_v33 = vsel %vm2061_vm7, %v2059_v16, %v5324_v0  ;;  %v2093_v19 = vsel %vm2061_vm7, %v2060_v59, %v5325_v20  ;;  %v5921_v20 = vld [vmem:[%s8436_s6 + $0x20] sm:$0xff]  }
 0x1bc   : > { %v5333_v50 = vpop.permute.xlu1 %5332  ;;  %v2123_v1 = vsel %vm2094_vm8, %v2090_v48, %v5329_v32  ;;  %v2124_v29 = vsel %vm2094_vm8, %v2091_v37, %v5330_v4 }
 0x1bd   : > { %v5338_v49 = vpop.permute.xlu0 %5337  ;;  %v5334_v25 = vunpack.i.l.bf16 %v5333_v50  ;;  %v5335_v62 = vunpack.i.h.bf16 %v5333_v50  ;;  %v5919_v50 = vld [vmem:[%s8436_s6 + $0x30] sm:$0xff]  }
 0x1be   : > { %v5340_v31 = vunpack.i.h.bf16 %v5338_v49  ;;  %v5339_v14 = vunpack.i.l.bf16 %v5338_v49  ;;  %4146 = vmatpush1.bf16.msra.mxu0 %v5919_v50  ;;  %4659 = vmatpush1.bf16.msra.mxu1 %v5919_v50 }
 0x1bf   : > { %v2125_v8 = vsel %vm2094_vm8, %v2092_v33, %v5334_v25  ;;  %v2126_v10 = vsel %vm2094_vm8, %v2093_v19, %v5335_v62  ;;  %4147 = vmatprep.subr.bf16.mxu0 %v6027_v55  ;;  %4651 = vmatprep.subr.bf16.mxu1 %v6027_v55  ;;  %v5925_v33 = vld [vmem:[%s8436_s6] sm:$0xff]  }
 0x1c0   : > { %v5343_v45 = vpop.permute.xlu1 %5342  ;;  %v2156_v40 = vsel %vm2127_vm9, %v2123_v1, %v5339_v14  ;;  %v2157_v17 = vsel %vm2127_vm9, %v2124_v29, %v5340_v31  ;;  %v5922_v29 = vld [vmem:[%s8436_s6 + $0x18] sm:$0xff]  }
 0x1c1   : > { %v5348_v46 = vpop.permute.xlu0 %5347  ;;  %v5345_v47 = vunpack.i.h.bf16 %v5343_v45  ;;  %v5344_v51 = vunpack.i.l.bf16 %v5343_v45 }
 0x1c2   : > { %v5350_v43 = vunpack.i.h.bf16 %v5348_v46  ;;  %v5349_v7 = vunpack.i.l.bf16 %v5348_v46  ;;  %4148 = vmatpush1.bf16.msra.mxu0 %v5920_v57  ;;  %4660 = vmatpush1.bf16.msra.mxu1 %v5920_v57  ;;  %v5923_v46 = vld [vmem:[%s8436_s6 + $0x10] sm:$0xff]  }
 0x1c3   : > { %v2158_v54 = vsel %vm2127_vm9, %v2125_v8, %v5344_v51  ;;  %v2159_v39 = vsel %vm2127_vm9, %v2126_v10, %v5345_v47  ;;  %4149 = vmatprep.subr.bf16.mxu0 %v6027_v55  ;;  %4652 = vmatprep.subr.bf16.mxu1 %v6027_v55  ;;  %v5924_v47 = vld [vmem:[%s8436_s6 + $0x8] sm:$0xff]  }
 0x1c4   : > { %v2189_v15 = vsel %vm2160_vm10, %v2156_v40, %v5349_v7  ;;  %v2190_v36 = vsel %vm2160_vm10, %v2157_v17, %v5350_v43  ;;  %v5353_v24 = vpop.permute.xlu1 %5352 }
 0x1c5   : > { %v5355_v38 = vunpack.i.h.bf16 %v5353_v24  ;;  %v5354_v18 = vunpack.i.l.bf16 %v5353_v24  ;;  %v2207_v58 = vpack.c.bf16 %v2190_v36, %v2189_v15 }
 0x1c6   : > { %4150 = vmatpush1.bf16.msra.mxu0 %v5921_v20  ;;  %4661 = vmatpush1.bf16.msra.mxu1 %v5921_v20 }
 0x1c7   : > { %v2191_v11 = vsel %vm2160_vm10, %v2158_v54, %v5354_v18  ;;  %v2192_v34 = vsel %vm2160_vm10, %v2159_v39, %v5355_v38  ;;  %4645 = vmatprep.mubr.msk.bf16.mxu0 %vm2231_vm11, %v2207_v58  ;;  %4151 = vmatprep.subr.bf16.mxu0 %v6027_v55  ;;  %v5926_v58 = vld [vmem:[%s8436_s6 + $0x40] sm:$0xff]  }
 0x1c8   : > { %v2208_v35 = vpack.c.bf16 %v2192_v34, %v2191_v11  ;;  %4653 = vmatprep.subr.bf16.mxu1 %v6027_v55 }
 0x1ca   : > { %4646 = vmatmul.mubr.msk.bf16.gmra.mxu0 %vm2231_vm11, %v2208_v35  ;;  %4662 = vmatpush1.bf16.msra.mxu1 %v5922_v29 }
 0x1cb   : > { %4152 = vmatpush1.bf16.msra.mxu0 %v5922_v29  ;;  %4654 = vmatprep.subr.bf16.mxu1 %v6027_v55 }
 0x1cc   : > { %4153 = vmatprep.subr.bf16.mxu0 %v6027_v55 }
 0x1ce   : > { %4663 = vmatpush1.bf16.msra.mxu1 %v5923_v46 }
 0x1cf   : > { %4154 = vmatpush1.bf16.msra.mxu0 %v5923_v46  ;;  %4655 = vmatprep.subr.bf16.mxu1 %v6027_v55 }
 0x1d0   : > { %4155 = vmatprep.subr.bf16.mxu0 %v6027_v55 }
 0x1d2   : > { %4664 = vmatpush1.bf16.msra.mxu1 %v5924_v47 }
 0x1d3   : > { %4156 = vmatpush1.bf16.msra.mxu0 %v5924_v47  ;;  %4656 = vmatprep.subr.bf16.mxu1 %v6027_v55 }
 0x1d4   : > { %4157 = vmatprep.subr.bf16.mxu0 %v6027_v55 }
 0x1d6   : > { %4665 = vmatpush1.bf16.msra.mxu1 %v5925_v33 }
 0x1d7   : > { %4158 = vmatpush1.bf16.msra.mxu0 %v5925_v33  ;;  %4657 = vmatprep.subr.bf16.mxu1 %v6027_v55 }
 0x1d8   : > { %4173 = vmatprep.subr.bf16.mxu0 %v6027_v55 }
 0x1da   : > { %4666 = vmatpush2.bf16.msra.mxu1 %v5926_v58 }
 0x1db   : > { %4174 = vmatpush2.bf16.msra.mxu0 %v5926_v58 }
 0x1fe   : > { %v4619_v28 = vpop.f32.mrf.mxu0 }
 0x1ff   : > { %v2330_v44 = vadd.f32 %v4619_v28, %v7490_v13 }
 0x200   : > { %v2321_v23 = vpop.f32.mrf.mxu0 }
 0x201   : > { %v2450_v52 = vmax.f32 %v2330_v44, 0.0  ;;  %v2322_v2 = vadd.f32 %v7490_v13, %v2321_v23 }
 0x202   : > { %v4620_v27 = vpop.f32.mrf.mxu0 }
 0x203   : > { %2539 = vst.msk [vmem:[#allocation3 + $0x31] sm:$0xff] %vm2480_vm12, %v2450_v52  ;;  %v2448_v6 = vmax.f32 %v2322_v2, 0.0  ;;  %v2333_v21 = vadd.f32 %v4620_v27, %v7490_v13 }
 0x204   : > { %v2324_v56 = vpop.f32.mrf.mxu0 }
 0x205   : > { %2537 = vst.msk [vmem:[#allocation3 + $0x19] sm:$0xff] %vm2480_vm12, %v2448_v6  ;;  %v2451_v22 = vmax.f32 %v2333_v21, 0.0  ;;  %v2325_v63 = vadd.f32 %v7490_v13, %v2324_v56 }
 0x207   : > { %2540 = vst.msk [vmem:[#allocation3 + $0x39] sm:$0xff] %vm2480_vm12, %v2451_v22  ;;  %v2449_v9 = vmax.f32 %v2325_v63, 0.0 }
 0x209   : > { %2538 = vst.msk [vmem:[#allocation3 + $0x21] sm:$0xff] %vm2480_vm12, %v2449_v9 }
 0x20a   : > { %v7505_v12 = vld [vmem:[#allocation3 + $0x30] sm:$0xff] }
 0x20b   : > { %v2794_v32 = vld [vmem:[#allocation3 + $0x31] sm:$0xff] }
 0x20c   : > { %v7572_v24 = vld [vmem:[#allocation3 + $0x18] sm:$0xff] }
 0x20d   : > { %v2697_v35 = vld [vmem:[#allocation3 + $0x19] sm:$0xff] }
 0x20e   : > { %v2826_v41 = vld [vmem:[#allocation3 + $0x32] sm:$0xff]  ;;  %v2827_v53 = vld [vmem:[#allocation3 + $0x3a] sm:$0xff] }
 0x20f   : > { %v7507_v26 = vld [vmem:[#allocation3 + $0x38] sm:$0xff]  ;;  %v3985_v5 = vpack.c.bf16 %v2827_v53, %v2826_v41  ;;  %v5386_v62 = vpack.i.bf16 %v2827_v53, %v2826_v41 }
 0x210   : > { %v5366_v61 = vpack.i.bf16 %v7507_v26, %v7505_v12  ;;  %v2795_v30 = vld [vmem:[#allocation3 + $0x39] sm:$0xff]  ;;  %v2698_v39 = vld [vmem:[#allocation3 + $0x21] sm:$0xff] }
 0x211   : > { %4575 = vmatprep.mubr.msk.bf16.mxu0 %vm2480_vm12, %v3985_v5  ;;  %v5371_v42 = vpack.i.bf16 %v2795_v30, %v2794_v32  ;;  %v7568_v19 = vld [vmem:[#allocation3 + $0x20] sm:$0xff]  ;;  %v5406_v44 = vpack.i.bf16 %v2698_v39, %v2697_v35 }
 0x212   : > { %5367 = vrot.lane.b32.xlu0 %v5366_v61, %s6028_s10  ;;  %v4623_v4 = vpop.f32.mrf.mxu0  ;;  %v5401_v18 = vpack.i.bf16 %v7568_v19, %v7572_v24  ;;  %v2729_v23 = vld [vmem:[#allocation3 + $0x1a] sm:$0xff]  ;;  %v2730_v52 = vld [vmem:[#allocation3 + $0x22] sm:$0xff] }
 0x213   : > { %v2346_v49 = vadd.f32 %v4623_v4, %v7490_v13  ;;  %v5411_v2 = vpack.i.bf16 %v2730_v52, %v2729_v23 }
 0x214   : > { %v2337_v3 = vpop.f32.mrf.mxu0 }
 0x215   : > { %v2454_v0 = vmax.f32 %v2346_v49, 0.0  ;;  %v2338_v31 = vadd.f32 %v7490_v13, %v2337_v3 }
 0x216   : > { %5372 = vrot.lane.b32.xlu0 %v5371_v42, %s6029_s13  ;;  %v4624_v14 = vpop.f32.mrf.mxu0 }
 0x217   : > { %2543 = vst.msk [vmem:[#allocation3 + $0x61] sm:$0xff] %vm2480_vm12, %v2454_v0  ;;  %v2452_v48 = vmax.f32 %v2338_v31, 0.0  ;;  %v2349_v37 = vadd.f32 %v4624_v14, %v7490_v13 }
 0x218   : > { %v2340_v25 = vpop.f32.mrf.mxu0 }
 0x219   : > { %2541 = vst.msk [vmem:[#allocation3 + $0x49] sm:$0xff] %vm2480_vm12, %v2452_v48  ;;  %v2455_v45 = vmax.f32 %v2349_v37, 0.0  ;;  %v2341_v16 = vadd.f32 %v7490_v13, %v2340_v25 }
 0x21a   : > { %5377 = vrot.lane.b32.xlu0 %v5366_v61, %s6030_s16 }
 0x21b   : > { %2544 = vst.msk [vmem:[#allocation3 + $0x69] sm:$0xff] %vm2480_vm12, %v2455_v45  ;;  %v2453_v1 = vmax.f32 %v2341_v16, 0.0 }
 0x21d   : > { %2542 = vst.msk [vmem:[#allocation3 + $0x51] sm:$0xff] %vm2480_vm12, %v2453_v1 }
 0x21e   : > { %5382 = vrot.lane.b32.xlu0 %v5371_v42, %s6031_s19  ;;  %v2766_v50 = vld [vmem:[#allocation3 + $0x60] sm:$0xff] }
 0x21f   : > { %v2798_v0 = vld [vmem:[#allocation3 + $0x61] sm:$0xff] }
 0x220   : > { %v2796_v52 = vld [vmem:[#allocation3 + $0x49] sm:$0xff] }
 0x222   : > { %5387 = vrot.lane.b32.xlu0 %v5386_v62, %s6032_s25  ;;  %v2767_v41 = vld [vmem:[#allocation3 + $0x68] sm:$0xff] }
 0x223   : > { %v5426_v32 = vpack.i.bf16 %v2767_v41, %v2766_v50  ;;  %v2735_v1 = vld [vmem:[#allocation3 + $0x62] sm:$0xff]  ;;  %v2736_v29 = vld [vmem:[#allocation3 + $0x6a] sm:$0xff] }
 0x224   : > { %v7555_v51 = vld [vmem:[#allocation3 + $0x4a] sm:$0xff]  ;;  %v7558_v43 = vld [vmem:[#allocation3 + $0x52] sm:$0xff] }
 0x225   : > { %v3987_v40 = vpack.c.bf16 %v7558_v43, %v7555_v51 }
 0x226   : > { %5392 = vrot.lane.b32.xlu0 %v5371_v42, %s6025_s21  ;;  %v4627_v7 = vpop.f32.mrf.mxu0  ;;  %v2799_v42 = vld [vmem:[#allocation3 + $0x69] sm:$0xff] }
 0x227   : > { %v2362_v59 = vadd.f32 %v4627_v7, %v7490_v13  ;;  %v7607_v14 = vpack.i.bf16 %v2799_v42, %v2798_v0 }
 0x228   : > { %v2353_v17 = vpop.f32.mrf.mxu0 }
 0x229   : > { %v2458_v8 = vmax.f32 %v2362_v59, 0.0  ;;  %v2354_v15 = vadd.f32 %v7490_v13, %v2353_v17 }
 0x22a   : > { %5397 = vrot.lane.b32.xlu0 %v5386_v62, %s6026_s22  ;;  %v4628_v36 = vpop.f32.mrf.mxu0 }
 0x22b   : > { %2547 = vst.msk [vmem:[#allocation3 + $0x91] sm:$0xff] %vm2480_vm12, %v2458_v8  ;;  %v2456_v10 = vmax.f32 %v2354_v15, 0.0  ;;  %v2365_v38 = vadd.f32 %v4628_v36, %v7490_v13  ;;  %v7629_v15 = vpack.i.bf16 %v2736_v29, %v2735_v1 }
 0x22c   : > { %v2356_v54 = vpop.f32.mrf.mxu0 }
 0x22d   : > { %2545 = vst.msk [vmem:[#allocation3 + $0x79] sm:$0xff] %vm2480_vm12, %v2456_v10  ;;  %v2459_v11 = vmax.f32 %v2365_v38, 0.0  ;;  %v2357_v34 = vadd.f32 %v7490_v13, %v2356_v54  ;;  %v2765_v10 = vld [vmem:[#allocation3 + $0x50] sm:$0xff]  ;;  %v2764_v54 = vld [vmem:[#allocation3 + $0x48] sm:$0xff] }
 0x22e   : > { %5402 = vrot.lane.b32.xlu0 %v5401_v18, %s6030_s16 }
 0x22f   : > { %2548 = vst.msk [vmem:[#allocation3 + $0x99] sm:$0xff] %vm2480_vm12, %v2459_v11  ;;  %v2457_v28 = vmax.f32 %v2357_v34, 0.0  ;;  %v5451_v34 = vpack.i.bf16 %v2765_v10, %v2764_v54 }
 0x231   : > { %2546 = vst.msk [vmem:[#allocation3 + $0x81] sm:$0xff] %vm2480_vm12, %v2457_v28  ;;  %v2797_v28 = vld [vmem:[#allocation3 + $0x51] sm:$0xff] }
 0x232   : > { %5407 = vrot.lane.b32.xlu0 %v5406_v44, %s6031_s19  ;;  %v2707_v27 = vld [vmem:[#allocation3 + $0x91] sm:$0xff] }
 0x233   : > { %v7673_v1 = vld [vmem:[#allocation3 + $0x90] sm:$0xff] }
 0x236   : > { %5412 = vrot.lane.b32.xlu0 %v5411_v2, %s6032_s25  ;;  %v2708_v6 = vld [vmem:[#allocation3 + $0x99] sm:$0xff] }
 0x237   : > { %v7590_v21 = vpack.i.bf16 %v2708_v6, %v2707_v27  ;;  %v2739_v56 = vld [vmem:[#allocation3 + $0x92] sm:$0xff]  ;;  %v2740_v22 = vld [vmem:[#allocation3 + $0x9a] sm:$0xff]  ;;  %v5456_v27 = vpack.i.bf16 %v2797_v28, %v2796_v52 }
 0x238   : > { %v5496_v60 = vpack.i.bf16 %v2740_v22, %v2739_v56  ;;  %v2643_v48 = vld [vmem:[#allocation3 + $0x7a] sm:$0xff]  ;;  %v2644_v37 = vld [vmem:[#allocation3 + $0x82] sm:$0xff] }
 0x239   : > { %5492 = vrot.lane.b32.xlu1 %v7590_v21, %s6031_s19  ;;  %v7613_v20 = vpack.i.bf16 %v2644_v37, %v2643_v48 }
 0x23a   : > { %5417 = vrot.lane.b32.xlu0 %v5406_v44, %s6025_s21  ;;  %v4631_v63 = vpop.f32.mrf.mxu0 }
 0x23b   : > { %v2378_v9 = vadd.f32 %v4631_v63, %v7490_v13 }
 0x23c   : > { %v2369_v55 = vpop.f32.mrf.mxu0 }
 0x23d   : > { %v2462_v53 = vmax.f32 %v2378_v9, 0.0  ;;  %v2370_v5 = vadd.f32 %v7490_v13, %v2369_v55  ;;  %5497 = vrot.lane.b32.xlu1 %v5496_v60, %s6032_s25 }
 0x23e   : > { %5422 = vrot.lane.b32.xlu0 %v5411_v2, %s6026_s22  ;;  %v4632_v61 = vpop.f32.mrf.mxu0 }
 0x23f   : > { %2551 = vst.msk [vmem:[#allocation3 + $0xc1] sm:$0xff] %vm2480_vm12, %v2462_v53  ;;  %v2460_v30 = vmax.f32 %v2370_v5, 0.0  ;;  %v2381_v4 = vadd.f32 %v4632_v61, %v7490_v13  ;;  %v5471_v53 = vpack.i.bf16 %v7558_v43, %v7555_v51 }
 0x240   : > { %v2372_v49 = vpop.f32.mrf.mxu0 }
 0x241   : > { %2549 = vst.msk [vmem:[#allocation3 + $0xa9] sm:$0xff] %vm2480_vm12, %v2460_v30  ;;  %v2463_v57 = vmax.f32 %v2381_v4, 0.0  ;;  %v2373_v3 = vadd.f32 %v7490_v13, %v2372_v49  ;;  %5502 = vrot.lane.b32.xlu1 %v7590_v21, %s6025_s21 }
 0x242   : > { %5427 = vrot.lane.b32.xlu0 %v5426_v32, %s6028_s10 }
 0x243   : > { %2552 = vst.msk [vmem:[#allocation3 + $0xc9] sm:$0xff] %vm2480_vm12, %v2463_v57  ;;  %v2461_v31 = vmax.f32 %v2373_v3, 0.0 }
 0x245   : > { %2550 = vst.msk [vmem:[#allocation3 + $0xb1] sm:$0xff] %vm2480_vm12, %v2461_v31  ;;  %5507 = vrot.lane.b32.xlu1 %v5496_v60, %s6026_s22 }
 0x246   : > { %5432 = vrot.lane.b32.xlu0 %v7607_v14, %s6029_s13  ;;  %v2774_v25 = vld [vmem:[#allocation3 + $0xc0] sm:$0xff] }
 0x247   : > { %v2806_v33 = vld [vmem:[#allocation3 + $0xc1] sm:$0xff] }
 0x248   : > { %v2804_v37 = vld [vmem:[#allocation3 + $0xa9] sm:$0xff] }
 0x249   : > { %5517 = vrot.lane.b32.xlu1 %v7613_v20, %s6026_s22 }
 0x24a   : > { %5437 = vrot.lane.b32.xlu0 %v5426_v32, %s6030_s16  ;;  %v2775_v45 = vld [vmem:[#allocation3 + $0xc8] sm:$0xff] }
 0x24b   : > { %v5561_v16 = vpack.i.bf16 %v2775_v45, %v2774_v25  ;;  %v2807_v47 = vld [vmem:[#allocation3 + $0xc9] sm:$0xff] }
 0x24c   : > { %v7618_v62 = vld [vmem:[#allocation3 + $0xaa] sm:$0xff]  ;;  %v7620_v46 = vld [vmem:[#allocation3 + $0xb2] sm:$0xff]  ;;  %v5566_v8 = vpack.i.bf16 %v2807_v47, %v2806_v33  ;;  %v2743_v6 = vld [vmem:[#allocation3 + $0xc2] sm:$0xff] }
 0x24d   : > { %5562 = vrot.lane.b32.xlu1 %v5561_v16, %s6028_s10  ;;  %v3995_v7 = vpack.c.bf16 %v7620_v46, %v7618_v62  ;;  %v2744_v56 = vld [vmem:[#allocation3 + $0xca] sm:$0xff]  ;;  %v2612_v47 = vld [vmem:[#allocation3 + $0x81] sm:$0xff] }
 0x24e   : > { %5442 = vrot.lane.b32.xlu0 %v7607_v14, %s6031_s19  ;;  %v4635_v59 = vpop.f32.mrf.mxu0  ;;  %v5581_v22 = vpack.i.bf16 %v2744_v56, %v2743_v6  ;;  %v2773_v61 = vld [vmem:[#allocation3 + $0xb0] sm:$0xff]  ;;  %v2772_v32 = vld [vmem:[#allocation3 + $0xa8] sm:$0xff] }
 0x24f   : > { %v2394_v17 = vadd.f32 %v4635_v59, %v7490_v13  ;;  %4580 = vmatprep.mubr.msk.bf16.mxu1 %vm2480_vm12, %v3995_v7  ;;  %v5596_v57 = vpack.i.bf16 %v2773_v61, %v2772_v32  ;;  %v2805_v0 = vld [vmem:[#allocation3 + $0xb1] sm:$0xff]  ;;  %v2611_v7 = vld [vmem:[#allocation3 + $0x79] sm:$0xff] }
 0x250   : > { %v2385_v36 = vpop.f32.mrf.mxu0  ;;  %v5601_v45 = vpack.i.bf16 %v2805_v0, %v2804_v37  ;;  %v5511_v33 = vpack.i.bf16 %v2612_v47, %v2611_v7 }
 0x251   : > { %v2466_v38 = vmax.f32 %v2394_v17, 0.0  ;;  %v2386_v18 = vadd.f32 %v7490_v13, %v2385_v36  ;;  %5567 = vrot.lane.b32.xlu1 %v5566_v8, %s6029_s13  ;;  %v2576_v36 = vld [vmem:[#allocation3 + $0x50] sm:$0xff] }
 0x252   : > { %5447 = vrot.lane.b32.xlu0 %v7629_v15, %s6032_s25  ;;  %v4636_v58 = vpop.f32.mrf.mxu0 }
 0x253   : > { %2555 = vst.msk [vmem:[#allocation3 + $0xf1] sm:$0xff] %vm2480_vm12, %v2466_v38  ;;  %v2464_v39 = vmax.f32 %v2386_v18, 0.0  ;;  %v2397_v11 = vadd.f32 %v4636_v58, %v7490_v13  ;;  %v2768_v38 = vld [vmem:[#allocation3 + $0x78] sm:$0xff]  ;;  %v5616_v58 = vpack.i.bf16 %v7620_v46, %v7618_v62 }
 0x254   : > { %v2388_v35 = vpop.f32.mrf.mxu0 }
 0x255   : > { %2553 = vst.msk [vmem:[#allocation3 + $0xd9] sm:$0xff] %vm2480_vm12, %v2464_v39  ;;  %v2467_v44 = vmax.f32 %v2397_v11, 0.0  ;;  %v2389_v23 = vadd.f32 %v7490_v13, %v2388_v35  ;;  %5572 = vrot.lane.b32.xlu1 %v5561_v16, %s6030_s16  ;;  %v7668_v16 = vld [vmem:[#allocation3 + $0x98] sm:$0xff]  ;;  %v7693_v39 = vpop.permute.xlu0 %5357 }
 0x256   : > { %5452 = vrot.lane.b32.xlu0 %v5451_v34, %s6028_s10  ;;  %v7677_v29 = vpack.i.bf16 %v7668_v16, %v7673_v1 }
 0x257   : > { %2556 = vst.msk [vmem:[#allocation3 + $0xf9] sm:$0xff] %vm2480_vm12, %v2467_v44  ;;  %v2465_v2 = vmax.f32 %v2389_v23, 0.0 }
 0x259   : > { %2554 = vst.msk [vmem:[#allocation3 + $0xe1] sm:$0xff] %vm2480_vm12, %v2465_v2  ;;  %5577 = vrot.lane.b32.xlu1 %v5566_v8, %s6031_s19  ;;  %v7704_v2 = vpop.permute.xlu0 %5362 }
 0x25a   : > { %5457 = vrot.lane.b32.xlu0 %v5456_v27, %s6029_s13  ;;  %v2778_v56 = vld [vmem:[#allocation3 + $0xf0] sm:$0xff] }
 0x25d   : > { %5582 = vrot.lane.b32.xlu1 %v5581_v22, %s6032_s25 }
 0x25e   : > { %5462 = vrot.lane.b32.xlu0 %v5451_v34, %s6030_s16  ;;  %v2779_v6 = vld [vmem:[#allocation3 + $0xf8] sm:$0xff] }
 0x260   : > { %v7647_v63 = vld [vmem:[#allocation3 + $0xda] sm:$0xff]  ;;  %v7651_v9 = vld [vmem:[#allocation3 + $0xe2] sm:$0xff] }
 0x261   : > { %5587 = vrot.lane.b32.xlu1 %v5566_v8, %s6025_s21  ;;  %v2769_v8 = vld [vmem:[#allocation3 + $0x80] sm:$0xff] }
 0x262   : > { %5467 = vrot.lane.b32.xlu0 %v5456_v27, %s6031_s19  ;;  %v4639_v60 = vpop.f32.mrf.mxu0  ;;  %v5521_v54 = vpack.i.bf16 %v2769_v8, %v2768_v38 }
 0x263   : > { %v2410_v41 = vadd.f32 %v4639_v60, %v7490_v13  ;;  %v5631_v60 = vpack.i.bf16 %v2779_v6, %v2778_v56  ;;  %v5364_v56 = vunpack.i.l.bf16 %v7704_v2 }
 0x264   : > { %v2401_v5 = vpop.f32.mrf.mxu0 }
 0x265   : > { %v2470_v50 = vmax.f32 %v2410_v41, 0.0  ;;  %v2402_v30 = vadd.f32 %v7490_v13, %v2401_v5  ;;  %5592 = vrot.lane.b32.xlu1 %v5581_v22, %s6026_s22  ;;  %v2811_v41 = vld [vmem:[#allocation3 + $0xf9] sm:$0xff] }
 0x266   : > { %5472 = vrot.lane.b32.xlu0 %v5471_v53, %s6032_s25  ;;  %v4640_v4 = vpop.f32.mrf.mxu0 }
 0x267   : > { %2559 = vst.msk [vmem:[#allocation3 + $0x121] sm:$0xff] %vm2480_vm12, %v2470_v50  ;;  %v2468_v49 = vmax.f32 %v2402_v30, 0.0  ;;  %v2413_v42 = vadd.f32 %v4640_v4, %v7490_v13 }
 0x268   : > { %v2404_v3 = vpop.f32.mrf.mxu0 }
 0x269   : > { %2557 = vst.msk [vmem:[#allocation3 + $0x109] sm:$0xff] %vm2480_vm12, %v2468_v49  ;;  %v2471_v31 = vmax.f32 %v2413_v42, 0.0  ;;  %v2405_v48 = vadd.f32 %v7490_v13, %v2404_v3  ;;  %5597 = vrot.lane.b32.xlu1 %v5596_v57, %s6028_s10 }
 0x26a   : > { %5477 = vrot.lane.b32.xlu0 %v5456_v27, %s6025_s21 }
 0x26b   : > { %2560 = vst.msk [vmem:[#allocation3 + $0x129] sm:$0xff] %vm2480_vm12, %v2471_v31  ;;  %v2469_v25 = vmax.f32 %v2405_v48, 0.0 }
 0x26d   : > { %2558 = vst.msk [vmem:[#allocation3 + $0x111] sm:$0xff] %vm2480_vm12, %v2469_v25  ;;  %5602 = vrot.lane.b32.xlu1 %v5601_v45, %s6029_s13  ;;  %v2747_v25 = vld [vmem:[#allocation3 + $0xf2] sm:$0xff] }
 0x26e   : > { %5482 = vrot.lane.b32.xlu0 %v5471_v53, %s6026_s22  ;;  %v2810_v53 = vld [vmem:[#allocation3 + $0xf1] sm:$0xff] }
 0x26f   : > { %v5636_v50 = vpack.i.bf16 %v2811_v41, %v2810_v53  ;;  %v5365_v53 = vunpack.i.h.bf16 %v7704_v2 }
 0x271   : > { %5607 = vrot.lane.b32.xlu1 %v5596_v57, %s6030_s16 }
 0x272   : > { %5487 = vrot.lane.b32.xlu0 %v7677_v29, %s6030_s16  ;;  %v7682_v59 = vld [vmem:[#allocation3 + $0x122] sm:$0xff]  ;;  %v7684_v17 = vld [vmem:[#allocation3 + $0x12a] sm:$0xff] }
 0x274   : > { %v2781_v43 = vld [vmem:[#allocation3 + $0x110] sm:$0xff] }
 0x275   : > { %5612 = vrot.lane.b32.xlu1 %v5601_v45, %s6031_s19 }
 0x276   : > { %5512 = vrot.lane.b32.xlu0 %v5511_v33, %s6025_s21  ;;  %v4643_v10 = vpop.f32.mrf.mxu0 }
 0x277   : > { %v2426_v18 = vadd.f32 %v4643_v10, %v7490_v13 }
 0x278   : > { %v2417_v11 = vpop.f32.mrf.mxu0 }
 0x279   : > { %v2474_v34 = vmax.f32 %v2426_v18, 0.0  ;;  %v2418_v35 = vadd.f32 %v7490_v13, %v2417_v11  ;;  %5617 = vrot.lane.b32.xlu1 %v5616_v58, %s6032_s25  ;;  %v2750_v18 = vld [vmem:[#allocation3 + $0x112] sm:$0xff] }
 0x27a   : > { %5522 = vrot.lane.b32.xlu0 %v5521_v54, %s6028_s10  ;;  %v4644_v28 = vpop.f32.mrf.mxu0 }
 0x27b   : > { %2563 = vst.msk [vmem:[#allocation3 + $0x151] sm:$0xff] %vm2480_vm12, %v2474_v34  ;;  %v2472_v44 = vmax.f32 %v2418_v35, 0.0  ;;  %v2429_v23 = vadd.f32 %v4644_v28, %v7490_v13  ;;  %v2777_v34 = vld [vmem:[#allocation3 + $0xe0] sm:$0xff]  ;;  %v2815_v35 = vld [vmem:[#allocation3 + $0x129] sm:$0xff]  ;;  %v5359_v28 = vunpack.i.l.bf16 %v7693_v39 }
 0x27c   : > { %v2420_v52 = vpop.f32.mrf.mxu0 }
 0x27d   : > { %2561 = vst.msk [vmem:[#allocation3 + $0x139] sm:$0xff] %vm2480_vm12, %v2472_v44  ;;  %v2475_v62 = vmax.f32 %v2429_v23, 0.0  ;;  %v2421_v46 = vadd.f32 %v7490_v13, %v2420_v52  ;;  %5622 = vrot.lane.b32.xlu1 %v5601_v45, %s6025_s21  ;;  %v2748_v45 = vld [vmem:[#allocation3 + $0xfa] sm:$0xff] }
 0x27e   : > { %5527 = vrot.lane.b32.xlu0 %v5511_v33, %s6029_s13  ;;  %v5651_v10 = vpack.i.bf16 %v2748_v45, %v2747_v25  ;;  %v2569_v44 = vld [vmem:[#allocation3] sm:$0xff]  ;;  %v2776_v23 = vld [vmem:[#allocation3 + $0xd8] sm:$0xff] }
 0x27f   : > { %2564 = vst.msk [vmem:[#allocation3 + $0x159] sm:$0xff] %vm2480_vm12, %v2475_v62  ;;  %v2473_v27 = vmax.f32 %v2421_v46, 0.0  ;;  %v2814_v52 = vld [vmem:[#allocation3 + $0x121] sm:$0xff]  ;;  %v3754_v41 = vsel %vm2480_vm12, %v2569_v44, %v5359_v28 }
 0x280   : > { %v2570_v62 = vld [vmem:[#allocation3 + $0x8] sm:$0xff]  ;;  %v5736_v6 = vpack.i.bf16 %v2815_v35, %v2814_v52 }
 0x281   : > { %2562 = vst.msk [vmem:[#allocation3 + $0x141] sm:$0xff] %vm2480_vm12, %v2473_v27  ;;  %5627 = vrot.lane.b32.xlu1 %v5616_v58, %s6026_s22  ;;  %v5666_v27 = vpack.i.bf16 %v2777_v34, %v2776_v23 }
 0x282   : > { %5532 = vrot.lane.b32.xlu0 %v7607_v14, %s6025_s21 }
 0x284   : > { %v7711_v22 = vpop.permute.xlu0 %5367  ;;  %v2784_v44 = vld [vmem:[#allocation3 + $0x138] sm:$0xff] }
 0x285   : > { %5632 = vrot.lane.b32.xlu1 %v5631_v60, %s6028_s10 }
 0x286   : > { %5537 = vrot.lane.b32.xlu0 %v7629_v15, %s6026_s22  ;;  %v7716_v5 = vld [vmem:[#allocation3 + $0x152] sm:$0xff]  ;;  %v7720_v30 = vld [vmem:[#allocation3 + $0x15a] sm:$0xff] }
 0x288   : > { %v7718_v61 = vpop.permute.xlu0 %5372 }
 0x289   : > { %5637 = vrot.lane.b32.xlu1 %v5636_v50, %s6029_s13  ;;  %v5374_v34 = vunpack.i.l.bf16 %v7718_v61 }
 0x28a   : > { %5542 = vrot.lane.b32.xlu0 %v5521_v54, %s6030_s16  ;;  %v4647_v4 = vpop.f32.mrf.mxu0 }
 0x28b   : > { %v2442_v32 = vadd.f32 %v4647_v4, %v7490_v13 }
 0x28c   : > { %v7727_v49 = vpop.permute.xlu0 %5377  ;;  %v2433_v15 = vpop.f32.mrf.mxu0 }
 0x28d   : > { %v2478_v42 = vmax.f32 %v2442_v32, 0.0  ;;  %v2434_v57 = vadd.f32 %v7490_v13, %v2433_v15  ;;  %5642 = vrot.lane.b32.xlu1 %v5631_v60, %s6030_s16  ;;  %v2809_v60 = vld [vmem:[#allocation3 + $0xe1] sm:$0xff]  ;;  %v3787_v15 = vsel %vm3786_vm14, %v3754_v41, %v5364_v56  ;;  %v5686_v41 = vpack.i.bf16 %v7651_v9, %v7647_v63 }
 0x28e   : > { %5547 = vrot.lane.b32.xlu0 %v5511_v33, %s6031_s19  ;;  %v4648_v3 = vpop.f32.mrf.mxu0 }
 0x28f   : > { %2567 = vst.msk [vmem:[#allocation3 + $0x181] sm:$0xff] %vm2480_vm12, %v2478_v42  ;;  %v2476_v0 = vmax.f32 %v2434_v57, 0.0  ;;  %v2445_v31 = vadd.f32 %v4648_v3, %v7490_v13 }
 0x290   : > { %v7734_v48 = vpop.permute.xlu0 %5382  ;;  %v2436_v37 = vpop.f32.mrf.mxu0 }
 0x291   : > { %2565 = vst.msk [vmem:[#allocation3 + $0x169] sm:$0xff] %vm2480_vm12, %v2476_v0  ;;  %v2479_v47 = vmax.f32 %v2445_v31, 0.0  ;;  %v2437_v7 = vadd.f32 %v7490_v13, %v2436_v37  ;;  %5647 = vrot.lane.b32.xlu1 %v5636_v50, %s6031_s19  ;;  %v2749_v13 = vld [vmem:[#allocation3 + $0x10a] sm:$0xff] }
 0x292   : > { %5552 = vrot.lane.b32.xlu0 %v7613_v20, %s6032_s25  ;;  %v5726_v54 = vpack.i.bf16 %v2750_v18, %v2749_v13 }
 0x293   : > { %2568 = vst.msk [vmem:[#allocation3 + $0x189] sm:$0xff] %vm2480_vm12, %v2479_v47  ;;  %v2477_v33 = vmax.f32 %v2437_v7, 0.0  ;;  %v2785_v7 = vld [vmem:[#allocation3 + $0x140] sm:$0xff] }
 0x294   : > { %v7742_v8 = vpop.permute.xlu0 %5387 }
 0x295   : > { %2566 = vst.msk [vmem:[#allocation3 + $0x171] sm:$0xff] %vm2480_vm12, %v2477_v33  ;;  %5652 = vrot.lane.b32.xlu1 %v5651_v10, %s6032_s25  ;;  %v5370_v33 = vunpack.i.h.bf16 %v7711_v22 }
 0x296   : > { %5557 = vrot.lane.b32.xlu0 %v7677_v29, %s6028_s10 }
 0x298   : > { %v7748_v38 = vpop.permute.xlu0 %5392 }
 0x299   : > { %5657 = vrot.lane.b32.xlu1 %v5636_v50, %s6025_s21 }
 0x29a   : > { %5717 = vrot.lane.b32.xlu0 %v7590_v21, %s6029_s13  ;;  %v7753_v20 = vld [vmem:[#allocation3 + $0x182] sm:$0xff]  ;;  %v7757_v11 = vld [vmem:[#allocation3 + $0x18a] sm:$0xff]  ;;  %v5360_v21 = vunpack.i.h.bf16 %v7693_v39  ;;  %v2808_v39 = vld [vmem:[#allocation3 + $0xd9] sm:$0xff] }
 0x29b   : > { %v5671_v32 = vpack.i.bf16 %v2809_v60, %v2808_v39  ;;  %v2753_v39 = vld [vmem:[#allocation3 + $0x13a] sm:$0xff] }
 0x29c   : > { %v7755_v58 = vpop.permute.xlu0 %5397  ;;  %v3755_v50 = vsel %vm2480_vm12, %v2570_v62, %v5360_v21  ;;  %v5766_v62 = vpack.i.bf16 %v2785_v7, %v2784_v44 }
 0x29d   : > { %5662 = vrot.lane.b32.xlu1 %v5651_v10, %s6026_s22  ;;  %v3788_v3 = vsel %vm3786_vm14, %v3755_v50, %v5365_v53  ;;  %v5369_v10 = vunpack.i.l.bf16 %v7711_v22 }
 0x29e   : > { %5727 = vrot.lane.b32.xlu0 %v5726_v54, %s6032_s25 }
 0x2a0   : > { %v5403_v46 = vpop.permute.xlu0 %5402 }
 0x2a1   : > { %5667 = vrot.lane.b32.xlu1 %v5666_v27, %s6028_s10  ;;  %v5405_v42 = vunpack.i.h.bf16 %v5403_v46  ;;  %v5404_v57 = vunpack.i.l.bf16 %v5403_v46 }
 0x2a2   : > { %5737 = vrot.lane.b32.xlu0 %v5736_v6, %s6029_s13 }
 0x2a3   : > { %v3821_v37 = vsel %vm3819_vm15, %v3788_v3, %v5405_v42  ;;  %v3820_v25 = vsel %vm3819_vm15, %v3787_v15, %v5404_v57  ;;  %v2818_v57 = vld [vmem:[#allocation3 + $0x151] sm:$0xff] }
 0x2a4   : > { %v5408_v4 = vpop.permute.xlu0 %5407 }
 0x2a5   : > { %v5410_v0 = vunpack.i.h.bf16 %v5408_v4  ;;  %v5409_v31 = vunpack.i.l.bf16 %v5408_v4  ;;  %5672 = vrot.lane.b32.xlu1 %v5671_v32, %s6029_s13  ;;  %v2754_v4 = vld [vmem:[#allocation3 + $0x142] sm:$0xff] }
 0x2a6   : > { %5747 = vrot.lane.b32.xlu0 %v5726_v54, %s6026_s22  ;;  %v5375_v54 = vunpack.i.h.bf16 %v7718_v61  ;;  %v5796_v51 = vpack.i.bf16 %v2754_v4, %v2753_v39  ;;  %v7849_v39 = vld [vmem:[#allocation3 + $0x128] sm:$0xff] }
 0x2a7   : > { %v3853_v13 = vsel %vm3852_vm1, %v3820_v25, %v5409_v31  ;;  %v3854_v18 = vsel %vm3852_vm1, %v3821_v37, %v5410_v0 }
 0x2a8   : > { %v5413_v2 = vpop.permute.xlu0 %5412 }
 0x2a9   : > { %v5415_v45 = vunpack.i.h.bf16 %v5413_v2  ;;  %v5414_v47 = vunpack.i.l.bf16 %v5413_v2  ;;  %5677 = vrot.lane.b32.xlu1 %v5666_v27, %s6030_s16  ;;  %v2813_v2 = vld [vmem:[#allocation3 + $0x111] sm:$0xff] }
 0x2aa   : > { %5757 = vrot.lane.b32.xlu0 %v5736_v6, %s6031_s19 }
 0x2ab   : > { %v3886_v35 = vsel %vm3885_vm2, %v3853_v13, %v5414_v47  ;;  %v3887_v28 = vsel %vm3885_vm2, %v3854_v18, %v5415_v45  ;;  %v7789_v23 = vpop.permute.xlu1 %5492  ;;  %v2812_v45 = vld [vmem:[#allocation3 + $0x109] sm:$0xff] }
 0x2ac   : > { %v3919_v21 = vsel %vm3918_vm3, %v3886_v35, %v5369_v10  ;;  %v3920_v22 = vsel %vm3918_vm3, %v3887_v28, %v5370_v33  ;;  %v5418_v52 = vpop.permute.xlu0 %5417  ;;  %v5706_v13 = vpack.i.bf16 %v2813_v2, %v2812_v45  ;;  %v5494_v29 = vunpack.i.l.bf16 %v7789_v23 }
 0x2ad   : > { %v3952_v46 = vsel %vm3951_vm4, %v3919_v21, %v5374_v34  ;;  %v3953_v27 = vsel %vm3951_vm4, %v3920_v22, %v5375_v54  ;;  %5682 = vrot.lane.b32.xlu1 %v5671_v32, %s6031_s19  ;;  %v5420_v37 = vunpack.i.h.bf16 %v5418_v52  ;;  %v5419_v25 = vunpack.i.l.bf16 %v5418_v52  ;;  %v2789_v52 = vld [vmem:[#allocation3 + $0x170] sm:$0xff] }
 0x2ae   : > { %v3984_v56 = vpack.c.bf16 %v3953_v27, %v3952_v46  ;;  %5767 = vrot.lane.b32.xlu0 %v5766_v62, %s6028_s10  ;;  %v5380_v21 = vunpack.i.h.bf16 %v7727_v49  ;;  %v5379_v22 = vunpack.i.l.bf16 %v7727_v49  ;;  %v5385_v46 = vunpack.i.h.bf16 %v7734_v48 }
 0x2af   : > { %v7795_v61 = vpop.permute.xlu1 %5497  ;;  %v3756_v18 = vsel %vm2480_vm12, %v7572_v24, %v5419_v25  ;;  %v3757_v54 = vsel %vm2480_vm12, %v7568_v19, %v5420_v37  ;;  %v5384_v27 = vunpack.i.l.bf16 %v7734_v48  ;;  %v5389_v48 = vunpack.i.l.bf16 %v7742_v8 }
 0x2b0   : > { %4176 = vmatmul.mubr.bf16.vlgmr.msra.gmra.mxu0 %v3984_v56  ;;  %v5423_v60 = vpop.permute.xlu0 %5422 }
 0x2b1   : > { %4576 = vmatprep.mubr.msk.bf16.mxu0 %vm2480_vm12, %v3987_v40  ;;  %5687 = vrot.lane.b32.xlu1 %v5686_v41, %s6032_s25  ;;  %v2819_v40 = vld [vmem:[#allocation3 + $0x159] sm:$0xff]  ;;  %v5425_v47 = vunpack.i.h.bf16 %v5423_v60  ;;  %v5424_v7 = vunpack.i.l.bf16 %v5423_v60 }
 0x2b2   : > { %5777 = vrot.lane.b32.xlu0 %v5736_v6, %s6025_s21  ;;  %v2780_v6 = vld [vmem:[#allocation3 + $0x108] sm:$0xff]  ;;  %v5806_v31 = vpack.i.bf16 %v2819_v40, %v2818_v57  ;;  %v5390_v40 = vunpack.i.h.bf16 %v7742_v8 }
 0x2b3   : > { %v7805_v53 = vpop.permute.xlu1 %5502  ;;  %v3789_v34 = vsel %vm3786_vm14, %v3756_v18, %v5424_v7  ;;  %v3790_v35 = vsel %vm3786_vm14, %v3757_v54, %v5425_v47 }
 0x2b4   : > { %v7807_v50 = vpop.permute.xlu0 %5427  ;;  %v3822_v24 = vsel %vm3819_vm15, %v3789_v34, %v5379_v22  ;;  %v3823_v19 = vsel %vm3819_vm15, %v3790_v35, %v5380_v21  ;;  %v2830_v34 = vld [vmem:[#allocation3 + $0x62] sm:$0xff]  ;;  %v2831_v35 = vld [vmem:[#allocation3 + $0x6a] sm:$0xff] }
 0x2b5   : > { %5692 = vrot.lane.b32.xlu1 %v5671_v32, %s6025_s21  ;;  %v5701_v32 = vpack.i.bf16 %v2781_v43, %v2780_v6  ;;  %v3856_v43 = vsel %vm3852_vm1, %v3823_v19, %v5385_v46  ;;  %v7857_v6 = vld [vmem:[#allocation3 + $0x120] sm:$0xff]  ;;  %v2757_v19 = vld [vmem:[#allocation3 + $0x16a] sm:$0xff]  ;;  %v5395_v46 = vunpack.i.h.bf16 %v7748_v38 }
 0x2b6   : > { %5787 = vrot.lane.b32.xlu0 %v5766_v62, %s6030_s16  ;;  %v2788_v62 = vld [vmem:[#allocation3 + $0x168] sm:$0xff]  ;;  %v5731_v2 = vpack.i.bf16 %v7849_v39, %v7857_v6  ;;  %v3889_v25 = vsel %vm3885_vm2, %v3856_v43, %v5390_v40 }
 0x2b7   : > { %v7811_v15 = vpop.permute.xlu1 %5507 }
 0x2b8   : > { %v7813_v42 = vpop.permute.xlu0 %5432 }
 0x2b9   : > { %5697 = vrot.lane.b32.xlu1 %v5686_v41, %s6026_s22  ;;  %v5836_v41 = vpack.i.bf16 %v2789_v52, %v2788_v62  ;;  %v2758_v62 = vld [vmem:[#allocation3 + $0x172] sm:$0xff] }
 0x2ba   : > { %5797 = vrot.lane.b32.xlu0 %v5796_v51, %s6032_s25  ;;  %v5866_v40 = vpack.i.bf16 %v2758_v62, %v2757_v19  ;;  %v2585_v19 = vld [vmem:[#allocation3 + $0xc0] sm:$0xff] }
 0x2bb   : > { %v7817_v3 = vpop.permute.xlu1 %5517 }
 0x2bc   : > { %v7819_v0 = vpop.permute.xlu0 %5437 }
 0x2bd   : > { %5702 = vrot.lane.b32.xlu1 %v5701_v32, %s6028_s10 }
 0x2be   : > { %5807 = vrot.lane.b32.xlu0 %v5806_v31, %s6029_s13 }
 0x2bf   : > { %v7823_v33 = vpop.permute.xlu1 %5562 }
 0x2c0   : > { %v7825_v10 = vpop.permute.xlu0 %5442 }
 0x2c1   : > { %5707 = vrot.lane.b32.xlu1 %v5706_v13, %s6029_s13 }
 0x2c2   : > { %5817 = vrot.lane.b32.xlu0 %v5796_v51, %s6026_s22  ;;  %v3855_v51 = vsel %vm3852_vm1, %v3822_v24, %v5384_v27  ;;  %v5394_v24 = vunpack.i.l.bf16 %v7748_v38  ;;  %v5400_v27 = vunpack.i.h.bf16 %v7755_v58 }
 0x2c3   : > { %v7835_v28 = vpop.permute.xlu1 %5567  ;;  %v3888_v37 = vsel %vm3885_vm2, %v3855_v51, %v5389_v48  ;;  %v2823_v48 = vld [vmem:[#allocation3 + $0x189] sm:$0xff] }
 0x2c4   : > { %v7837_v44 = vpop.permute.xlu0 %5447  ;;  %v3758_v38 = vsel %vm2480_vm12, %v7505_v12, %v5394_v24 }
 0x2c5   : > { %5712 = vrot.lane.b32.xlu1 %v5701_v32, %s6030_s16 }
 0x2c6   : > { %5827 = vrot.lane.b32.xlu0 %v5806_v31, %s6031_s19 }
 0x2c7   : > { %v7847_v56 = vpop.permute.xlu1 %5572 }
 0x2c8   : > { %v5453_v60 = vpop.permute.xlu0 %5452 }
 0x2c9   : > { %v5455_v49 = vunpack.i.h.bf16 %v5453_v60  ;;  %v5454_v4 = vunpack.i.l.bf16 %v5453_v60  ;;  %5722 = vrot.lane.b32.xlu1 %v5706_v13, %s6031_s19  ;;  %v5399_v60 = vunpack.i.l.bf16 %v7755_v58  ;;  %v3759_v58 = vsel %vm2480_vm12, %v7507_v26, %v5395_v46 }
 0x2ca   : > { %5837 = vrot.lane.b32.xlu0 %v5836_v41, %s6028_s10  ;;  %v3792_v12 = vsel %vm3786_vm14, %v3759_v58, %v5400_v27  ;;  %v5430_v26 = vunpack.i.h.bf16 %v7807_v50 }
 0x2cb   : > { %v7859_v57 = vpop.permute.xlu1 %5577  ;;  %v3921_v7 = vsel %vm3918_vm3, %v3888_v37, %v5454_v4  ;;  %v3922_v18 = vsel %vm3918_vm3, %v3889_v25, %v5455_v49 }
 0x2cc   : > { %v5458_v32 = vpop.permute.xlu0 %5457 }
 0x2cd   : > { %v5460_v45 = vunpack.i.h.bf16 %v5458_v32  ;;  %v5459_v47 = vunpack.i.l.bf16 %v5458_v32  ;;  %5732 = vrot.lane.b32.xlu1 %v5731_v2, %s6028_s10  ;;  %v2817_v32 = vld [vmem:[#allocation3 + $0x141] sm:$0xff] }
 0x2ce   : > { %5847 = vrot.lane.b32.xlu0 %v5806_v31, %s6025_s21  ;;  %v3989_v31 = vpack.c.bf16 %v2831_v35, %v2830_v34 }
 0x2cf   : > { %v3954_v8 = vsel %vm3951_vm4, %v3921_v7, %v5459_v47  ;;  %v3955_v54 = vsel %vm3951_vm4, %v3922_v18, %v5460_v45  ;;  %v7871_v21 = vpop.permute.xlu1 %5582  ;;  %v2822_v47 = vld [vmem:[#allocation3 + $0x181] sm:$0xff]  ;;  %v2816_v7 = vld [vmem:[#allocation3 + $0x139] sm:$0xff]  ;;  %v3791_v18 = vsel %vm3786_vm14, %v3758_v38, %v5399_v60 }
 0x2d0   : > { %v5463_v22 = vpop.permute.xlu0 %5462  ;;  %v3986_v52 = vpack.c.bf16 %v3955_v54, %v3954_v8  ;;  %v2586_v8 = vld [vmem:[#allocation3 + $0xc8] sm:$0xff]  ;;  %v7892_v54 = vpack.i.bf16 %v2823_v48, %v2822_v47  ;;  %v7894_v34 = vpack.i.bf16 %v2817_v32, %v2816_v7  ;;  %v7900_v60 = vld [vmem:[#allocation3 + $0x92] sm:$0xff]  ;;  %v7910_v38 = vld [vmem:[#allocation3 + $0x9a] sm:$0xff]  ;;  %v5435_v47 = vunpack.i.h.bf16 %v7813_v42 }
 0x2d1   : > { %5742 = vrot.lane.b32.xlu1 %v5706_v13, %s6025_s21  ;;  %v5465_v49 = vunpack.i.h.bf16 %v5463_v22  ;;  %v5464_v4 = vunpack.i.l.bf16 %v5463_v22  ;;  %v2833_v32 = vld [vmem:[#allocation3 + $0x82] sm:$0xff]  ;;  %v5434_v7 = vunpack.i.l.bf16 %v7813_v42 }
 0x2d2   : > { %5857 = vrot.lane.b32.xlu0 %v5836_v41, %s6030_s16  ;;  %4184 = vmatmul.mubr.bf16.gmra.mxu0 %v3986_v52  ;;  %v7884_v41 = vpack.i.bf16 %v7684_v17, %v7682_v59 }
 0x2d3   : > { %4577 = vmatprep.mubr.msk.bf16.mxu0 %vm2480_vm12, %v3989_v31  ;;  %v5588_v51 = vpop.permute.xlu1 %5587  ;;  %v3825_v35 = vsel %vm3819_vm15, %v3792_v12, %v5465_v49  ;;  %v3824_v22 = vsel %vm3819_vm15, %v3791_v18, %v5464_v4  ;;  %v2832_v4 = vld [vmem:[#allocation3 + $0x7a] sm:$0xff] }
 0x2d4   : > { %v5468_v43 = vpop.permute.xlu0 %5467  ;;  %v5590_v13 = vunpack.i.h.bf16 %v5588_v51  ;;  %v5589_v37 = vunpack.i.l.bf16 %v5588_v51  ;;  %v5429_v51 = vunpack.i.l.bf16 %v7807_v50 }
 0x2d5   : > { %v5470_v25 = vunpack.i.h.bf16 %v5468_v43  ;;  %v5469_v45 = vunpack.i.l.bf16 %v5468_v43  ;;  %5752 = vrot.lane.b32.xlu1 %v5731_v2, %s6030_s16 }
 0x2d6   : > { %5867 = vrot.lane.b32.xlu0 %v5866_v40, %s6032_s25  ;;  %v3771_v2 = vsel %vm2480_vm12, %v2586_v8, %v5590_v13  ;;  %v3770_v43 = vsel %vm2480_vm12, %v2585_v19, %v5589_v37  ;;  %v2793_v19 = vld [vmem:[#allocation3 + $0x1a0] sm:$0xff] }
 0x2d7   : > { %v5593_v52 = vpop.permute.xlu1 %5592  ;;  %v3857_v48 = vsel %vm3852_vm1, %v3824_v22, %v5469_v45  ;;  %v3858_v49 = vsel %vm3852_vm1, %v3825_v35, %v5470_v25  ;;  %v7920_v25 = vld [vmem:[#allocation3 + $0xc2] sm:$0xff]  ;;  %v7922_v45 = vld [vmem:[#allocation3 + $0xca] sm:$0xff]  ;;  %v7930_v22 = vld [vmem:[#allocation3 + $0x158] sm:$0xff] }
 0x2d8   : > { %v5473_v24 = vpop.permute.xlu0 %5472  ;;  %v5595_v62 = vunpack.i.h.bf16 %v5593_v52  ;;  %v5594_v46 = vunpack.i.l.bf16 %v5593_v52 }
 0x2d9   : > { %v5475_v31 = vunpack.i.h.bf16 %v5473_v24  ;;  %v5474_v27 = vunpack.i.l.bf16 %v5473_v24  ;;  %5762 = vrot.lane.b32.xlu1 %v7884_v41, %s6032_s25  ;;  %v2792_v24 = vld [vmem:[#allocation3 + $0x198] sm:$0xff] }
 0x2da   : > { %5877 = vrot.lane.b32.xlu0 %v7892_v54, %s6029_s13  ;;  %v7913_v13 = vsel %vm3786_vm14, %v3770_v43, %v5594_v46  ;;  %v7916_v50 = vsel %vm3786_vm14, %v3771_v2, %v5595_v62  ;;  %v3991_v2 = vpack.c.bf16 %v2833_v32, %v2832_v4  ;;  %v5509_v4 = vunpack.i.l.bf16 %v7811_v15 }
 0x2db   : > { %v3890_v58 = vsel %vm3885_vm2, %v3857_v48, %v5474_v27  ;;  %v3891_v37 = vsel %vm3885_vm2, %v3858_v49, %v5475_v31  ;;  %v7926_v18 = vpop.permute.xlu1 %5597  ;;  %v7939_v31 = vld [vmem:[#allocation3 + $0x150] sm:$0xff] }
 0x2dc   : > { %v5478_v12 = vpop.permute.xlu0 %5477  ;;  %v3923_v8 = vsel %vm3918_vm3, %v3890_v58, %v5429_v51  ;;  %v3924_v35 = vsel %vm3918_vm3, %v3891_v37, %v5430_v26  ;;  %v2821_v27 = vld [vmem:[#allocation3 + $0x171] sm:$0xff]  ;;  %v5504_v51 = vunpack.i.l.bf16 %v7805_v53  ;;  %v7946_v49 = vpack.i.bf16 %v7930_v22, %v7939_v31 }
 0x2dd   : > { %v5479_v62 = vunpack.i.l.bf16 %v5478_v12  ;;  %5772 = vrot.lane.b32.xlu1 %v7894_v34, %s6029_s13  ;;  %v3956_v42 = vsel %vm3951_vm4, %v3923_v8, %v5434_v7  ;;  %v3957_v46 = vsel %vm3951_vm4, %v3924_v35, %v5435_v47  ;;  %v5480_v43 = vunpack.i.h.bf16 %v5478_v12  ;;  %v2820_v47 = vld [vmem:[#allocation3 + $0x169] sm:$0xff] }
 0x2de   : > { %5887 = vrot.lane.b32.xlu0 %v5866_v40, %s6026_s22  ;;  %v3988_v48 = vpack.c.bf16 %v3957_v46, %v3956_v42  ;;  %v5505_v40 = vunpack.i.h.bf16 %v7805_v53  ;;  %v7954_v37 = vpack.i.bf16 %v7720_v30, %v7716_v5  ;;  %v5906_v7 = vpack.i.bf16 %v2793_v19, %v2792_v24  ;;  %v2575_v8 = vld [vmem:[#allocation3 + $0x48] sm:$0xff] }
 0x2df   : > { %v7950_v32 = vpop.permute.xlu1 %5602  ;;  %v5510_v12 = vunpack.i.h.bf16 %v7811_v15  ;;  %v7957_v46 = vpack.i.bf16 %v2821_v27, %v2820_v47  ;;  %v5495_v53 = vunpack.i.h.bf16 %v7789_v23  ;;  %v3760_v55 = vsel %vm2480_vm12, %v2575_v8, %v5479_v62 }
 0x2e0   : > { %v5483_v58 = vpop.permute.xlu0 %5482  ;;  %4192 = vmatmul.mubr.bf16.gmra.mxu0 %v3988_v48  ;;  %v3766_v24 = vsel %vm2480_vm12, %v7673_v1, %v5504_v51  ;;  %v3761_v19 = vsel %vm2480_vm12, %v2576_v36, %v5480_v43  ;;  %v3767_v62 = vsel %vm2480_vm12, %v7668_v16, %v5505_v40  ;;  %v5439_v48 = vunpack.i.l.bf16 %v7819_v0 }
 0x2e1   : > { %v5485_v35 = vunpack.i.h.bf16 %v5483_v58  ;;  %v5484_v42 = vunpack.i.l.bf16 %v5483_v58  ;;  %4578 = vmatprep.mubr.msk.bf16.mxu0 %vm2480_vm12, %v3991_v2  ;;  %5782 = vrot.lane.b32.xlu1 %v7884_v41, %s6026_s22  ;;  %v3799_v2 = vsel %vm3786_vm14, %v3766_v24, %v5509_v4  ;;  %v3800_v1 = vsel %vm3786_vm14, %v3767_v62, %v5510_v12 }
 0x2e2   : > { %5897 = vrot.lane.b32.xlu0 %v7892_v54, %s6031_s19  ;;  %v5520_v36 = vunpack.i.h.bf16 %v7817_v3  ;;  %v5440_v51 = vunpack.i.h.bf16 %v7819_v0  ;;  %v5445_v16 = vunpack.i.h.bf16 %v7825_v10  ;;  %v5444_v4 = vunpack.i.l.bf16 %v7825_v10 }
 0x2e3   : > { %v3793_v27 = vsel %vm3786_vm14, %v3760_v55, %v5484_v42  ;;  %v3794_v41 = vsel %vm3786_vm14, %v3761_v19, %v5485_v35  ;;  %v5608_v58 = vpop.permute.xlu1 %5607  ;;  %v5519_v55 = vunpack.i.l.bf16 %v7817_v3  ;;  %v5450_v12 = vunpack.i.h.bf16 %v7837_v44 }
 0x2e4   : > { %v5488_v47 = vpop.permute.xlu0 %5487  ;;  %v3826_v43 = vsel %vm3819_vm15, %v3793_v27, %v5439_v48  ;;  %v5610_v40 = vunpack.i.h.bf16 %v5608_v58  ;;  %v3827_v8 = vsel %vm3819_vm15, %v3794_v41, %v5440_v51  ;;  %v5609_v35 = vunpack.i.l.bf16 %v5608_v58  ;;  %v2579_v51 = vld [vmem:[#allocation3 + $0x78] sm:$0xff] }
 0x2e5   : > { %5792 = vrot.lane.b32.xlu1 %v7894_v34, %s6031_s19  ;;  %v5449_v3 = vunpack.i.l.bf16 %v7837_v44  ;;  %v5600_v0 = vunpack.i.h.bf16 %v7926_v18  ;;  %v5599_v42 = vunpack.i.l.bf16 %v7926_v18  ;;  %v5605_v24 = vunpack.i.h.bf16 %v7950_v32  ;;  %v2580_v44 = vld [vmem:[#allocation3 + $0x80] sm:$0xff] }
 0x2e6   : > { %5907 = vrot.lane.b32.xlu0 %v5906_v7, %s6028_s10  ;;  %v5604_v62 = vunpack.i.l.bf16 %v7950_v32  ;;  %v3859_v52 = vsel %vm3852_vm1, %v3826_v43, %v5444_v4  ;;  %v3833_v41 = vsel %vm3819_vm15, %v3800_v1, %v5610_v40  ;;  %v5490_v58 = vunpack.i.h.bf16 %v5488_v47 }
 0x2e7   : > { %v5613_v19 = vpop.permute.xlu1 %5612  ;;  %v5489_v7 = vunpack.i.l.bf16 %v5488_v47  ;;  %v3860_v18 = vsel %vm3852_vm1, %v3827_v8, %v5445_v16  ;;  %v3832_v26 = vsel %vm3819_vm15, %v3799_v2, %v5609_v35  ;;  %v3892_v4 = vsel %vm3885_vm2, %v3859_v52, %v5449_v3 }
 0x2e8   : > { %v5513_v27 = vpop.permute.xlu0 %5512  ;;  %v5614_v54 = vunpack.i.l.bf16 %v5613_v19  ;;  %v5615_v14 = vunpack.i.h.bf16 %v5613_v19  ;;  %v8511_v19 = vunpack.i.l.bf16 %v7795_v61 }
 0x2e9   : > { %v5515_v10 = vunpack.i.h.bf16 %v5513_v27  ;;  %v5514_v48 = vunpack.i.l.bf16 %v5513_v27  ;;  %5802 = vrot.lane.b32.xlu1 %v7946_v49, %s6028_s10 }
 0x2eb   : > { %v3765_v32 = vsel %vm2480_vm12, %v2580_v44, %v5515_v10  ;;  %v3764_v27 = vsel %vm2480_vm12, %v2579_v51, %v5514_v48  ;;  %v5618_v47 = vpop.permute.xlu1 %5617  ;;  %v3893_v10 = vsel %vm3885_vm2, %v3860_v18, %v5450_v12  ;;  %v8512_v12 = vunpack.i.h.bf16 %v7795_v61 }
 0x2ec   : > { %v3798_v43 = vsel %vm3786_vm14, %v3765_v32, %v5520_v36  ;;  %v3797_v1 = vsel %vm3786_vm14, %v3764_v27, %v5519_v55  ;;  %v5523_v40 = vpop.permute.xlu0 %5522  ;;  %v5620_v8 = vunpack.i.h.bf16 %v5618_v47  ;;  %v5619_v2 = vunpack.i.l.bf16 %v5618_v47 }
 0x2ed   : > { %v3830_v15 = vsel %vm3819_vm15, %v3797_v1, %v5489_v7  ;;  %v3831_v16 = vsel %vm3819_vm15, %v3798_v43, %v5490_v58  ;;  %v5524_v35 = vunpack.i.l.bf16 %v5523_v40  ;;  %5812 = vrot.lane.b32.xlu1 %v7894_v34, %s6025_s21  ;;  %v3865_v55 = vsel %vm3852_vm1, %v3832_v26, %v5614_v54 }
 0x2ee   : > { %v3863_v36 = vsel %vm3852_vm1, %v3830_v15, %v5494_v29  ;;  %v3864_v52 = vsel %vm3852_vm1, %v3831_v16, %v5495_v53  ;;  %v5525_v3 = vunpack.i.h.bf16 %v5523_v40  ;;  %v3866_v34 = vsel %vm3852_vm1, %v3833_v41, %v5615_v14 }
 0x2ef   : > { %v3896_v48 = vsel %vm3885_vm2, %v3863_v36, %v8511_v19  ;;  %v3897_v58 = vsel %vm3885_vm2, %v3864_v52, %v8512_v12  ;;  %v3898_v7 = vsel %vm3885_vm2, %v3865_v55, %v5619_v2  ;;  %v5623_v29 = vpop.permute.xlu1 %5622  ;;  %v3899_v26 = vsel %vm3885_vm2, %v3866_v34, %v5620_v8 }
 0x2f0   : > { %v5528_v15 = vpop.permute.xlu0 %5527  ;;  %v3929_v23 = vsel %vm3918_vm3, %v3896_v48, %v5599_v42  ;;  %v3930_v53 = vsel %vm3918_vm3, %v3897_v58, %v5600_v0  ;;  %v3925_v54 = vsel %vm3918_vm3, %v3892_v4, %v5524_v35  ;;  %v5625_v18 = vunpack.i.h.bf16 %v5623_v29 }
 0x2f1   : > { %v5530_v51 = vunpack.i.h.bf16 %v5528_v15  ;;  %v5529_v44 = vunpack.i.l.bf16 %v5528_v15  ;;  %v5624_v61 = vunpack.i.l.bf16 %v5623_v29  ;;  %5822 = vrot.lane.b32.xlu1 %v7946_v49, %s6030_s16  ;;  %v3962_v14 = vsel %vm3951_vm4, %v3929_v23, %v5604_v62  ;;  %v2583_v62 = vld [vmem:[#allocation3 + $0xa8] sm:$0xff] }
 0x2f2   : > { %v3963_v41 = vsel %vm3951_vm4, %v3930_v53, %v5605_v24  ;;  %v5564_v32 = vunpack.i.l.bf16 %v7823_v33  ;;  %v3926_v42 = vsel %vm3918_vm3, %v3893_v10, %v5525_v3  ;;  %v5570_v43 = vunpack.i.h.bf16 %v7835_v28  ;;  %v2584_v24 = vld [vmem:[#allocation3 + $0xb0] sm:$0xff] }
 0x2f3   : > { %v3994_v0 = vpack.c.bf16 %v3963_v41, %v3962_v14  ;;  %v3958_v27 = vsel %vm3951_vm4, %v3925_v54, %v5529_v44  ;;  %v5569_v1 = vunpack.i.l.bf16 %v7835_v28  ;;  %v5575_v47 = vunpack.i.h.bf16 %v7847_v56  ;;  %v5628_v40 = vpop.permute.xlu1 %5627  ;;  %v2790_v14 = vld [vmem:[#allocation3 + $0x180] sm:$0xff] }
 0x2f4   : > { %v8041_v4 = vpop.permute.xlu0 %5532  ;;  %v3959_v49 = vsel %vm3951_vm4, %v3926_v42, %v5530_v51  ;;  %v5630_v16 = vunpack.i.h.bf16 %v5628_v40  ;;  %v5629_v8 = vunpack.i.l.bf16 %v5628_v40  ;;  %v3931_v2 = vsel %vm3918_vm3, %v3898_v7, %v5564_v32 }
 0x2f5   : > { %4216 = vmatmul.mubr.bf16.vlgmr.msra.gmra.mxu1 %v3994_v0  ;;  %v8513_v35 = vunpack.i.h.bf16 %v7823_v33  ;;  %v5574_v28 = vunpack.i.l.bf16 %v7847_v56  ;;  %v3769_v36 = vsel %vm2480_vm12, %v2584_v24, %v5625_v18  ;;  %v3768_v52 = vsel %vm2480_vm12, %v2583_v62, %v5624_v61  ;;  %5832 = vrot.lane.b32.xlu1 %v7954_v37, %s6032_s25  ;;  %v2791_v61 = vld [vmem:[#allocation3 + $0x188] sm:$0xff] }
 0x2f6   : > { %v8514_v55 = vpack.c.bf16 %v7922_v45, %v7920_v25  ;;  %v3990_v3 = vpack.c.bf16 %v3959_v49, %v3958_v27  ;;  %v5580_v19 = vunpack.i.h.bf16 %v7859_v57  ;;  %v5579_v33 = vunpack.i.l.bf16 %v7859_v57 }
 0x2f7   : > { %v3932_v10 = vsel %vm3918_vm3, %v3899_v26, %v8513_v35  ;;  %v3801_v48 = vsel %vm3786_vm14, %v3768_v52, %v5629_v8  ;;  %v3802_v56 = vsel %vm3786_vm14, %v3769_v36, %v5630_v16  ;;  %v8063_v25 = vpop.permute.xlu1 %5632  ;;  %v3964_v34 = vsel %vm3951_vm4, %v3931_v2, %v5569_v1  ;;  %v2577_v1 = vld [vmem:[#allocation3 + $0x60] sm:$0xff] }
 0x2f8   : > { %4581 = vmatprep.mubr.msk.bf16.mxu1 %vm2480_vm12, %v8514_v55  ;;  %v3834_v12 = vsel %vm3819_vm15, %v3801_v48, %v5574_v28  ;;  %v3835_v58 = vsel %vm3819_vm15, %v3802_v56, %v5575_v47  ;;  %4200 = vmatmul.mubr.bf16.gmra.mxu0 %v3990_v3  ;;  %v5538_v45 = vpop.permute.xlu0 %5537  ;;  %v3965_v7 = vsel %vm3951_vm4, %v3932_v10, %v5570_v43  ;;  %v5585_v29 = vunpack.i.h.bf16 %v7871_v21  ;;  %v2578_v47 = vld [vmem:[#allocation3 + $0x68] sm:$0xff] }
 0x2f9   : > { %v5584_v57 = vunpack.i.l.bf16 %v7871_v21  ;;  %v8515_v15 = vpack.c.bf16 %v7910_v38, %v7900_v60  ;;  %5842 = vrot.lane.b32.xlu1 %v7957_v46, %s6029_s13  ;;  %v3867_v23 = vsel %vm3852_vm1, %v3834_v12, %v5579_v33  ;;  %v3868_v53 = vsel %vm3852_vm1, %v3835_v58, %v5580_v19 }
 0x2fa   : > { %v3996_v26 = vpack.c.bf16 %v3965_v7, %v3964_v34  ;;  %v8081_v51 = vsel %vm3885_vm2, %v3868_v53, %v5585_v29  ;;  %v8516_v60 = vpack.c.bf16 %v7651_v9, %v7647_v63  ;;  %v5871_v42 = vpack.i.bf16 %v2791_v61, %v2790_v14 }
 0x2fb   : > { %4579 = vmatprep.mubr.msk.bf16.mxu0 %vm2480_vm12, %v8515_v15  ;;  %v8078_v54 = vsel %vm3885_vm2, %v3867_v23, %v5584_v57  ;;  %v8083_v21 = vpop.permute.xlu1 %5637  ;;  %v5535_v0 = vunpack.i.h.bf16 %v8041_v4  ;;  %v5534_v63 = vunpack.i.l.bf16 %v8041_v4  ;;  %v5540_v9 = vunpack.i.h.bf16 %v5538_v45  ;;  %v2824_v57 = vld [vmem:[#allocation3 + $0x199] sm:$0xff]  ;;  %v2825_v15 = vld [vmem:[#allocation3 + $0x1a1] sm:$0xff] }
 0x2fc   : > { %v5543_v44 = vpop.permute.xlu0 %5542  ;;  %v5539_v27 = vunpack.i.l.bf16 %v5538_v45  ;;  %v5901_v53 = vpack.i.bf16 %v7757_v11, %v7753_v20 }
 0x2fd   : > { %4224 = vmatmul.mubr.bf16.gmra.mxu1 %v3996_v26  ;;  %5852 = vrot.lane.b32.xlu1 %v7954_v37, %s6026_s22  ;;  %v5545_v37 = vunpack.i.h.bf16 %v5543_v44  ;;  %v5544_v43 = vunpack.i.l.bf16 %v5543_v44  ;;  %v3763_v16 = vsel %vm2480_vm12, %v2578_v47, %v5535_v0  ;;  %v3762_v8 = vsel %vm2480_vm12, %v2577_v1, %v5534_v63 }
 0x2fe   : > { %4582 = vmatprep.mubr.msk.bf16.mxu1 %vm2480_vm12, %v8516_v60  ;;  %v3795_v4 = vsel %vm3786_vm14, %v3762_v8, %v5539_v27  ;;  %v3796_v10 = vsel %vm3786_vm14, %v3763_v16, %v5540_v9  ;;  %v5911_v44 = vpack.i.bf16 %v2825_v15, %v2824_v57  ;;  %v2842_v27 = vld [vmem:[#allocation3 + $0xf2] sm:$0xff] }
 0x2ff   : > { %v8091_v38 = vpop.permute.xlu1 %5642  ;;  %v3828_v52 = vsel %vm3819_vm15, %v3795_v4, %v5544_v43  ;;  %v3829_v55 = vsel %vm3819_vm15, %v3796_v10, %v5545_v37  ;;  %v2843_v37 = vld [vmem:[#allocation3 + $0xfa] sm:$0xff] }
 0x300   : > { %v5548_v18 = vpop.permute.xlu0 %5547 }
 0x301   : > { %5862 = vrot.lane.b32.xlu1 %v7957_v46, %s6031_s19  ;;  %v5550_v40 = vunpack.i.h.bf16 %v5548_v18  ;;  %v5549_v49 = vunpack.i.l.bf16 %v5548_v18 }
 0x303   : > { %v8095_v41 = vpop.permute.xlu1 %5647  ;;  %v3861_v3 = vsel %vm3852_vm1, %v3828_v52, %v5549_v49  ;;  %v3862_v19 = vsel %vm3852_vm1, %v3829_v55, %v5550_v40  ;;  %v4001_v49 = vpack.c.bf16 %v2843_v37, %v2842_v27  ;;  %v5635_v55 = vunpack.i.h.bf16 %v8063_v25 }
 0x304   : > { %v5553_v32 = vpop.permute.xlu0 %5552  ;;  %v5650_v27 = vunpack.i.h.bf16 %v8095_v41  ;;  %v5649_v37 = vunpack.i.l.bf16 %v8095_v41 }
 0x305   : > { %5872 = vrot.lane.b32.xlu1 %v5871_v42, %s6028_s10  ;;  %v5555_v2 = vunpack.i.h.bf16 %v5553_v32  ;;  %v5554_v35 = vunpack.i.l.bf16 %v5553_v32 }
 0x307   : > { %v8100_v62 = vpop.permute.xlu1 %5652  ;;  %v3894_v56 = vsel %vm3885_vm2, %v3861_v3, %v5554_v35  ;;  %v3895_v12 = vsel %vm3885_vm2, %v3862_v19, %v5555_v2  ;;  %v5634_v3 = vunpack.i.l.bf16 %v8063_v25 }
 0x308   : > { %v5558_v24 = vpop.permute.xlu0 %5557 }
 0x309   : > { %v5560_v28 = vunpack.i.h.bf16 %v5558_v24  ;;  %v5559_v36 = vunpack.i.l.bf16 %v5558_v24  ;;  %5882 = vrot.lane.b32.xlu1 %v7957_v46, %s6025_s21 }
 0x30b   : > { %v8112_v33 = vpop.permute.xlu1 %5657  ;;  %v3927_v34 = vsel %vm3918_vm3, %v3894_v56, %v5559_v36  ;;  %v3928_v46 = vsel %vm3918_vm3, %v3895_v12, %v5560_v28 }
 0x30c   : > { %v5718_v48 = vpop.permute.xlu0 %5717 }
 0x30d   : > { %v5720_v58 = vunpack.i.h.bf16 %v5718_v48  ;;  %v5719_v45 = vunpack.i.l.bf16 %v5718_v48  ;;  %5892 = vrot.lane.b32.xlu1 %v5871_v42, %s6030_s16 }
 0x30f   : > { %v3960_v7 = vsel %vm3951_vm4, %v3927_v34, %v5719_v45  ;;  %v3961_v29 = vsel %vm3951_vm4, %v3928_v46, %v5720_v58  ;;  %v8121_v23 = vpop.permute.xlu1 %5662  ;;  %v5640_v58 = vunpack.i.h.bf16 %v8083_v21  ;;  %v2844_v46 = vld [vmem:[#allocation3 + $0x10a] sm:$0xff] }
 0x310   : > { %v3992_v26 = vpack.c.bf16 %v3961_v29, %v3960_v7  ;;  %v8127_v32 = vpop.permute.xlu0 %5727  ;;  %v2845_v7 = vld [vmem:[#allocation3 + $0x112] sm:$0xff] }
 0x311   : > { %5902 = vrot.lane.b32.xlu1 %v5901_v53, %s6032_s25 }
 0x312   : > { %4208 = vmatmul.mubr.bf16.gmra.mxu0 %v3992_v26 }
 0x313   : > { %v5668_v60 = vpop.permute.xlu1 %5667 }
 0x314   : > { %v5670_v18 = vunpack.i.h.bf16 %v5668_v60  ;;  %v5669_v61 = vunpack.i.l.bf16 %v5668_v60  ;;  %v8135_v24 = vpop.permute.xlu0 %5737  ;;  %v4003_v60 = vpack.c.bf16 %v2845_v7, %v2844_v46  ;;  %v2589_v7 = vld [vmem:[#allocation3 + $0xf0] sm:$0xff] }
 0x315   : > { %5912 = vrot.lane.b32.xlu1 %v5911_v44, %s6029_s13 }
 0x316   : > { %v3933_v63 = vsel %vm3918_vm3, %v8078_v54, %v5669_v61  ;;  %v3934_v9 = vsel %vm3918_vm3, %v8081_v51, %v5670_v18  ;;  %v2587_v18 = vld [vmem:[#allocation3 + $0xd8] sm:$0xff] }
 0x317   : > { %v5673_v14 = vpop.permute.xlu1 %5672 }
 0x318   : > { %v5675_v42 = vunpack.i.h.bf16 %v5673_v14  ;;  %v5674_v0 = vunpack.i.l.bf16 %v5673_v14  ;;  %v8138_v4 = vpop.permute.xlu0 %5747 }
 0x31a   : > { %v3966_v43 = vsel %vm3951_vm4, %v3933_v63, %v5674_v0  ;;  %v3967_v1 = vsel %vm3951_vm4, %v3934_v9, %v5675_v42  ;;  %v5645_v42 = vunpack.i.h.bf16 %v8091_v38  ;;  %v5644_v0 = vunpack.i.l.bf16 %v8091_v38 }
 0x31b   : > { %v5678_v47 = vpop.permute.xlu1 %5677  ;;  %v3998_v40 = vpack.c.bf16 %v3967_v1, %v3966_v43  ;;  %v5655_v38 = vunpack.i.h.bf16 %v8100_v62 }
 0x31c   : > { %v5680_v8 = vunpack.i.h.bf16 %v5678_v47  ;;  %v5679_v54 = vunpack.i.l.bf16 %v5678_v47  ;;  %v8156_v53 = vpop.permute.xlu0 %5757 }
 0x31d   : > { %4232 = vmatmul.mubr.bf16.gmra.mxu1 %v3998_v40 }
 0x31e   : > { %4583 = vmatprep.mubr.msk.bf16.mxu1 %vm2480_vm12, %v4001_v49  ;;  %v3836_v10 = vsel %vm3819_vm15, %v7913_v13, %v5679_v54  ;;  %v3837_v28 = vsel %vm3819_vm15, %v7916_v50, %v5680_v8  ;;  %v5639_v13 = vunpack.i.l.bf16 %v8083_v21  ;;  %v2588_v21 = vld [vmem:[#allocation3 + $0xe0] sm:$0xff] }
 0x31f   : > { %v5683_v16 = vpop.permute.xlu1 %5682 }
 0x320   : > { %v5685_v2 = vunpack.i.h.bf16 %v5683_v16  ;;  %v5684_v35 = vunpack.i.l.bf16 %v5683_v16  ;;  %v5654_v16 = vunpack.i.l.bf16 %v8100_v62  ;;  %v8171_v8 = vpop.permute.xlu0 %5767 }
 0x322   : > { %v3869_v19 = vsel %vm3852_vm1, %v3836_v10, %v5684_v35  ;;  %v3870_v48 = vsel %vm3852_vm1, %v3837_v28, %v5685_v2 }
 0x323   : > { %v5688_v51 = vpop.permute.xlu1 %5687 }
 0x324   : > { %v5690_v36 = vunpack.i.h.bf16 %v5688_v51  ;;  %v5689_v52 = vunpack.i.l.bf16 %v5688_v51  ;;  %v8179_v62 = vpop.permute.xlu0 %5777 }
 0x326   : > { %v3902_v56 = vsel %vm3885_vm2, %v3869_v19, %v5689_v52  ;;  %v3903_v12 = vsel %vm3885_vm2, %v3870_v48, %v5690_v36 }
 0x327   : > { %v5693_v45 = vpop.permute.xlu1 %5692  ;;  %v3935_v50 = vsel %vm3918_vm3, %v3902_v56, %v5634_v3  ;;  %v3936_v34 = vsel %vm3918_vm3, %v3903_v12, %v5635_v55  ;;  %v5660_v56 = vunpack.i.h.bf16 %v8112_v33  ;;  %v5659_v12 = vunpack.i.l.bf16 %v8112_v33 }
 0x328   : > { %v5695_v25 = vunpack.i.h.bf16 %v5693_v45  ;;  %v5694_v29 = vunpack.i.l.bf16 %v5693_v45  ;;  %v3968_v57 = vsel %vm3951_vm4, %v3935_v50, %v5639_v13  ;;  %v3969_v15 = vsel %vm3951_vm4, %v3936_v34, %v5640_v58 }
 0x329   : > { %v4000_v26 = vpack.c.bf16 %v3969_v15, %v3968_v57  ;;  %v5665_v45 = vunpack.i.h.bf16 %v8121_v23  ;;  %v5664_v50 = vunpack.i.l.bf16 %v8121_v23  ;;  %v3774_v33 = vsel %vm2480_vm12, %v2589_v7, %v5659_v12  ;;  %v8195_v23 = vpop.permute.xlu0 %5787 }
 0x32a   : > { %v3773_v63 = vsel %vm2480_vm12, %v2588_v21, %v5695_v25  ;;  %v3772_v9 = vsel %vm2480_vm12, %v2587_v18, %v5694_v29  ;;  %v2590_v25 = vld [vmem:[#allocation3 + $0xf8] sm:$0xff]  ;;  %v8517_v29 = vpack.c.bf16 %v7684_v17, %v7682_v59 }
 0x32b   : > { %v5698_v44 = vpop.permute.xlu1 %5697  ;;  %4240 = vmatmul.mubr.bf16.gmra.mxu1 %v4000_v26  ;;  %v3775_v57 = vsel %vm2480_vm12, %v2590_v25, %v5660_v56  ;;  %v3807_v26 = vsel %vm3786_vm14, %v3774_v33, %v5664_v50 }
 0x32c   : > { %v5700_v61 = vunpack.i.h.bf16 %v5698_v44  ;;  %v5699_v14 = vunpack.i.l.bf16 %v5698_v44  ;;  %4584 = vmatprep.mubr.msk.bf16.mxu1 %vm2480_vm12, %v4003_v60  ;;  %v3808_v44 = vsel %vm3786_vm14, %v3775_v57, %v5665_v45 }
 0x32e   : > { %v3805_v43 = vsel %vm3786_vm14, %v3772_v9, %v5699_v14  ;;  %v3806_v1 = vsel %vm3786_vm14, %v3773_v63, %v5700_v61  ;;  %v5730_v14 = vunpack.i.h.bf16 %v8127_v32 }
 0x32f   : > { %v3838_v47 = vsel %vm3819_vm15, %v3805_v43, %v5644_v0  ;;  %v3839_v40 = vsel %vm3819_vm15, %v3806_v1, %v5645_v42  ;;  %v5703_v49 = vpop.permute.xlu1 %5702  ;;  %v5729_v42 = vunpack.i.l.bf16 %v8127_v32 }
 0x330   : > { %v3871_v54 = vsel %vm3852_vm1, %v3838_v47, %v5649_v37  ;;  %v3872_v2 = vsel %vm3852_vm1, %v3839_v40, %v5650_v27  ;;  %v5705_v41 = vunpack.i.h.bf16 %v5703_v49  ;;  %v5704_v35 = vunpack.i.l.bf16 %v5703_v49  ;;  %v8207_v47 = vpop.permute.xlu0 %5797 }
 0x331   : > { %v3904_v51 = vsel %vm3885_vm2, %v3871_v54, %v5654_v16  ;;  %v3905_v10 = vsel %vm3885_vm2, %v3872_v2, %v5655_v38  ;;  %v5740_v27 = vunpack.i.h.bf16 %v8135_v24  ;;  %v5739_v37 = vunpack.i.l.bf16 %v8135_v24  ;;  %v2848_v54 = vld [vmem:[#allocation3 + $0x13a] sm:$0xff]  ;;  %v2849_v2 = vld [vmem:[#allocation3 + $0x142] sm:$0xff] }
 0x332   : > { %v3937_v55 = vsel %vm3918_vm3, %v3904_v51, %v5704_v35  ;;  %v3938_v3 = vsel %vm3918_vm3, %v3905_v10, %v5705_v41  ;;  %v2591_v24 = vld [vmem:[#allocation3 + $0x108] sm:$0xff]  ;;  %v2592_v51 = vld [vmem:[#allocation3 + $0x110] sm:$0xff] }
 0x333   : > { %v5708_v28 = vpop.permute.xlu1 %5707 }
 0x334   : > { %v5710_v36 = vunpack.i.h.bf16 %v5708_v28  ;;  %v5709_v52 = vunpack.i.l.bf16 %v5708_v28 }
 0x336   : > { %v3970_v19 = vsel %vm3951_vm4, %v3937_v55, %v5709_v52  ;;  %v3971_v48 = vsel %vm3951_vm4, %v3938_v3, %v5710_v36  ;;  %v4007_v52 = vpack.c.bf16 %v2849_v2, %v2848_v54  ;;  %v5750_v55 = vunpack.i.h.bf16 %v8138_v4 }
 0x337   : > { %v5713_v58 = vpop.permute.xlu1 %5712  ;;  %v4002_v13 = vpack.c.bf16 %v3971_v48, %v3970_v19  ;;  %v5749_v3 = vunpack.i.l.bf16 %v8138_v4  ;;  %v8217_v48 = vpop.permute.xlu0 %5807  ;;  %v5759_v4 = vunpack.i.l.bf16 %v8156_v53 }
 0x338   : > { %v5715_v34 = vunpack.i.h.bf16 %v5713_v58  ;;  %v5714_v46 = vunpack.i.l.bf16 %v5713_v58 }
 0x339   : > { %4248 = vmatmul.mubr.bf16.gmra.mxu1 %v4002_v13 }
 0x33a   : > { %4585 = vmatprep.mubr.msk.bf16.mxu1 %vm2480_vm12, %v8517_v29  ;;  %v3840_v21 = vsel %vm3819_vm15, %v3807_v26, %v5714_v46  ;;  %v3841_v61 = vsel %vm3819_vm15, %v3808_v44, %v5715_v34  ;;  %v5760_v34 = vunpack.i.h.bf16 %v8156_v53  ;;  %v5770_v44 = vunpack.i.h.bf16 %v8171_v8 }
 0x33b   : > { %v5723_v15 = vpop.permute.xlu1 %5722  ;;  %v8228_v33 = vpop.permute.xlu0 %5817 }
 0x33c   : > { %v5725_v60 = vunpack.i.h.bf16 %v5723_v15  ;;  %v5724_v18 = vunpack.i.l.bf16 %v5723_v15 }
 0x33e   : > { %v3873_v59 = vsel %vm3852_vm1, %v3840_v21, %v5724_v18  ;;  %v3874_v17 = vsel %vm3852_vm1, %v3841_v61, %v5725_v60  ;;  %v5769_v60 = vunpack.i.l.bf16 %v8171_v8  ;;  %v5780_v61 = vunpack.i.h.bf16 %v8179_v62 }
 0x33f   : > { %v5733_v0 = vpop.permute.xlu1 %5732  ;;  %v3906_v43 = vsel %vm3885_vm2, %v3873_v59, %v5729_v42  ;;  %v3907_v1 = vsel %vm3885_vm2, %v3874_v17, %v5730_v14  ;;  %v5779_v59 = vunpack.i.l.bf16 %v8179_v62 }
 0x340   : > { %v5735_v63 = vunpack.i.h.bf16 %v5733_v0  ;;  %v5734_v9 = vunpack.i.l.bf16 %v5733_v0 }
 0x341   : > { %v3778_v62 = vsel %vm2480_vm12, %v7857_v6, %v5779_v59 }
 0x342   : > { %v3939_v40 = vsel %vm3918_vm3, %v3906_v43, %v5734_v9  ;;  %v3940_v49 = vsel %vm3918_vm3, %v3907_v1, %v5735_v63  ;;  %v3779_v43 = vsel %vm2480_vm12, %v7849_v39, %v5780_v61 }
 0x343   : > { %v5743_v38 = vpop.permute.xlu1 %5742  ;;  %v3972_v32 = vsel %vm3951_vm4, %v3939_v40, %v5739_v37  ;;  %v3973_v16 = vsel %vm3951_vm4, %v3940_v49, %v5740_v27  ;;  %v8240_v27 = vpop.permute.xlu0 %5827  ;;  %v8518_v49 = vpack.c.bf16 %v7720_v30, %v7716_v5  ;;  %v5800_v5 = vunpack.i.h.bf16 %v8207_v47 }
 0x344   : > { %v5745_v41 = vunpack.i.h.bf16 %v5743_v38  ;;  %v5744_v35 = vunpack.i.l.bf16 %v5743_v38  ;;  %v4004_v10 = vpack.c.bf16 %v3973_v16, %v3972_v32  ;;  %v5790_v38 = vunpack.i.h.bf16 %v8195_v23 }
 0x345   : > { %v5789_v32 = vunpack.i.l.bf16 %v8195_v23  ;;  %v5799_v30 = vunpack.i.l.bf16 %v8207_v47  ;;  %v5810_v23 = vunpack.i.h.bf16 %v8217_v48 }
 0x346   : > { %v3777_v28 = vsel %vm2480_vm12, %v2592_v51, %v5745_v41  ;;  %v3776_v36 = vsel %vm2480_vm12, %v2591_v24, %v5744_v35  ;;  %4256 = vmatmul.mubr.bf16.gmra.mxu1 %v4004_v10 }
 0x347   : > { %v5753_v19 = vpop.permute.xlu1 %5752  ;;  %4586 = vmatprep.mubr.msk.bf16.mxu1 %vm2480_vm12, %v4007_v52  ;;  %v3809_v58 = vsel %vm3786_vm14, %v3776_v36, %v5749_v3  ;;  %v3810_v13 = vsel %vm3786_vm14, %v3777_v28, %v5750_v55  ;;  %v5838_v41 = vpop.permute.xlu0 %5837  ;;  %v5809_v36 = vunpack.i.l.bf16 %v8217_v48  ;;  %v2595_v48 = vld [vmem:[#allocation3 + $0x138] sm:$0xff] }
 0x348   : > { %v5755_v56 = vunpack.i.h.bf16 %v5753_v19  ;;  %v5754_v12 = vunpack.i.l.bf16 %v5753_v19 }
 0x34a   : > { %v3842_v45 = vsel %vm3819_vm15, %v3809_v58, %v5754_v12  ;;  %v3843_v50 = vsel %vm3819_vm15, %v3810_v13, %v5755_v56  ;;  %v2852_v56 = vld [vmem:[#allocation3 + $0x16a] sm:$0xff]  ;;  %v2853_v12 = vld [vmem:[#allocation3 + $0x172] sm:$0xff] }
 0x34b   : > { %v5763_v46 = vpop.permute.xlu1 %5762  ;;  %v3875_v29 = vsel %vm3852_vm1, %v3842_v45, %v5759_v4  ;;  %v3876_v57 = vsel %vm3852_vm1, %v3843_v50, %v5760_v34  ;;  %v5848_v45 = vpop.permute.xlu0 %5847 }
 0x34c   : > { %v5765_v7 = vunpack.i.h.bf16 %v5763_v46  ;;  %v5764_v25 = vunpack.i.l.bf16 %v5763_v46  ;;  %v2596_v46 = vld [vmem:[#allocation3 + $0x140] sm:$0xff] }
 0x34e   : > { %v3908_v15 = vsel %vm3885_vm2, %v3875_v29, %v5764_v25  ;;  %v3909_v26 = vsel %vm3885_vm2, %v3876_v57, %v5765_v7  ;;  %v4011_v7 = vpack.c.bf16 %v2853_v12, %v2852_v56  ;;  %v5820_v57 = vunpack.i.h.bf16 %v8228_v33 }
 0x34f   : > { %v5773_v18 = vpop.permute.xlu1 %5772  ;;  %v3941_v17 = vsel %vm3918_vm3, %v3908_v15, %v5769_v60  ;;  %v3942_v14 = vsel %vm3918_vm3, %v3909_v26, %v5770_v44  ;;  %v5819_v15 = vunpack.i.l.bf16 %v8228_v33  ;;  %v8519_v56 = vpack.c.bf16 %v7757_v11, %v7753_v20  ;;  %v5936_v11 = vld [vmem:[%s6248_s30 + $0x8] sm:$0xff] }
 0x350   : > { %v5775_v21 = vunpack.i.h.bf16 %v5773_v18  ;;  %v5774_v53 = vunpack.i.l.bf16 %v5773_v18 }
 0x352   : > { %v3974_v42 = vsel %vm3951_vm4, %v3941_v17, %v5774_v53  ;;  %v3975_v0 = vsel %vm3951_vm4, %v3942_v14, %v5775_v21  ;;  %v5858_v53 = vpop.permute.xlu0 %5857  ;;  %v5830_v17 = vunpack.i.h.bf16 %v8240_v27  ;;  %v5829_v14 = vunpack.i.l.bf16 %v8240_v27  ;;  %v8286_v27 = vld [vmem:[%s8437_s7] ss:$0 sm:$0xff] }
 0x353   : > { %v5783_v63 = vpop.permute.xlu1 %5782  ;;  %v4006_v9 = vpack.c.bf16 %v3975_v0, %v3974_v42  ;;  %v5860_v12 = vunpack.i.h.bf16 %v5858_v53 }
 0x354   : > { %v5785_v8 = vunpack.i.h.bf16 %v5783_v63  ;;  %v5784_v37 = vunpack.i.l.bf16 %v5783_v63 }
 0x355   : > { %4264 = vmatmul.mubr.bf16.gmra.mxu1 %v4006_v9 }
 0x356   : > { %v3811_v1 = vsel %vm3786_vm14, %v3778_v62, %v5784_v37  ;;  %v3812_v40 = vsel %vm3786_vm14, %v3779_v43, %v5785_v8  ;;  %4587 = vmatprep.mubr.msk.bf16.mxu1 %vm2480_vm12, %v8518_v49  ;;  %v5840_v43 = vunpack.i.h.bf16 %v5838_v41  ;;  %v5839_v62 = vunpack.i.l.bf16 %v5838_v41 }
 0x357   : > { %v5793_v16 = vpop.permute.xlu1 %5792  ;;  %v3844_v2 = vsel %vm3819_vm15, %v3811_v1, %v5789_v32  ;;  %v3845_v6 = vsel %vm3819_vm15, %v3812_v40, %v5790_v38  ;;  %v5868_v40 = vpop.permute.xlu0 %5867  ;;  %v5850_v32 = vunpack.i.h.bf16 %v5848_v45 }
 0x358   : > { %v5795_v54 = vunpack.i.h.bf16 %v5793_v16  ;;  %v5794_v39 = vunpack.i.l.bf16 %v5793_v16  ;;  %v5849_v16 = vunpack.i.l.bf16 %v5848_v45 }
 0x35a   : > { %v3877_v35 = vsel %vm3852_vm1, %v3844_v2, %v5794_v39  ;;  %v3878_v24 = vsel %vm3852_vm1, %v3845_v6, %v5795_v54 }
 0x35b   : > { %v5803_v51 = vpop.permute.xlu1 %5802  ;;  %v3910_v52 = vsel %vm3885_vm2, %v3877_v35, %v5799_v30  ;;  %v3911_v55 = vsel %vm3885_vm2, %v3878_v24, %v5800_v5 }
 0x35c   : > { %v5805_v10 = vunpack.i.h.bf16 %v5803_v51  ;;  %v5804_v28 = vunpack.i.l.bf16 %v5803_v51 }
 0x35e   : > { %v3943_v3 = vsel %vm3918_vm3, %v3910_v52, %v5804_v28  ;;  %v3944_v19 = vsel %vm3918_vm3, %v3911_v55, %v5805_v10  ;;  %v3783_v10 = vsel %vm2480_vm12, %v7930_v22, %v5850_v32  ;;  %v3782_v28 = vsel %vm2480_vm12, %v7939_v31, %v5849_v16 }
 0x35f   : > { %v5813_v58 = vpop.permute.xlu1 %5812  ;;  %v3976_v47 = vsel %vm3951_vm4, %v3943_v3, %v5809_v36  ;;  %v3977_v13 = vsel %vm3951_vm4, %v3944_v19, %v5810_v23  ;;  %v5878_v36 = vpop.permute.xlu0 %5877  ;;  %v5935_v3 = vld [vmem:[%s6248_s30] sm:$0xff]  ;;  %v5859_v22 = vunpack.i.l.bf16 %v5858_v53 }
 0x360   : > { %v5815_v50 = vunpack.i.h.bf16 %v5813_v58  ;;  %v5814_v34 = vunpack.i.l.bf16 %v5813_v58  ;;  %v4008_v4 = vpack.c.bf16 %v3977_v13, %v3976_v47  ;;  %v5880_v53 = vunpack.i.h.bf16 %v5878_v36 }
 0x362   : > { %v3781_v25 = vsel %vm2480_vm12, %v2596_v46, %v5815_v50  ;;  %v3780_v29 = vsel %vm2480_vm12, %v2595_v48, %v5814_v34  ;;  %4272 = vmatmul.mubr.bf16.gmra.mxu1 %v4008_v4 }
 0x363   : > { %v5823_v26 = vpop.permute.xlu1 %5822  ;;  %4588 = vmatprep.mubr.msk.bf16.mxu1 %vm2480_vm12, %v4011_v7  ;;  %v3813_v18 = vsel %vm3786_vm14, %v3780_v29, %v5819_v15  ;;  %v3814_v21 = vsel %vm3786_vm14, %v3781_v25, %v5820_v57  ;;  %v5870_v25 = vunpack.i.h.bf16 %v5868_v40  ;;  %v5869_v29 = vunpack.i.l.bf16 %v5868_v40  ;;  %v5888_v15 = vpop.permute.xlu0 %5887 }
 0x364   : > { %v5825_v44 = vunpack.i.h.bf16 %v5823_v26  ;;  %v5824_v60 = vunpack.i.l.bf16 %v5823_v26 }
 0x366   : > { %v3846_v61 = vsel %vm3819_vm15, %v3813_v18, %v5824_v60  ;;  %v3847_v59 = vsel %vm3819_vm15, %v3814_v21, %v5825_v44  ;;  %v2856_v18 = vld [vmem:[#allocation3 + $0x19a] sm:$0xff]  ;;  %v2857_v21 = vld [vmem:[#allocation3 + $0x1a2] sm:$0xff] }
 0x367   : > { %v5833_v42 = vpop.permute.xlu1 %5832  ;;  %v3879_v63 = vsel %vm3852_vm1, %v3846_v61, %v5829_v14  ;;  %v3880_v9 = vsel %vm3852_vm1, %v3847_v59, %v5830_v17  ;;  %v5879_v61 = vunpack.i.l.bf16 %v5878_v36  ;;  %v5898_v32 = vpop.permute.xlu0 %5897 }
 0x368   : > { %v5835_v33 = vunpack.i.h.bf16 %v5833_v42  ;;  %v5834_v0 = vunpack.i.l.bf16 %v5833_v42 }
 0x36a   : > { %v3912_v8 = vsel %vm3885_vm2, %v3879_v63, %v5834_v0  ;;  %v3913_v37 = vsel %vm3885_vm2, %v3880_v9, %v5835_v33 }
 0x36b   : > { %v5843_v1 = vpop.permute.xlu1 %5842  ;;  %v3945_v54 = vsel %vm3918_vm3, %v3912_v8, %v5839_v62  ;;  %v3946_v39 = vsel %vm3918_vm3, %v3913_v37, %v5840_v43  ;;  %v4015_v43 = vpack.c.bf16 %v2857_v21, %v2856_v18 }
 0x36c   : > { %v5845_v49 = vunpack.i.h.bf16 %v5843_v1  ;;  %v5844_v38 = vunpack.i.l.bf16 %v5843_v1 }
 0x36e   : > { %v3978_v2 = vsel %vm3951_vm4, %v3945_v54, %v5844_v38  ;;  %v3979_v6 = vsel %vm3951_vm4, %v3946_v39, %v5845_v49  ;;  %v2599_v49 = vld [vmem:[#allocation3 + $0x168] sm:$0xff]  ;;  %v2600_v38 = vld [vmem:[#allocation3 + $0x170] sm:$0xff]  ;;  %v5890_v39 = vunpack.i.h.bf16 %v5888_v15 }
 0x36f   : > { %v5853_v41 = vpop.permute.xlu1 %5852  ;;  %v4010_v24 = vpack.c.bf16 %v3979_v6, %v3978_v2  ;;  %v5889_v2 = vunpack.i.l.bf16 %v5888_v15 }
 0x370   : > { %v4177_v35 = vpop.f32.mrf.mxu0  ;;  %v5855_v5 = vunpack.i.h.bf16 %v5853_v41  ;;  %v5854_v30 = vunpack.i.l.bf16 %v5853_v41 }
 0x371   : > { %v4178_v51 = vadd.f32 %v8286_v27, %v4177_v35  ;;  %4280 = vmatmul.mubr.bf16.gmra.mxu1 %v4010_v24 }
 0x372   : > { %v4179_v23 = vpop.f32.mrf.mxu0  ;;  %v3815_v52 = vsel %vm3786_vm14, %v3782_v28, %v5854_v30  ;;  %v3816_v55 = vsel %vm3786_vm14, %v3783_v10, %v5855_v5  ;;  %4589 = vmatprep.mubr.msk.bf16.mxu1 %vm2480_vm12, %v8519_v56  ;;  %v5908_v10 = vpop.permute.xlu0 %5907  ;;  %v5900_v28 = vunpack.i.h.bf16 %v5898_v32 }
 0x373   : > { %v4304_v19 = vsub.f32 %v4178_v51, %v5935_v3  ;;  %v5863_v58 = vpop.permute.xlu1 %5862  ;;  %v3848_v50 = vsel %vm3819_vm15, %v3815_v52, %v5859_v22  ;;  %v3849_v34 = vsel %vm3819_vm15, %v3816_v55, %v5860_v12  ;;  %v5899_v23 = vunpack.i.l.bf16 %v5898_v32 }
 0x374   : > { %v4180_v47 = vpop.f32.mrf.mxu0  ;;  %v5865_v31 = vunpack.i.h.bf16 %v5863_v58  ;;  %v5864_v13 = vunpack.i.l.bf16 %v5863_v58  ;;  %v5910_v56 = vunpack.i.h.bf16 %v5908_v10  ;;  %v5909_v12 = vunpack.i.l.bf16 %v5908_v10 }
 0x375   : > { %v4181_v45 = vadd.f32 %v8286_v27, %v4180_v47  ;;  %v4336_v48 = vmul.f32 %v4304_v19, %v4304_v19 }
 0x376   : > { %v4182_v4 = vpop.f32.mrf.mxu0  ;;  %v3881_v46 = vsel %vm3852_vm1, %v3848_v50, %v5864_v13  ;;  %v3882_v20 = vsel %vm3852_vm1, %v3849_v34, %v5865_v31 }
 0x377   : > { %v4305_v7 = vsub.f32 %v4181_v45, %v5936_v11  ;;  %v5873_v57 = vpop.permute.xlu1 %5872  ;;  %v3914_v59 = vsel %vm3885_vm2, %v3881_v46, %v5869_v29  ;;  %v3915_v17 = vsel %vm3885_vm2, %v3882_v20, %v5870_v25  ;;  %v4368_v14 = vsel %vm528_vm0, %v4336_v48, 0.0 }
 0x378   : > { %v5875_v44 = vunpack.i.h.bf16 %v5873_v57  ;;  %v5874_v60 = vunpack.i.l.bf16 %v5873_v57 }
 0x379   : > { %v4337_v26 = vmul.f32 %v4305_v7, %v4305_v7  ;;  %v5937_v7 = vld [vmem:[%s6248_s30 + $0x10] sm:$0xff] }
 0x37a   : > { %v3947_v33 = vsel %vm3918_vm3, %v3914_v59, %v5874_v60  ;;  %v3948_v0 = vsel %vm3918_vm3, %v3915_v17, %v5875_v44  ;;  %v5938_v60 = vld [vmem:[%s6248_s30 + $0x18] sm:$0xff] }
 0x37b   : > { %v4369_v42 = vsel %vm528_vm0, %v4337_v26, 0.0  ;;  %v5883_v9 = vpop.permute.xlu1 %5882  ;;  %v3980_v8 = vsel %vm3951_vm4, %v3947_v33, %v5879_v61  ;;  %v3981_v37 = vsel %vm3951_vm4, %v3948_v0, %v5880_v53  ;;  %v5939_v33 = vld [vmem:[%s6248_s30 + $0x20] sm:$0xff] }
 0x37c   : > { %v4370_v63 = vadd.f32 %v4369_v42, %v4368_v14  ;;  %v5885_v62 = vunpack.i.h.bf16 %v5883_v9  ;;  %v5884_v1 = vunpack.i.l.bf16 %v5883_v9  ;;  %v4012_v40 = vpack.c.bf16 %v3981_v37, %v3980_v8 }
 0x37e   : > { %v3785_v16 = vsel %vm2480_vm12, %v2600_v38, %v5885_v62  ;;  %v3784_v54 = vsel %vm2480_vm12, %v2599_v49, %v5884_v1  ;;  %4288 = vmatmul.mubr.bf16.gmra.mxu1 %v4012_v40  ;;  %v5940_v1 = vld [vmem:[%s6248_s30 + $0x28] sm:$0xff] }
 0x37f   : > { %v5893_v6 = vpop.permute.xlu1 %5892  ;;  %4590 = vmatprep.mubr.msk.bf16.mxu1 %vm2480_vm12, %v4015_v43  ;;  %v3817_v24 = vsel %vm3786_vm14, %v3784_v54, %v5889_v2  ;;  %v3818_v5 = vsel %vm3786_vm14, %v3785_v16, %v5890_v39 }
 0x380   : > { %v5895_v41 = vunpack.i.h.bf16 %v5893_v6  ;;  %v5894_v35 = vunpack.i.l.bf16 %v5893_v6 }
 0x382   : > { %v3850_v30 = vsel %vm3819_vm15, %v3817_v24, %v5894_v35  ;;  %v3851_v51 = vsel %vm3819_vm15, %v3818_v5, %v5895_v41  ;;  %v5941_v35 = vld [vmem:[%s6248_s30 + $0x30] sm:$0xff] }
 0x383   : > { %v5903_v36 = vpop.permute.xlu1 %5902  ;;  %v3883_v3 = vsel %vm3852_vm1, %v3850_v30, %v5899_v23  ;;  %v3884_v19 = vsel %vm3852_vm1, %v3851_v51, %v5900_v28 }
 0x384   : > { %v5905_v52 = vunpack.i.h.bf16 %v5903_v36  ;;  %v5904_v55 = vunpack.i.l.bf16 %v5903_v36 }
 0x386   : > { %v3916_v22 = vsel %vm3885_vm2, %v3883_v3, %v5904_v55  ;;  %v3917_v58 = vsel %vm3885_vm2, %v3884_v19, %v5905_v52  ;;  %v5942_v52 = vld [vmem:[%s6248_s30 + $0x38] sm:$0xff] }
 0x387   : > { %v5913_v47 = vpop.permute.xlu1 %5912  ;;  %v3949_v45 = vsel %vm3918_vm3, %v3916_v22, %v5909_v12  ;;  %v3950_v50 = vsel %vm3918_vm3, %v3917_v58, %v5910_v56 }
 0x388   : > { %v5915_v31 = vunpack.i.h.bf16 %v5913_v47  ;;  %v5914_v13 = vunpack.i.l.bf16 %v5913_v47 }
 0x38a   : > { %v3982_v34 = vsel %vm3951_vm4, %v3949_v45, %v5914_v13  ;;  %v3983_v4 = vsel %vm3951_vm4, %v3950_v50, %v5915_v31 }
 0x38b   : > { %v4014_v48 = vpack.c.bf16 %v3983_v4, %v3982_v34  ;;  %v5943_v4 = vld [vmem:[%s6248_s30 + $0x40] sm:$0xff] }
 0x38d   : > { %4296 = vmatmul.mubr.bf16.gmra.mxu1 %v4014_v48 }
 0x392   : > { %v4185_v46 = vpop.f32.mrf.mxu0 }
 0x393   : > { %v4186_v20 = vadd.f32 %v8286_v27, %v4185_v46 }
 0x394   : > { %v4187_v11 = vpop.f32.mrf.mxu0 }
 0x395   : > { %v4306_v25 = vsub.f32 %v4186_v20, %v5937_v7  ;;  %v5944_v20 = vld [vmem:[%s6248_s30 + $0x50] sm:$0xff] }
 0x396   : > { %v4188_v29 = vpop.f32.mrf.mxu0 }
 0x397   : > { %v4338_v57 = vmul.f32 %v4306_v25, %v4306_v25  ;;  %v4189_v15 = vadd.f32 %v8286_v27, %v4188_v29 }
 0x398   : > { %v4190_v26 = vpop.f32.mrf.mxu0 }
 0x399   : > { %v4371_v44 = vsel %vm528_vm0, %v4338_v57, 0.0  ;;  %v4307_v18 = vsub.f32 %v4189_v15, %v5938_v60  ;;  %v5945_v15 = vld [vmem:[%s6248_s30 + $0x58] sm:$0xff] }
 0x39a   : > { %v4372_v21 = vadd.f32 %v4371_v44, %v4370_v63 }
 0x39b   : > { %v4339_v53 = vmul.f32 %v4307_v18, %v4307_v18  ;;  %v5946_v18 = vld [vmem:[%s6248_s30 + $0x48] sm:$0xff] }
 0x39d   : > { %v4373_v61 = vsel %vm528_vm0, %v4339_v53, 0.0 }
 0x39e   : > { %v4374_v59 = vadd.f32 %v4373_v61, %v4372_v21 }
 0x3a0   : > { %v4193_v17 = vpop.f32.mrf.mxu0 }
 0x3a1   : > { %v4194_v14 = vadd.f32 %v8286_v27, %v4193_v17 }
 0x3a2   : > { %v4195_v42 = vpop.f32.mrf.mxu0 }
 0x3a3   : > { %v4308_v0 = vsub.f32 %v4194_v14, %v5939_v33  ;;  %v5948_v33 = vld [vmem:[%s6248_s30 + $0x68] sm:$0xff] }
 0x3a4   : > { %v4196_v9 = vpop.f32.mrf.mxu0 }
 0x3a5   : > { %v4340_v8 = vmul.f32 %v4308_v0, %v4308_v0  ;;  %v4197_v37 = vadd.f32 %v8286_v27, %v4196_v9 }
 0x3a6   : > { %v4198_v43 = vpop.f32.mrf.mxu0 }
 0x3a7   : > { %v4375_v62 = vsel %vm528_vm0, %v4340_v8, 0.0  ;;  %v4309_v63 = vsub.f32 %v4197_v37, %v5940_v1 }
 0x3a8   : > { %v4376_v40 = vadd.f32 %v4375_v62, %v4374_v59  ;;  %v5947_v59 = vld [vmem:[%s6248_s30 + $0x60] sm:$0xff] }
 0x3a9   : > { %v4341_v49 = vmul.f32 %v4309_v63, %v4309_v63 }
 0x3ab   : > { %v4377_v38 = vsel %vm528_vm0, %v4341_v49, 0.0 }
 0x3ac   : > { %v4378_v32 = vadd.f32 %v4377_v38, %v4376_v40 }
 0x3b5   : > { %v4217_v16 = vpop.f32.mrf.mxu1 }
 0x3b6   : > { %v4218_v13 = vadd.f32 %v8286_v27, %v4217_v16 }
 0x3b7   : > { %v4219_v54 = vpop.f32.mrf.mxu1 }
 0x3b8   : > { %v4201_v39 = vpop.f32.mrf.mxu0  ;;  %v4314_v11 = vsub.f32 %v4218_v13, %v5944_v20 }
 0x3b9   : > { %v4202_v2 = vadd.f32 %v8286_v27, %v4201_v39  ;;  %v4220_v6 = vpop.f32.mrf.mxu1 }
 0x3ba   : > { %v4203_v41 = vpop.f32.mrf.mxu0  ;;  %v4221_v34 = vadd.f32 %v8286_v27, %v4220_v6  ;;  %v4346_v61 = vmul.f32 %v4314_v11, %v4314_v11 }
 0x3bb   : > { %v4310_v24 = vsub.f32 %v4202_v2, %v5941_v35  ;;  %v4222_v5 = vpop.f32.mrf.mxu1 }
 0x3bc   : > { %v4204_v30 = vpop.f32.mrf.mxu0  ;;  %v4315_v26 = vsub.f32 %v4221_v34, %v5945_v15  ;;  %v4387_v43 = vsel %vm528_vm0, %v4346_v61, 0.0 }
 0x3bd   : > { %v4342_v51 = vmul.f32 %v4310_v24, %v4310_v24  ;;  %v4205_v10 = vadd.f32 %v8286_v27, %v4204_v30  ;;  %v4225_v28 = vpop.f32.mrf.mxu1  ;;  %v5950_v30 = vld [vmem:[%s6248_s30 + $0x78] sm:$0xff] }
 0x3be   : > { %v4206_v23 = vpop.f32.mrf.mxu0  ;;  %v4226_v7 = vadd.f32 %v8286_v27, %v4225_v28  ;;  %v4347_v42 = vmul.f32 %v4315_v26, %v4315_v26 }
 0x3bf   : > { %v4379_v36 = vsel %vm528_vm0, %v4342_v51, 0.0  ;;  %v4311_v55 = vsub.f32 %v4205_v10, %v5942_v52  ;;  %v4227_v3 = vpop.f32.mrf.mxu1 }
 0x3c0   : > { %v4380_v19 = vadd.f32 %v4379_v36, %v4378_v32  ;;  %v4316_v17 = vsub.f32 %v4226_v7, %v5947_v59  ;;  %v4389_v49 = vsel %vm528_vm0, %v4347_v42, 0.0  ;;  %v5949_v32 = vld [vmem:[%s6248_s30 + $0x70] sm:$0xff] }
 0x3c1   : > { %v4343_v56 = vmul.f32 %v4311_v55, %v4311_v55  ;;  %v4228_v12 = vpop.f32.mrf.mxu1 }
 0x3c2   : > { %v4229_v44 = vadd.f32 %v8286_v27, %v4228_v12  ;;  %v4348_v62 = vmul.f32 %v4316_v17, %v4316_v17  ;;  %v5951_v12 = vld [vmem:[%s6248_s30 + $0x80] sm:$0xff] }
 0x3c3   : > { %v4381_v22 = vsel %vm528_vm0, %v4343_v56, 0.0  ;;  %v4230_v58 = vpop.f32.mrf.mxu1 }
 0x3c4   : > { %v4382_v47 = vadd.f32 %v4381_v22, %v4380_v19  ;;  %v4317_v0 = vsub.f32 %v4229_v44, %v5948_v33  ;;  %v4391_v2 = vsel %vm528_vm0, %v4348_v62, 0.0 }
 0x3c6   : > { %v4349_v38 = vmul.f32 %v4317_v0, %v4317_v0 }
 0x3c8   : > { %v4393_v5 = vsel %vm528_vm0, %v4349_v38, 0.0 }
 0x3d2   : > { %v4209_v31 = vpop.f32.mrf.mxu0 }
 0x3d3   : > { %v4210_v45 = vadd.f32 %v8286_v27, %v4209_v31 }
 0x3d4   : > { %v4211_v50 = vpop.f32.mrf.mxu0 }
 0x3d5   : > { %v4312_v48 = vsub.f32 %v4210_v45, %v5943_v4  ;;  %v5952_v50 = vld [vmem:[%s6248_s30 + $0x88] sm:$0xff] }
 0x3d6   : > { %v4212_v46 = vpop.f32.mrf.mxu0 }
 0x3d7   : > { %v4344_v25 = vmul.f32 %v4312_v48, %v4312_v48  ;;  %v4213_v29 = vadd.f32 %v8286_v27, %v4212_v46 }
 0x3d8   : > { %v4214_v57 = vpop.f32.mrf.mxu0 }
 0x3d9   : > { %v4383_v60 = vsel %vm528_vm0, %v4344_v25, 0.0  ;;  %v4313_v21 = vsub.f32 %v4213_v29, %v5946_v18 }
 0x3da   : > { %v4384_v53 = vadd.f32 %v4383_v60, %v4382_v47 }
 0x3db   : > { %v4345_v14 = vmul.f32 %v4313_v21, %v4313_v21 }
 0x3dd   : > { %v4385_v9 = vsel %vm528_vm0, %v4345_v14, 0.0  ;;  %v4233_v37 = vpop.f32.mrf.mxu1 }
 0x3de   : > { %v4386_v8 = vadd.f32 %v4385_v9, %v4384_v53  ;;  %v4234_v1 = vadd.f32 %v8286_v27, %v4233_v37 }
 0x3df   : > { %v4235_v40 = vpop.f32.mrf.mxu1 }
 0x3e0   : > { %v4388_v63 = vadd.f32 %v4387_v43, %v4386_v8  ;;  %v4318_v16 = vsub.f32 %v4234_v1, %v5949_v32  ;;  %v5953_v8 = vld [vmem:[%s6248_s30 + $0x90] sm:$0xff]  ;;  %v5954_v1 = vld [vmem:[%s6248_s30 + $0x98] sm:$0xff]  ;;  %v5955_v32 = vld [vmem:[%s6248_s30 + $0xa0] sm:$0xff] }
 0x3e1   : > { %v4236_v39 = vpop.f32.mrf.mxu1 }
 0x3e2   : > { %v4390_v54 = vadd.f32 %v4389_v49, %v4388_v63  ;;  %v4350_v6 = vmul.f32 %v4318_v16, %v4318_v16  ;;  %v4237_v41 = vadd.f32 %v8286_v27, %v4236_v39 }
 0x3e3   : > { %v4238_v24 = vpop.f32.mrf.mxu1 }
 0x3e4   : > { %v4392_v35 = vadd.f32 %v4391_v2, %v4390_v54  ;;  %v4319_v51 = vsub.f32 %v4237_v41, %v5950_v30  ;;  %v4395_v28 = vsel %vm528_vm0, %v4350_v6, 0.0  ;;  %v5956_v2 = vld [vmem:[%s6248_s30 + $0xa8] sm:$0xff] }
 0x3e6   : > { %v4394_v10 = vadd.f32 %v4393_v5, %v4392_v35  ;;  %v4351_v23 = vmul.f32 %v4319_v51, %v4319_v51  ;;  %v5957_v5 = vld [vmem:[%s6248_s30 + $0xb0] sm:$0xff] }
 0x3e8   : > { %v4396_v36 = vadd.f32 %v4395_v28, %v4394_v10  ;;  %v4397_v52 = vsel %vm528_vm0, %v4351_v23, 0.0  ;;  %v5958_v23 = vld [vmem:[%s6248_s30 + $0xb8] sm:$0xff] }
 0x3ea   : > { %v4398_v55 = vadd.f32 %v4397_v52, %v4396_v36 }
 0x3eb   : > { %v4241_v3 = vpop.f32.mrf.mxu1 }
 0x3ec   : > { %v4242_v19 = vadd.f32 %v8286_v27, %v4241_v3 }
 0x3ed   : > { %v4243_v56 = vpop.f32.mrf.mxu1 }
 0x3ee   : > { %v4320_v22 = vsub.f32 %v4242_v19, %v5951_v12  ;;  %v5959_v12 = vld [vmem:[%s6248_s30 + $0xc0] sm:$0xff] }
 0x3ef   : > { %v4244_v58 = vpop.f32.mrf.mxu1 }
 0x3f0   : > { %v4352_v47 = vmul.f32 %v4320_v22, %v4320_v22  ;;  %v4245_v31 = vadd.f32 %v8286_v27, %v4244_v58 }
 0x3f1   : > { %v4246_v13 = vpop.f32.mrf.mxu1 }
 0x3f2   : > { %v4399_v45 = vsel %vm528_vm0, %v4352_v47, 0.0  ;;  %v4321_v34 = vsub.f32 %v4245_v31, %v5952_v50  ;;  %v5960_v50 = vld [vmem:[%s6248_s30 + $0xc8] sm:$0xff] }
 0x3f3   : > { %v4400_v4 = vadd.f32 %v4399_v45, %v4398_v55 }
 0x3f4   : > { %v4353_v48 = vmul.f32 %v4321_v34, %v4321_v34 }
 0x3f6   : > { %v4401_v46 = vsel %vm528_vm0, %v4353_v48, 0.0 }
 0x3f7   : > { %v4402_v20 = vadd.f32 %v4401_v46, %v4400_v4 }
 0x3f9   : > { %v4249_v11 = vpop.f32.mrf.mxu1 }
 0x3fa   : > { %v4250_v42 = vadd.f32 %v8286_v27, %v4249_v11 }
 0x3fb   : > { %v4251_v7 = vpop.f32.mrf.mxu1 }
 0x3fc   : > { %v4322_v37 = vsub.f32 %v4250_v42, %v5953_v8  ;;  %v5961_v7 = vld [vmem:[%s6248_s30 + $0xd0] sm:$0xff] }
 0x3fd   : > { %v4252_v25 = vpop.f32.mrf.mxu1 }
 0x3fe   : > { %v4253_v0 = vadd.f32 %v8286_v27, %v4252_v25  ;;  %v4354_v38 = vmul.f32 %v4322_v37, %v4322_v37 }
 0x3ff   : > { %v4254_v29 = vpop.f32.mrf.mxu1 }
 0x400   : > { %v4323_v63 = vsub.f32 %v4253_v0, %v5954_v1  ;;  %v4403_v35 = vsel %vm528_vm0, %v4354_v38, 0.0 }
 0x401   : > { %v4404_v3 = vadd.f32 %v4403_v35, %v4402_v20 }
 0x402   : > { %v4355_v39 = vmul.f32 %v4323_v63, %v4323_v63 }
 0x404   : > { %v4405_v10 = vsel %vm528_vm0, %v4355_v39, 0.0  ;;  %v5965_v39 = vld [vmem:[%s6248_s30 + $0xf0] sm:$0xff] }
 0x405   : > { %v4406_v31 = vadd.f32 %v4405_v10, %v4404_v3 }
 0x406   : > { %v4257_v57 = vpop.f32.mrf.mxu1 }
 0x407   : > { %v4258_v43 = vadd.f32 %v8286_v27, %v4257_v57 }
 0x408   : > { %v4259_v15 = vpop.f32.mrf.mxu1 }
 0x409   : > { %v4324_v16 = vsub.f32 %v4258_v43, %v5955_v32 }
 0x40a   : > { %v4260_v26 = vpop.f32.mrf.mxu1 }
 0x40b   : > { %v4261_v40 = vadd.f32 %v8286_v27, %v4260_v26  ;;  %v4356_v24 = vmul.f32 %v4324_v16, %v4324_v16 }
 0x40c   : > { %v4262_v44 = vpop.f32.mrf.mxu1 }
 0x40d   : > { %v4325_v6 = vsub.f32 %v4261_v40, %v5956_v2  ;;  %v4407_v19 = vsel %vm528_vm0, %v4356_v24, 0.0 }
 0x40e   : > { %v4408_v46 = vadd.f32 %v4407_v19, %v4406_v31 }
 0x40f   : > { %v4357_v28 = vmul.f32 %v4325_v6, %v4325_v6 }
 0x411   : > { %v4409_v13 = vsel %vm528_vm0, %v4357_v28, 0.0  ;;  %v5966_v28 = vld [vmem:[%s6248_s30 + $0xf8] sm:$0xff] }
 0x412   : > { %v4410_v15 = vadd.f32 %v4409_v13, %v4408_v46 }
 0x415   : > { %v4265_v60 = vpop.f32.mrf.mxu1 }
 0x416   : > { %v4266_v54 = vadd.f32 %v8286_v27, %v4265_v60  ;;  %v5962_v60 = vld [vmem:[%s6248_s30 + $0xd8] sm:$0xff] }
 0x417   : > { %v4267_v18 = vpop.f32.mrf.mxu1 }
 0x418   : > { %v4326_v30 = vsub.f32 %v4266_v54, %v5957_v5 }
 0x419   : > { %v4268_v21 = vpop.f32.mrf.mxu1 }
 0x41a   : > { %v4269_v41 = vadd.f32 %v8286_v27, %v4268_v21  ;;  %v4358_v56 = vmul.f32 %v4326_v30, %v4326_v30 }
 0x41b   : > { %v4270_v53 = vpop.f32.mrf.mxu1 }
 0x41c   : > { %v4327_v36 = vsub.f32 %v4269_v41, %v5958_v23  ;;  %v4411_v20 = vsel %vm528_vm0, %v4358_v56, 0.0 }
 0x41d   : > { %v4412_v53 = vadd.f32 %v4411_v20, %v4410_v15 }
 0x41e   : > { %v4359_v45 = vmul.f32 %v4327_v36, %v4327_v36 }
 0x420   : > { %v4413_v26 = vsel %vm528_vm0, %v4359_v45, 0.0 }
 0x421   : > { %v4414_v42 = vadd.f32 %v4413_v26, %v4412_v53 }
 0x422   : > { %v4273_v61 = vpop.f32.mrf.mxu1 }
 0x423   : > { %v4274_v51 = vadd.f32 %v8286_v27, %v4273_v61 }
 0x424   : > { %v4275_v59 = vpop.f32.mrf.mxu1 }
 0x425   : > { %v4328_v22 = vsub.f32 %v4274_v51, %v5959_v12 }
 0x426   : > { %v4276_v17 = vpop.f32.mrf.mxu1 }
 0x427   : > { %v4277_v52 = vadd.f32 %v8286_v27, %v4276_v17  ;;  %v4360_v11 = vmul.f32 %v4328_v22, %v4328_v22  ;;  %v5963_v17 = vld [vmem:[%s6248_s30 + $0xe0] sm:$0xff] }
 0x428   : > { %v4278_v14 = vpop.f32.mrf.mxu1 }
 0x429   : > { %v4329_v34 = vsub.f32 %v4277_v52, %v5960_v50  ;;  %v4415_v61 = vsel %vm528_vm0, %v4360_v11, 0.0 }
 0x42a   : > { %v4416_v37 = vadd.f32 %v4415_v61, %v4414_v42 }
 0x42b   : > { %v4361_v44 = vmul.f32 %v4329_v34, %v4329_v34 }
 0x431   : > { %v4281_v33 = vpop.f32.mrf.mxu1 }
 0x432   : > { %v4282_v58 = vadd.f32 %v8286_v27, %v4281_v33  ;;  %v4417_v33 = vsel %vm528_vm0, %v4361_v44, 0.0 }
 0x433   : > { %v4283_v9 = vpop.f32.mrf.mxu1  ;;  %v4418_v1 = vadd.f32 %v4417_v33, %v4416_v37 }
 0x434   : > { %v4330_v25 = vsub.f32 %v4282_v58, %v5961_v7  ;;  %v5964_v9 = vld [vmem:[%s6248_s30 + $0xe8] sm:$0xff]  ;;  %s362_s30 = scalar_lea.vmem %s8438_s8, %s6236_s20 }
 0x435   : > { %v4284_v62 = vpop.f32.mrf.mxu1 }
 0x436   : > { %v4285_v4 = vadd.f32 %v8286_v27, %v4284_v62  ;;  %v4362_v59 = vmul.f32 %v4330_v25, %v4330_v25 }
 0x437   : > { %v4286_v49 = vpop.f32.mrf.mxu1 }
 0x438   : > { %v4331_v18 = vsub.f32 %v4285_v4, %v5962_v60  ;;  %v4419_v43 = vsel %vm528_vm0, %v4362_v59, 0.0 }
 0x439   : > { %v4420_v32 = vadd.f32 %v4419_v43, %v4418_v1 }
 0x43a   : > { %v4363_v0 = vmul.f32 %v4331_v18, %v4331_v18 }
 0x43c   : > { %v4421_v40 = vsel %vm528_vm0, %v4363_v0, 0.0 }
 0x43d   : > { %v4422_v6 = vadd.f32 %v4421_v40, %v4420_v32 }
 0x43e   : > { %v4289_v55 = vpop.f32.mrf.mxu1 }
 0x43f   : > { %v4290_v29 = vadd.f32 %v8286_v27, %v4289_v55 }
 0x440   : > { %v4291_v47 = vpop.f32.mrf.mxu1 }
 0x441   : > { %v4332_v14 = vsub.f32 %v4290_v29, %v5963_v17 }
 0x442   : > { %v4292_v48 = vpop.f32.mrf.mxu1 }
 0x443   : > { %v4293_v21 = vadd.f32 %v8286_v27, %v4292_v48  ;;  %v4364_v62 = vmul.f32 %v4332_v14, %v4332_v14 }
 0x444   : > { %v4294_v57 = vpop.f32.mrf.mxu1 }
 0x445   : > { %v4333_v8 = vsub.f32 %v4293_v21, %v5964_v9  ;;  %v4423_v54 = vsel %vm528_vm0, %v4364_v62, 0.0 }
 0x446   : > { %v4424_v30 = vadd.f32 %v4423_v54, %v4422_v6 }
 0x447   : > { %v4365_v49 = vmul.f32 %v4333_v8, %v4333_v8 }
 0x449   : > { %v4425_v35 = vsel %vm528_vm0, %v4365_v49, 0.0 }
 0x44a   : > { %v4426_v36 = vadd.f32 %v4425_v35, %v4424_v30 }
 0x44d   : > { %v4297_v63 = vpop.f32.mrf.mxu1 }
 0x44e   : > { %v4298_v38 = vadd.f32 %v8286_v27, %v4297_v63 }
 0x44f   : > { %v4299_v16 = vpop.f32.mrf.mxu1 }
 0x450   : > { %v4334_v2 = vsub.f32 %v4298_v38, %v5965_v39 }
 0x451   : > { %v4300_v41 = vpop.f32.mrf.mxu1 }
 0x452   : > { %v4366_v24 = vmul.f32 %v4334_v2, %v4334_v2  ;;  %v4301_v5 = vadd.f32 %v8286_v27, %v4300_v41 }
 0x453   : > { %v4302_v51 = vpop.f32.mrf.mxu1 }
 0x454   : > { %v4427_v10 = vsel %vm528_vm0, %v4366_v24, 0.0  ;;  %v4335_v23 = vsub.f32 %v4301_v5, %v5966_v28 }
 0x455   : > { %v4428_v55 = vadd.f32 %v4427_v10, %v4426_v36 }
 0x456   : > { %v4367_v52 = vmul.f32 %v4335_v23, %v4335_v23 }
 0x458   : > { %v4429_v3 = vsel %vm528_vm0, %v4367_v52, 0.0 }
 0x459   : > { %v4430_v19 = vadd.f32 %v4429_v3, %v4428_v55 }
 0x45b   : > { %4431 = vadd.xlane.f32.xlu0 %v4430_v19 }
 0x4e4   : > { %v4432_v56 = vpop.xlane.xlu0 %4431 }
 0x4e5   : > { %v4433_v12 = vrot.slane %v4432_v56, 4 }
 0x4e7   : > { %v4434_v22 = vadd.f32 %v4433_v12, %v4432_v56 }
 0x4e9   : > { %v4435_v58 = vrot.slane %v4434_v22, 2 }
 0x4eb   : > { %v4436_v47 = vadd.f32 %v4435_v58, %v4434_v22 }
 0x4ed   : > { %v4437_v27 = vrot.slane %v4436_v47, 1 }
 0x4ef   : > { %v4438_v31 = vadd.f32 %v4437_v27, %v4436_v47 }
 0x4f1   : > { %4667 = vpush %v4438_v31 }
 0x522   : > { %s4668_s14 = spop %4667 }
 0x523   : > { %v4440_v13 = vstv %s4668_s14 }
 0x524   : > { %4442 = vst.msk [vmem:[%s362_s30] sm:$0x1] %vm4441_vm5, %v4440_v13 }
 0x525 PF: > { %s20_s27 = sadd.s32 1, %s6011_s27  }
 0x526   : > { %p17_p5 = scmp.ge.s32.totalorder %s20_s27, 4  }
 0x528   :  { %19 = sbr.rel (!%p17_p5) target bundleno = 2 (0x2), region = 101 }
 0x52d   :  { %4460 = vsyncpa [#allocation5], 1 }
 0x52e   :  { %4462 = vsyncpa [#allocation5 + $0x1], 1 }
 0x52f   :  { %4463 = vsyncpa [#allocation7], 1 }

</bundles_post_ra>
